<compile_context>
chip_gen: v6e
topology: v6e:2x2x1
jax: 0.10.0
libtpu: 0.0.40
codegen_flags: <defaults>
</compile_context>

<pallas_src>
import functools

import jax
import jax.numpy as jnp
from jax.experimental import pallas as pl
from jax.experimental.pallas import tpu as pltpu


# --------------------------------------------------------------------------- #
# Fused kernel: stacked per-coin LSTMs (block-diagonal, bf16 MXU) + attention + fc
# --------------------------------------------------------------------------- #
def make_fused_kernel(*, B, C, T, H, L):
    CH = C * H
    f32 = jnp.float32
    bf16 = jnp.bfloat16

    def kernel(x0_ref,                          # (T*B, C*F) bf16, time-major packed input
               wih0_ref, whh0_ref, b0_ref,      # (C*F,4CH) bf16, (CH,4CH) bf16, (1,4CH) f32
               wihr_ref, whhr_ref, br_ref,      # (L-1,CH,4CH) bf16 x2, (L-1,1,4CH) f32
               wqkv_ref, bqkv_ref,              # (CH,3CH) f32, (1,3CH) f32 (q pre-scaled)
               summat_ref, spread_ref,          # (CH,C*NH), (C*NH,C*NH) one-hot maps
               expand_ref, coinsum_ref,         # (C*NH,CH), (CH,H)       one-hot maps
               wof_ref, bof_ref,                # (H,Fo), (1,Fo)  (wo@wfc pre-folded)
               out_ref,                         # (B,Fo) f32
               seq_ref):                        # scratch (T*B, CH) f32 inter-layer sequence

        # ---------------- stacked LSTM, all C coins at once ----------------
        def run_layer(gin, whh_bf, store_seq):
            # gin: (T*B, 4CH) f32 = input projection + bias, hoisted off the serial path.
            h = jnp.zeros((B, CH), f32)
            c = jnp.zeros((B, CH), f32)
            for t in range(T):                               # fully unrolled, static T
                # serial-path matmul: bf16 operands, f32 accumulation (single MXU pass)
                g = gin[t * B:(t + 1) * B, :] + jnp.dot(
                    h.astype(bf16), whh_bf, preferred_element_type=f32)   # (B, 4CH)
                i_g = jax.nn.sigmoid(g[:, 0 * CH:1 * CH])    # vreg-aligned gate slices
                f_g = jax.nn.sigmoid(g[:, 1 * CH:2 * CH])
                g_g = jnp.tanh(g[:, 2 * CH:3 * CH])
                o_g = jax.nn.sigmoid(g[:, 3 * CH:4 * CH])
                c = f_g * c + i_g * g_g
                h = o_g * jnp.tanh(c)
                if store_seq:
                    seq_ref[pl.ds(t * B, B), :] = h
            return h

        gin0 = jnp.dot(x0_ref[...], wih0_ref[...],
                       preferred_element_type=f32) + b0_ref[...]          # (T*B, 4CH)
        h_last = run_layer(gin0, whh0_ref[...], store_seq=(L > 1))
        for l in range(1, L):
            # seq_ref is fully consumed by this matmul BEFORE run_layer overwrites it.
            gin = jnp.dot(seq_ref[...].astype(bf16), wihr_ref[l - 1],
                          preferred_element_type=f32) + br_ref[l - 1]
            h_last = run_layer(gin, whhr_ref[l - 1], store_seq=(l < L - 1))
        # h_last: (B, C*H), coin-major lanes: h_last[b, c*H + j] = final h of coin c.

        # ------- multi-head attention (target query only), lane-dense, batched -------
        qkv = jnp.dot(h_last, wqkv_ref[...],
                      preferred_element_type=f32) + bqkv_ref[...]         # (B, 3CH)
        q_rep = qkv[:, 0 * CH:1 * CH]      # target-coin query, scaled, tiled per coin
        k_all = qkv[:, 1 * CH:2 * CH]      # per-coin keys   (coin-major lanes)
        v_all = qkv[:, 2 * CH:3 * CH]      # per-coin values (coin-major lanes)

        s = jnp.dot(q_rep * k_all, summat_ref[...],
                    preferred_element_type=f32)                            # (B, C*NH) scores
        m = jnp.max(s, axis=1, keepdims=True)          # per-row constant: softmax-invariant
        e = jnp.exp(s - m)
        denom = jnp.dot(e, spread_ref[...], preferred_element_type=f32)    # per-head sums
        p = e * pl.reciprocal(denom, approx=True)                          # softmax over coins
        p_full = jnp.dot(p, expand_ref[...], preferred_element_type=f32)   # (B, CH)
        ctx = jnp.dot(p_full * v_all, coinsum_ref[...],
                      preferred_element_type=f32)                          # (B, H)

        out = jnp.dot(ctx, wof_ref[...],
                      preferred_element_type=f32) + bof_ref[...]           # (B, Fo)
        out_ref[...] = out.astype(out_ref.dtype)                           # single store

    return kernel


# --------------------------------------------------------------------------- #
# One-time parameter packing (hoisted out of the forward path)
# --------------------------------------------------------------------------- #
def pack_params(params, *, num_coins, num_heads, target_coin_index):
    lstm = params["lstm"]
    C = num_coins
    L = len(lstm[0])
    H = lstm[0][0]["whh"].shape[1]      # whh: (4H, H)
    F = lstm[0][0]["wih"].shape[1]      # layer-0 wih: (4H, F)
    CH = C * H
    NH = num_heads
    HD = H // NH
    scale = 1.0 / float(HD) ** 0.5
    f32 = jnp.float32
    bf16 = jnp.bfloat16

    def pack_layer(l, in_dim):
        # Block-diagonal over coins, gate-major over columns (PyTorch gate order i,f,g,o):
        #   wih[c*in + a, gt*CH + c*H + j] = wih_c[gt*H + j, a]
        wih = jnp.zeros((C * in_dim, 4 * CH), f32)
        whh = jnp.zeros((CH, 4 * CH), f32)
        bias = jnp.zeros((4 * CH,), f32)
        for c in range(C):
            p = lstm[c][l]
            for gt in range(4):
                col = gt * CH + c * H
                wih = wih.at[c * in_dim:(c + 1) * in_dim, col:col + H].set(
                    p["wih"][gt * H:(gt + 1) * H, :].T)
                whh = whh.at[c * H:(c + 1) * H, col:col + H].set(
                    p["whh"][gt * H:(gt + 1) * H, :].T)
                bias = bias.at[col:col + H].set(
                    p["bih"][gt * H:(gt + 1) * H] + p["bhh"][gt * H:(gt + 1) * H])
        return wih.astype(bf16), whh.astype(bf16), bias[None, :]

    wih0, whh0, b0 = pack_layer(0, F)
    if L > 1:
        rest = [pack_layer(l, H) for l in range(1, L)]
        wihr = jnp.stack([r[0] for r in rest])
        whhr = jnp.stack([r[1] for r in rest])
        br = jnp.stack([r[2] for r in rest])
    else:  # dummies, never read when L == 1
        wihr = jnp.zeros((1, CH, 4 * CH), bf16)
        whhr = jnp.zeros((1, CH, 4 * CH), bf16)
        br = jnp.zeros((1, 1, 4 * CH), f32)

    Wq, Wk, Wv = jnp.split(params["in_proj_w"], 3, axis=0)   # each (H, H)
    bq, bk, bv = jnp.split(params["in_proj_b"], 3)

    # Q: select target coin's hidden, project, pre-scale by 1/sqrt(HD), tile over coin lanes.
    wq_full = jnp.zeros((CH, CH), f32)
    wq_full = wq_full.at[target_coin_index * H:(target_coin_index + 1) * H, :].set(
        jnp.tile(Wq.T * scale, (1, C)))
    bq_rep = jnp.tile(bq * scale, C)[None, :]
    # K/V: block-diagonal per coin so attention stays in the (B, CH) coin-major lane layout.
    wk_bd = jnp.kron(jnp.eye(C, dtype=f32), Wk.T)
    wv_bd = jnp.kron(jnp.eye(C, dtype=f32), Wv.T)
    bk_rep = jnp.tile(bk, C)[None, :]
    bv_rep = jnp.tile(bv, C)[None, :]
    wqkv = jnp.concatenate([wq_full, wk_bd, wv_bd], axis=1)   # (CH, 3CH)
    bqkv = jnp.concatenate([bq_rep, bk_rep, bv_rep], axis=1)  # (1, 3CH)

    # One-hot maps for per-(coin, head) score reduction, softmax grouping and context.
    i = jnp.arange(CH)
    grp = (i // H) * NH + (i % H) // HD
    summat = jax.nn.one_hot(grp, C * NH, dtype=f32)            # (CH, C*NH)
    expand = summat.T                                          # (C*NH, CH)
    r = jnp.arange(C * NH)
    spread = (r[:, None] % NH == r[None, :] % NH).astype(f32)  # (C*NH, C*NH) same-head sum
    coinsum = jax.nn.one_hot(i % H, H, dtype=f32)              # (CH, H) sum over coins

    # Fold attention out_proj into fc: out = ctx @ (Wo^T @ Wfc^T) + (bo @ Wfc^T + bfc).
    wof = params["out_w"].T @ params["fc_w"].T                 # (H, Fo)
    bof = (params["out_b"] @ params["fc_w"].T + params["fc_b"])[None, :]

    return dict(wih0=wih0, whh0=whh0, b0=b0, wihr=wihr, whhr=whhr, br=br,
                wqkv=wqkv, bqkv=bqkv, summat=summat, spread=spread,
                expand=expand, coinsum=coinsum, wof=wof, bof=bof)


# --------------------------------------------------------------------------- #
# Forward wrapper (single fused pallas_call, no grid)
# --------------------------------------------------------------------------- #
@functools.partial(jax.jit, static_argnames=("output_window", "num_layers"))
def coinwise_forward(x, packed, *, output_window, num_layers):
    B, C, F, T = x.shape
    H = packed["coinsum"].shape[1]
    CH = C * H
    Fo = F * output_window

    # Time-major packed input: x0[t*B + b, c*F + f] = x[b, c, f, t]; bf16 to halve the DMA.
    x0 = jnp.transpose(x, (3, 0, 1, 2)).reshape(T * B, C * F).astype(jnp.bfloat16)

    kernel = make_fused_kernel(B=B, C=C, T=T, H=H, L=num_layers)
    out = pl.pallas_call(
        kernel,
        out_shape=jax.ShapeDtypeStruct((B, Fo), jnp.float32),
        scratch_shapes=[
            pltpu.VMEM((T * B, CH), jnp.float32),   # inter-layer sequence (reused in place)
        ],
    )(x0,
      packed["wih0"], packed["whh0"], packed["b0"],
      packed["wihr"], packed["whhr"], packed["br"],
      packed["wqkv"], packed["bqkv"],
      packed["summat"], packed["spread"], packed["expand"], packed["coinsum"],
      packed["wof"], packed["bof"])
    return out.reshape(B, F, output_window)


# --------------------------------------------------------------------------- #
# Pure-JAX f32 reference (mirrors the PyTorch forward, eval mode)
# --------------------------------------------------------------------------- #
def ref_forward(x, params, *, output_window, num_heads, target_coin_index):
    B, C, F, T = x.shape
    lstm = params["lstm"]
    L = len(lstm[0])
    H = lstm[0][0]["whh"].shape[1]

    hs = []
    for ci in range(C):
        inp = jnp.transpose(x[:, ci], (0, 2, 1))                 # (B, T, F)
        for l in range(L):
            p = lstm[ci][l]
            h = jnp.zeros((B, H), jnp.float32)
            c = jnp.zeros((B, H), jnp.float32)
            outs = []
            for t in range(T):
                g = inp[:, t] @ p["wih"].T + p["bih"] + h @ p["whh"].T + p["bhh"]
                i = jax.nn.sigmoid(g[:, :H])
                f = jax.nn.sigmoid(g[:, H:2 * H])
                gg = jnp.tanh(g[:, 2 * H:3 * H])
                o = jax.nn.sigmoid(g[:, 3 * H:])
                c = f * c + i * gg
                h = o * jnp.tanh(c)
                outs.append(h)
            inp = jnp.stack(outs, axis=1)
        hs.append(h)
    stack = jnp.stack(hs, axis=1)                                # (B, C, H)

    Wq, Wk, Wv = jnp.split(params["in_proj_w"], 3, axis=0)
    bq, bk, bv = jnp.split(params["in_proj_b"], 3)
    q = stack @ Wq.T + bq
    k = stack @ Wk.T + bk
    v = stack @ Wv.T + bv
    hd = H // num_heads
    qh = q.reshape(B, C, num_heads, hd).transpose(0, 2, 1, 3)
    kh = k.reshape(B, C, num_heads, hd).transpose(0, 2, 1, 3)
    vh = v.reshape(B, C, num_heads, hd).transpose(0, 2, 1, 3)
    s = jnp.einsum("bhqd,bhkd->bhqk", qh, kh) / jnp.sqrt(hd).astype(jnp.float32)
    p = jax.nn.softmax(s, axis=-1)
    ctx = jnp.einsum("bhqk,bhkd->bhqd", p, vh).transpose(0, 2, 1, 3).reshape(B, C, H)
    attn_out = ctx @ params["out_w"].T + params["out_b"]
    tgt = attn_out[:, target_coin_index]
    out = tgt @ params["fc_w"].T + params["fc_b"]
    return out.reshape(B, F, output_window)


# --------------------------------------------------------------------------- #
# Deterministic parameter init (shapes match the PyTorch module's __init__)
# --------------------------------------------------------------------------- #
def init_params(key, *, num_coins, output_features, hidden_dim, num_layers, output_window):
    C, F, H, L = num_coins, output_features, hidden_dim, num_layers
    Fo = F * output_window
    keys = jax.random.split(key, C * L * 4 + 6)

    def nrm(k, shape, scale=0.2):
        return (scale * jax.random.normal(k, shape)).astype(jnp.float32)

    lstm = []
    ki = 0
    for _c in range(C):
        layers = []
        for l in range(L):
            in_dim = F if l == 0 else H
            layers.append(dict(
                wih=nrm(keys[ki + 0], (4 * H, in_dim)),
                whh=nrm(keys[ki + 1], (4 * H, H)),
                bih=nrm(keys[ki + 2], (4 * H,)),
                bhh=nrm(keys[ki + 3], (4 * H,)),
            ))
            ki += 4
        lstm.append(layers)

    return dict(
        lstm=lstm,
        in_proj_w=nrm(keys[ki + 0], (3 * H, H)),
        in_proj_b=nrm(keys[ki + 1], (3 * H,)),
        out_w=nrm(keys[ki + 2], (H, H)),
        out_b=nrm(keys[ki + 3], (H,)),
        fc_w=nrm(keys[ki + 4], (Fo, H)),
        fc_b=nrm(keys[ki + 5], (Fo,)),
    )


if __name__ == "__main__":
    B = 2
    num_coins = 4
    output_features = 4
    input_window = 8
    output_window = 2
    hidden_dim = 32
    num_layers = 3
    num_heads = 4
    target_coin_index = 0

    key = jax.random.PRNGKey(0)
    kp, kx = jax.random.split(key)
    params = init_params(kp, num_coins=num_coins, output_features=output_features,
                         hidden_dim=hidden_dim, num_layers=num_layers,
                         output_window=output_window)
    x = jax.random.normal(kx, (B, num_coins, output_features, input_window), jnp.float32)

    # One-time packing (block-diagonal bf16 LSTM weights, fused/folded attention+fc weights).
    packed = pack_params(params, num_coins=num_coins, num_heads=num_heads,
                         target_coin_index=target_coin_index)

    out = coinwise_forward(x, packed, output_window=output_window,
                           num_layers=num_layers)
    out = jax.block_until_ready(out)
    assert out.shape == (B, output_features, output_window), out.shape

    ref = ref_forward(x, params, output_window=output_window,
                      num_heads=num_heads, target_coin_index=target_coin_index)
    err = float(jnp.max(jnp.abs(out - ref)))
    # bf16 MXU operands (f32 accumulation) vs. an all-f32 reference: 5e-2 abs is the
    # expected numerics envelope at these weight scales.
    if err > 5e-2:
        raise AssertionError(f"Pallas kernel mismatch vs reference: max abs err = {err}")

    print("KERNEL_OK")
</pallas_src>

<mosaic_0001>
module attributes {stable_mosaic.version = 11 : i64} {
  func.func @kernel(%arg0: memref<16x16xbf16, #tpu.memory_space<vmem>>, %arg1: memref<16x512xbf16, #tpu.memory_space<vmem>>, %arg2: memref<128x512xbf16, #tpu.memory_space<vmem>>, %arg3: memref<1x512xf32, #tpu.memory_space<vmem>>, %arg4: memref<2x128x512xbf16, #tpu.memory_space<vmem>>, %arg5: memref<2x128x512xbf16, #tpu.memory_space<vmem>>, %arg6: memref<2x1x512xf32, #tpu.memory_space<vmem>>, %arg7: memref<128x384xf32, #tpu.memory_space<vmem>>, %arg8: memref<1x384xf32, #tpu.memory_space<vmem>>, %arg9: memref<128x16xf32, #tpu.memory_space<vmem>>, %arg10: memref<16x16xf32, #tpu.memory_space<vmem>>, %arg11: memref<16x128xf32, #tpu.memory_space<vmem>>, %arg12: memref<128x32xf32, #tpu.memory_space<vmem>>, %arg13: memref<32x8xf32, #tpu.memory_space<vmem>>, %arg14: memref<1x8xf32, #tpu.memory_space<vmem>>, %arg15: memref<2x8xf32, #tpu.memory_space<vmem>>, %arg16: memref<16x128xf32, #tpu.memory_space<vmem>>) attributes {dimension_semantics = [], scalar_prefetch = 0 : i64, scratch_operands = 1 : i64, tpu.core_type = #tpu.core_type<tc>} {
    %c0 = arith.constant 0 : index
    %c0_0 = arith.constant 0 : index
    %0 = vector.load %arg0[%c0, %c0_0] : memref<16x16xbf16, #tpu.memory_space<vmem>>, vector<16x16xbf16>
    %c0_1 = arith.constant 0 : index
    %c0_2 = arith.constant 0 : index
    %1 = vector.load %arg1[%c0_1, %c0_2] : memref<16x512xbf16, #tpu.memory_space<vmem>>, vector<16x512xbf16>
    %cst = arith.constant dense<0.000000e+00> : vector<16x512xf32>
    %2 = tpu.matmul %0, %1, %cst {dimension_numbers = #tpu.dot_dimension_numbers<[1], [0], [0], [1], [0, 0, 1, 1], [], []>} : vector<16x16xbf16>, vector<16x512xbf16>, vector<16x512xf32> -> vector<16x512xf32>
    %c0_3 = arith.constant 0 : index
    %c0_4 = arith.constant 0 : index
    %3 = vector.load %arg3[%c0_3, %c0_4] : memref<1x512xf32, #tpu.memory_space<vmem>>, vector<1x512xf32>
    %4 = vector.broadcast %3 : vector<1x512xf32> to vector<16x512xf32>
    %5 = arith.addf %2, %4 : vector<16x512xf32>
    %c0_5 = arith.constant 0 : index
    %c0_6 = arith.constant 0 : index
    %6 = vector.load %arg2[%c0_5, %c0_6] : memref<128x512xbf16, #tpu.memory_space<vmem>>, vector<128x512xbf16>
    %cst_7 = arith.constant 0.000000e+00 : f32
    %7 = vector.broadcast %cst_7 : f32 to vector<2x128xf32>
    %cst_8 = arith.constant 0.000000e+00 : f32
    %8 = vector.broadcast %cst_8 : f32 to vector<2x128xf32>
    %9 = vector.extract_strided_slice %5 {offsets = [0, 0], sizes = [2, 512], strides = [1, 1]} : vector<16x512xf32> to vector<2x512xf32>
    %10 = arith.truncf %7 : vector<2x128xf32> to vector<2x128xbf16>
    %cst_9 = arith.constant dense<0.000000e+00> : vector<2x512xf32>
    %11 = tpu.matmul %10, %6, %cst_9 {dimension_numbers = #tpu.dot_dimension_numbers<[1], [0], [0], [1], [0, 0, 1, 1], [], []>} : vector<2x128xbf16>, vector<128x512xbf16>, vector<2x512xf32> -> vector<2x512xf32>
    %12 = arith.addf %9, %11 : vector<2x512xf32>
    %13 = vector.extract_strided_slice %12 {offsets = [0, 0], sizes = [2, 128], strides = [1, 1]} : vector<2x512xf32> to vector<2x128xf32>
    %14 = arith.negf %13 : vector<2x128xf32>
    %15 = math.exp %14 : vector<2x128xf32>
    %cst_10 = arith.constant 1.000000e+00 : f32
    %16 = vector.broadcast %cst_10 : f32 to vector<2x128xf32>
    %17 = arith.addf %16, %15 : vector<2x128xf32>
    %18 = arith.divf %16, %17 : vector<2x128xf32>
    %19 = vector.extract_strided_slice %12 {offsets = [0, 128], sizes = [2, 128], strides = [1, 1]} : vector<2x512xf32> to vector<2x128xf32>
    %20 = arith.negf %19 : vector<2x128xf32>
    %21 = math.exp %20 : vector<2x128xf32>
    %cst_11 = arith.constant 1.000000e+00 : f32
    %22 = vector.broadcast %cst_11 : f32 to vector<2x128xf32>
    %23 = arith.addf %22, %21 : vector<2x128xf32>
    %24 = arith.divf %22, %23 : vector<2x128xf32>
    %25 = vector.extract_strided_slice %12 {offsets = [0, 256], sizes = [2, 128], strides = [1, 1]} : vector<2x512xf32> to vector<2x128xf32>
    %26 = math.tanh %25 : vector<2x128xf32>
    %27 = vector.extract_strided_slice %12 {offsets = [0, 384], sizes = [2, 128], strides = [1, 1]} : vector<2x512xf32> to vector<2x128xf32>
    %28 = arith.negf %27 : vector<2x128xf32>
    %29 = math.exp %28 : vector<2x128xf32>
    %cst_12 = arith.constant 1.000000e+00 : f32
    %30 = vector.broadcast %cst_12 : f32 to vector<2x128xf32>
    %31 = arith.addf %30, %29 : vector<2x128xf32>
    %32 = arith.divf %30, %31 : vector<2x128xf32>
    %33 = arith.mulf %24, %8 : vector<2x128xf32>
    %34 = arith.mulf %18, %26 : vector<2x128xf32>
    %35 = arith.addf %33, %34 : vector<2x128xf32>
    %36 = math.tanh %35 : vector<2x128xf32>
    %37 = arith.mulf %32, %36 : vector<2x128xf32>
    %c0_13 = arith.constant 0 : index
    %c0_14 = arith.constant 0 : index
    %38 = vector.load %arg16[%c0_13, %c0_14] : memref<16x128xf32, #tpu.memory_space<vmem>>, vector<2x128xf32>
    tpu.vector_store %arg16[%c0_13, %c0_14], %37 {strides = array<i32>} : memref<16x128xf32, #tpu.memory_space<vmem>>, vector<2x128xf32>,
    %39 = vector.extract_strided_slice %5 {offsets = [2, 0], sizes = [2, 512], strides = [1, 1]} : vector<16x512xf32> to vector<2x512xf32>
    %40 = arith.truncf %37 : vector<2x128xf32> to vector<2x128xbf16>
    %cst_15 = arith.constant dense<0.000000e+00> : vector<2x512xf32>
    %41 = tpu.matmul %40, %6, %cst_15 {dimension_numbers = #tpu.dot_dimension_numbers<[1], [0], [0], [1], [0, 0, 1, 1], [], []>} : vector<2x128xbf16>, vector<128x512xbf16>, vector<2x512xf32> -> vector<2x512xf32>
    %42 = arith.addf %39, %41 : vector<2x512xf32>
    %43 = vector.extract_strided_slice %42 {offsets = [0, 0], sizes = [2, 128], strides = [1, 1]} : vector<2x512xf32> to vector<2x128xf32>
    %44 = arith.negf %43 : vector<2x128xf32>
    %45 = math.exp %44 : vector<2x128xf32>
    %cst_16 = arith.constant 1.000000e+00 : f32
    %46 = vector.broadcast %cst_16 : f32 to vector<2x128xf32>
    %47 = arith.addf %46, %45 : vector<2x128xf32>
    %48 = arith.divf %46, %47 : vector<2x128xf32>
    %49 = vector.extract_strided_slice %42 {offsets = [0, 128], sizes = [2, 128], strides = [1, 1]} : vector<2x512xf32> to vector<2x128xf32>
    %50 = arith.negf %49 : vector<2x128xf32>
    %51 = math.exp %50 : vector<2x128xf32>
    %cst_17 = arith.constant 1.000000e+00 : f32
    %52 = vector.broadcast %cst_17 : f32 to vector<2x128xf32>
    %53 = arith.addf %52, %51 : vector<2x128xf32>
    %54 = arith.divf %52, %53 : vector<2x128xf32>
    %55 = vector.extract_strided_slice %42 {offsets = [0, 256], sizes = [2, 128], strides = [1, 1]} : vector<2x512xf32> to vector<2x128xf32>
    %56 = math.tanh %55 : vector<2x128xf32>
    %57 = vector.extract_strided_slice %42 {offsets = [0, 384], sizes = [2, 128], strides = [1, 1]} : vector<2x512xf32> to vector<2x128xf32>
    %58 = arith.negf %57 : vector<2x128xf32>
    %59 = math.exp %58 : vector<2x128xf32>
    %cst_18 = arith.constant 1.000000e+00 : f32
    %60 = vector.broadcast %cst_18 : f32 to vector<2x128xf32>
    %61 = arith.addf %60, %59 : vector<2x128xf32>
    %62 = arith.divf %60, %61 : vector<2x128xf32>
    %63 = arith.mulf %54, %35 : vector<2x128xf32>
    %64 = arith.mulf %48, %56 : vector<2x128xf32>
    %65 = arith.addf %63, %64 : vector<2x128xf32>
    %66 = math.tanh %65 : vector<2x128xf32>
    %67 = arith.mulf %62, %66 : vector<2x128xf32>
    %c2 = arith.constant 2 : index
    %c0_19 = arith.constant 0 : index
    %68 = vector.load %arg16[%c2, %c0_19] : memref<16x128xf32, #tpu.memory_space<vmem>>, vector<2x128xf32>
    tpu.vector_store %arg16[%c2, %c0_19], %67 {strides = array<i32>} : memref<16x128xf32, #tpu.memory_space<vmem>>, vector<2x128xf32>,
    %69 = vector.extract_strided_slice %5 {offsets = [4, 0], sizes = [2, 512], strides = [1, 1]} : vector<16x512xf32> to vector<2x512xf32>
    %70 = arith.truncf %67 : vector<2x128xf32> to vector<2x128xbf16>
    %cst_20 = arith.constant dense<0.000000e+00> : vector<2x512xf32>
    %71 = tpu.matmul %70, %6, %cst_20 {dimension_numbers = #tpu.dot_dimension_numbers<[1], [0], [0], [1], [0, 0, 1, 1], [], []>} : vector<2x128xbf16>, vector<128x512xbf16>, vector<2x512xf32> -> vector<2x512xf32>
    %72 = arith.addf %69, %71 : vector<2x512xf32>
    %73 = vector.extract_strided_slice %72 {offsets = [0, 0], sizes = [2, 128], strides = [1, 1]} : vector<2x512xf32> to vector<2x128xf32>
    %74 = arith.negf %73 : vector<2x128xf32>
    %75 = math.exp %74 : vector<2x128xf32>
    %cst_21 = arith.constant 1.000000e+00 : f32
    %76 = vector.broadcast %cst_21 : f32 to vector<2x128xf32>
    %77 = arith.addf %76, %75 : vector<2x128xf32>
    %78 = arith.divf %76, %77 : vector<2x128xf32>
    %79 = vector.extract_strided_slice %72 {offsets = [0, 128], sizes = [2, 128], strides = [1, 1]} : vector<2x512xf32> to vector<2x128xf32>
    %80 = arith.negf %79 : vector<2x128xf32>
    %81 = math.exp %80 : vector<2x128xf32>
    %cst_22 = arith.constant 1.000000e+00 : f32
    %82 = vector.broadcast %cst_22 : f32 to vector<2x128xf32>
    %83 = arith.addf %82, %81 : vector<2x128xf32>
    %84 = arith.divf %82, %83 : vector<2x128xf32>
    %85 = vector.extract_strided_slice %72 {offsets = [0, 256], sizes = [2, 128], strides = [1, 1]} : vector<2x512xf32> to vector<2x128xf32>
    %86 = math.tanh %85 : vector<2x128xf32>
    %87 = vector.extract_strided_slice %72 {offsets = [0, 384], sizes = [2, 128], strides = [1, 1]} : vector<2x512xf32> to vector<2x128xf32>
    %88 = arith.negf %87 : vector<2x128xf32>
    %89 = math.exp %88 : vector<2x128xf32>
    %cst_23 = arith.constant 1.000000e+00 : f32
    %90 = vector.broadcast %cst_23 : f32 to vector<2x128xf32>
    %91 = arith.addf %90, %89 : vector<2x128xf32>
    %92 = arith.divf %90, %91 : vector<2x128xf32>
    %93 = arith.mulf %84, %65 : vector<2x128xf32>
    %94 = arith.mulf %78, %86 : vector<2x128xf32>
    %95 = arith.addf %93, %94 : vector<2x128xf32>
    %96 = math.tanh %95 : vector<2x128xf32>
    %97 = arith.mulf %92, %96 : vector<2x128xf32>
    %c4 = arith.constant 4 : index
    %c0_24 = arith.constant 0 : index
    %98 = vector.load %arg16[%c4, %c0_24] : memref<16x128xf32, #tpu.memory_space<vmem>>, vector<2x128xf32>
    tpu.vector_store %arg16[%c4, %c0_24], %97 {strides = array<i32>} : memref<16x128xf32, #tpu.memory_space<vmem>>, vector<2x128xf32>,
    %99 = vector.extract_strided_slice %5 {offsets = [6, 0], sizes = [2, 512], strides = [1, 1]} : vector<16x512xf32> to vector<2x512xf32>
    %100 = arith.truncf %97 : vector<2x128xf32> to vector<2x128xbf16>
    %cst_25 = arith.constant dense<0.000000e+00> : vector<2x512xf32>
    %101 = tpu.matmul %100, %6, %cst_25 {dimension_numbers = #tpu.dot_dimension_numbers<[1], [0], [0], [1], [0, 0, 1, 1], [], []>} : vector<2x128xbf16>, vector<128x512xbf16>, vector<2x512xf32> -> vector<2x512xf32>
    %102 = arith.addf %99, %101 : vector<2x512xf32>
    %103 = vector.extract_strided_slice %102 {offsets = [0, 0], sizes = [2, 128], strides = [1, 1]} : vector<2x512xf32> to vector<2x128xf32>
    %104 = arith.negf %103 : vector<2x128xf32>
    %105 = math.exp %104 : vector<2x128xf32>
    %cst_26 = arith.constant 1.000000e+00 : f32
    %106 = vector.broadcast %cst_26 : f32 to vector<2x128xf32>
    %107 = arith.addf %106, %105 : vector<2x128xf32>
    %108 = arith.divf %106, %107 : vector<2x128xf32>
    %109 = vector.extract_strided_slice %102 {offsets = [0, 128], sizes = [2, 128], strides = [1, 1]} : vector<2x512xf32> to vector<2x128xf32>
    %110 = arith.negf %109 : vector<2x128xf32>
    %111 = math.exp %110 : vector<2x128xf32>
    %cst_27 = arith.constant 1.000000e+00 : f32
    %112 = vector.broadcast %cst_27 : f32 to vector<2x128xf32>
    %113 = arith.addf %112, %111 : vector<2x128xf32>
    %114 = arith.divf %112, %113 : vector<2x128xf32>
    %115 = vector.extract_strided_slice %102 {offsets = [0, 256], sizes = [2, 128], strides = [1, 1]} : vector<2x512xf32> to vector<2x128xf32>
    %116 = math.tanh %115 : vector<2x128xf32>
    %117 = vector.extract_strided_slice %102 {offsets = [0, 384], sizes = [2, 128], strides = [1, 1]} : vector<2x512xf32> to vector<2x128xf32>
    %118 = arith.negf %117 : vector<2x128xf32>
    %119 = math.exp %118 : vector<2x128xf32>
    %cst_28 = arith.constant 1.000000e+00 : f32
    %120 = vector.broadcast %cst_28 : f32 to vector<2x128xf32>
    %121 = arith.addf %120, %119 : vector<2x128xf32>
    %122 = arith.divf %120, %121 : vector<2x128xf32>
    %123 = arith.mulf %114, %95 : vector<2x128xf32>
    %124 = arith.mulf %108, %116 : vector<2x128xf32>
    %125 = arith.addf %123, %124 : vector<2x128xf32>
    %126 = math.tanh %125 : vector<2x128xf32>
    %127 = arith.mulf %122, %126 : vector<2x128xf32>
    %c6 = arith.constant 6 : index
    %c0_29 = arith.constant 0 : index
    %128 = vector.load %arg16[%c6, %c0_29] : memref<16x128xf32, #tpu.memory_space<vmem>>, vector<2x128xf32>
    tpu.vector_store %arg16[%c6, %c0_29], %127 {strides = array<i32>} : memref<16x128xf32, #tpu.memory_space<vmem>>, vector<2x128xf32>,
    %129 = vector.extract_strided_slice %5 {offsets = [8, 0], sizes = [2, 512], strides = [1, 1]} : vector<16x512xf32> to vector<2x512xf32>
    %130 = arith.truncf %127 : vector<2x128xf32> to vector<2x128xbf16>
    %cst_30 = arith.constant dense<0.000000e+00> : vector<2x512xf32>
    %131 = tpu.matmul %130, %6, %cst_30 {dimension_numbers = #tpu.dot_dimension_numbers<[1], [0], [0], [1], [0, 0, 1, 1], [], []>} : vector<2x128xbf16>, vector<128x512xbf16>, vector<2x512xf32> -> vector<2x512xf32>
    %132 = arith.addf %129, %131 : vector<2x512xf32>
    %133 = vector.extract_strided_slice %132 {offsets = [0, 0], sizes = [2, 128], strides = [1, 1]} : vector<2x512xf32> to vector<2x128xf32>
    %134 = arith.negf %133 : vector<2x128xf32>
    %135 = math.exp %134 : vector<2x128xf32>
    %cst_31 = arith.constant 1.000000e+00 : f32
    %136 = vector.broadcast %cst_31 : f32 to vector<2x128xf32>
    %137 = arith.addf %136, %135 : vector<2x128xf32>
    %138 = arith.divf %136, %137 : vector<2x128xf32>
    %139 = vector.extract_strided_slice %132 {offsets = [0, 128], sizes = [2, 128], strides = [1, 1]} : vector<2x512xf32> to vector<2x128xf32>
    %140 = arith.negf %139 : vector<2x128xf32>
    %141 = math.exp %140 : vector<2x128xf32>
    %cst_32 = arith.constant 1.000000e+00 : f32
    %142 = vector.broadcast %cst_32 : f32 to vector<2x128xf32>
    %143 = arith.addf %142, %141 : vector<2x128xf32>
    %144 = arith.divf %142, %143 : vector<2x128xf32>
    %145 = vector.extract_strided_slice %132 {offsets = [0, 256], sizes = [2, 128], strides = [1, 1]} : vector<2x512xf32> to vector<2x128xf32>
    %146 = math.tanh %145 : vector<2x128xf32>
    %147 = vector.extract_strided_slice %132 {offsets = [0, 384], sizes = [2, 128], strides = [1, 1]} : vector<2x512xf32> to vector<2x128xf32>
    %148 = arith.negf %147 : vector<2x128xf32>
    %149 = math.exp %148 : vector<2x128xf32>
    %cst_33 = arith.constant 1.000000e+00 : f32
    %150 = vector.broadcast %cst_33 : f32 to vector<2x128xf32>
    %151 = arith.addf %150, %149 : vector<2x128xf32>
    %152 = arith.divf %150, %151 : vector<2x128xf32>
    %153 = arith.mulf %144, %125 : vector<2x128xf32>
    %154 = arith.mulf %138, %146 : vector<2x128xf32>
    %155 = arith.addf %153, %154 : vector<2x128xf32>
    %156 = math.tanh %155 : vector<2x128xf32>
    %157 = arith.mulf %152, %156 : vector<2x128xf32>
    %c8 = arith.constant 8 : index
    %c0_34 = arith.constant 0 : index
    %158 = vector.load %arg16[%c8, %c0_34] : memref<16x128xf32, #tpu.memory_space<vmem>>, vector<2x128xf32>
    tpu.vector_store %arg16[%c8, %c0_34], %157 {strides = array<i32>} : memref<16x128xf32, #tpu.memory_space<vmem>>, vector<2x128xf32>,
    %159 = vector.extract_strided_slice %5 {offsets = [10, 0], sizes = [2, 512], strides = [1, 1]} : vector<16x512xf32> to vector<2x512xf32>
    %160 = arith.truncf %157 : vector<2x128xf32> to vector<2x128xbf16>
    %cst_35 = arith.constant dense<0.000000e+00> : vector<2x512xf32>
    %161 = tpu.matmul %160, %6, %cst_35 {dimension_numbers = #tpu.dot_dimension_numbers<[1], [0], [0], [1], [0, 0, 1, 1], [], []>} : vector<2x128xbf16>, vector<128x512xbf16>, vector<2x512xf32> -> vector<2x512xf32>
    %162 = arith.addf %159, %161 : vector<2x512xf32>
    %163 = vector.extract_strided_slice %162 {offsets = [0, 0], sizes = [2, 128], strides = [1, 1]} : vector<2x512xf32> to vector<2x128xf32>
    %164 = arith.negf %163 : vector<2x128xf32>
    %165 = math.exp %164 : vector<2x128xf32>
    %cst_36 = arith.constant 1.000000e+00 : f32
    %166 = vector.broadcast %cst_36 : f32 to vector<2x128xf32>
    %167 = arith.addf %166, %165 : vector<2x128xf32>
    %168 = arith.divf %166, %167 : vector<2x128xf32>
    %169 = vector.extract_strided_slice %162 {offsets = [0, 128], sizes = [2, 128], strides = [1, 1]} : vector<2x512xf32> to vector<2x128xf32>
    %170 = arith.negf %169 : vector<2x128xf32>
    %171 = math.exp %170 : vector<2x128xf32>
    %cst_37 = arith.constant 1.000000e+00 : f32
    %172 = vector.broadcast %cst_37 : f32 to vector<2x128xf32>
    %173 = arith.addf %172, %171 : vector<2x128xf32>
    %174 = arith.divf %172, %173 : vector<2x128xf32>
    %175 = vector.extract_strided_slice %162 {offsets = [0, 256], sizes = [2, 128], strides = [1, 1]} : vector<2x512xf32> to vector<2x128xf32>
    %176 = math.tanh %175 : vector<2x128xf32>
    %177 = vector.extract_strided_slice %162 {offsets = [0, 384], sizes = [2, 128], strides = [1, 1]} : vector<2x512xf32> to vector<2x128xf32>
    %178 = arith.negf %177 : vector<2x128xf32>
    %179 = math.exp %178 : vector<2x128xf32>
    %cst_38 = arith.constant 1.000000e+00 : f32
    %180 = vector.broadcast %cst_38 : f32 to vector<2x128xf32>
    %181 = arith.addf %180, %179 : vector<2x128xf32>
    %182 = arith.divf %180, %181 : vector<2x128xf32>
    %183 = arith.mulf %174, %155 : vector<2x128xf32>
    %184 = arith.mulf %168, %176 : vector<2x128xf32>
    %185 = arith.addf %183, %184 : vector<2x128xf32>
    %186 = math.tanh %185 : vector<2x128xf32>
    %187 = arith.mulf %182, %186 : vector<2x128xf32>
    %c10 = arith.constant 10 : index
    %c0_39 = arith.constant 0 : index
    %188 = vector.load %arg16[%c10, %c0_39] : memref<16x128xf32, #tpu.memory_space<vmem>>, vector<2x128xf32>
    tpu.vector_store %arg16[%c10, %c0_39], %187 {strides = array<i32>} : memref<16x128xf32, #tpu.memory_space<vmem>>, vector<2x128xf32>,
    %189 = vector.extract_strided_slice %5 {offsets = [12, 0], sizes = [2, 512], strides = [1, 1]} : vector<16x512xf32> to vector<2x512xf32>
    %190 = arith.truncf %187 : vector<2x128xf32> to vector<2x128xbf16>
    %cst_40 = arith.constant dense<0.000000e+00> : vector<2x512xf32>
    %191 = tpu.matmul %190, %6, %cst_40 {dimension_numbers = #tpu.dot_dimension_numbers<[1], [0], [0], [1], [0, 0, 1, 1], [], []>} : vector<2x128xbf16>, vector<128x512xbf16>, vector<2x512xf32> -> vector<2x512xf32>
    %192 = arith.addf %189, %191 : vector<2x512xf32>
    %193 = vector.extract_strided_slice %192 {offsets = [0, 0], sizes = [2, 128], strides = [1, 1]} : vector<2x512xf32> to vector<2x128xf32>
    %194 = arith.negf %193 : vector<2x128xf32>
    %195 = math.exp %194 : vector<2x128xf32>
    %cst_41 = arith.constant 1.000000e+00 : f32
    %196 = vector.broadcast %cst_41 : f32 to vector<2x128xf32>
    %197 = arith.addf %196, %195 : vector<2x128xf32>
    %198 = arith.divf %196, %197 : vector<2x128xf32>
    %199 = vector.extract_strided_slice %192 {offsets = [0, 128], sizes = [2, 128], strides = [1, 1]} : vector<2x512xf32> to vector<2x128xf32>
    %200 = arith.negf %199 : vector<2x128xf32>
    %201 = math.exp %200 : vector<2x128xf32>
    %cst_42 = arith.constant 1.000000e+00 : f32
    %202 = vector.broadcast %cst_42 : f32 to vector<2x128xf32>
    %203 = arith.addf %202, %201 : vector<2x128xf32>
    %204 = arith.divf %202, %203 : vector<2x128xf32>
    %205 = vector.extract_strided_slice %192 {offsets = [0, 256], sizes = [2, 128], strides = [1, 1]} : vector<2x512xf32> to vector<2x128xf32>
    %206 = math.tanh %205 : vector<2x128xf32>
    %207 = vector.extract_strided_slice %192 {offsets = [0, 384], sizes = [2, 128], strides = [1, 1]} : vector<2x512xf32> to vector<2x128xf32>
    %208 = arith.negf %207 : vector<2x128xf32>
    %209 = math.exp %208 : vector<2x128xf32>
    %cst_43 = arith.constant 1.000000e+00 : f32
    %210 = vector.broadcast %cst_43 : f32 to vector<2x128xf32>
    %211 = arith.addf %210, %209 : vector<2x128xf32>
    %212 = arith.divf %210, %211 : vector<2x128xf32>
    %213 = arith.mulf %204, %185 : vector<2x128xf32>
    %214 = arith.mulf %198, %206 : vector<2x128xf32>
    %215 = arith.addf %213, %214 : vector<2x128xf32>
    %216 = math.tanh %215 : vector<2x128xf32>
    %217 = arith.mulf %212, %216 : vector<2x128xf32>
    %c12 = arith.constant 12 : index
    %c0_44 = arith.constant 0 : index
    %218 = vector.load %arg16[%c12, %c0_44] : memref<16x128xf32, #tpu.memory_space<vmem>>, vector<2x128xf32>
    tpu.vector_store %arg16[%c12, %c0_44], %217 {strides = array<i32>} : memref<16x128xf32, #tpu.memory_space<vmem>>, vector<2x128xf32>,
    %219 = vector.extract_strided_slice %5 {offsets = [14, 0], sizes = [2, 512], strides = [1, 1]} : vector<16x512xf32> to vector<2x512xf32>
    %220 = arith.truncf %217 : vector<2x128xf32> to vector<2x128xbf16>
    %cst_45 = arith.constant dense<0.000000e+00> : vector<2x512xf32>
    %221 = tpu.matmul %220, %6, %cst_45 {dimension_numbers = #tpu.dot_dimension_numbers<[1], [0], [0], [1], [0, 0, 1, 1], [], []>} : vector<2x128xbf16>, vector<128x512xbf16>, vector<2x512xf32> -> vector<2x512xf32>
    %222 = arith.addf %219, %221 : vector<2x512xf32>
    %223 = vector.extract_strided_slice %222 {offsets = [0, 0], sizes = [2, 128], strides = [1, 1]} : vector<2x512xf32> to vector<2x128xf32>
    %224 = arith.negf %223 : vector<2x128xf32>
    %225 = math.exp %224 : vector<2x128xf32>
    %cst_46 = arith.constant 1.000000e+00 : f32
    %226 = vector.broadcast %cst_46 : f32 to vector<2x128xf32>
    %227 = arith.addf %226, %225 : vector<2x128xf32>
    %228 = arith.divf %226, %227 : vector<2x128xf32>
    %229 = vector.extract_strided_slice %222 {offsets = [0, 128], sizes = [2, 128], strides = [1, 1]} : vector<2x512xf32> to vector<2x128xf32>
    %230 = arith.negf %229 : vector<2x128xf32>
    %231 = math.exp %230 : vector<2x128xf32>
    %cst_47 = arith.constant 1.000000e+00 : f32
    %232 = vector.broadcast %cst_47 : f32 to vector<2x128xf32>
    %233 = arith.addf %232, %231 : vector<2x128xf32>
    %234 = arith.divf %232, %233 : vector<2x128xf32>
    %235 = vector.extract_strided_slice %222 {offsets = [0, 256], sizes = [2, 128], strides = [1, 1]} : vector<2x512xf32> to vector<2x128xf32>
    %236 = math.tanh %235 : vector<2x128xf32>
    %237 = vector.extract_strided_slice %222 {offsets = [0, 384], sizes = [2, 128], strides = [1, 1]} : vector<2x512xf32> to vector<2x128xf32>
    %238 = arith.negf %237 : vector<2x128xf32>
    %239 = math.exp %238 : vector<2x128xf32>
    %cst_48 = arith.constant 1.000000e+00 : f32
    %240 = vector.broadcast %cst_48 : f32 to vector<2x128xf32>
    %241 = arith.addf %240, %239 : vector<2x128xf32>
    %242 = arith.divf %240, %241 : vector<2x128xf32>
    %243 = arith.mulf %234, %215 : vector<2x128xf32>
    %244 = arith.mulf %228, %236 : vector<2x128xf32>
    %245 = arith.addf %243, %244 : vector<2x128xf32>
    %246 = math.tanh %245 : vector<2x128xf32>
    %247 = arith.mulf %242, %246 : vector<2x128xf32>
    %c14 = arith.constant 14 : index
    %c0_49 = arith.constant 0 : index
    %248 = vector.load %arg16[%c14, %c0_49] : memref<16x128xf32, #tpu.memory_space<vmem>>, vector<2x128xf32>
    tpu.vector_store %arg16[%c14, %c0_49], %247 {strides = array<i32>} : memref<16x128xf32, #tpu.memory_space<vmem>>, vector<2x128xf32>,
    %c0_50 = arith.constant 0 : index
    %c0_51 = arith.constant 0 : index
    %249 = vector.load %arg16[%c0_50, %c0_51] : memref<16x128xf32, #tpu.memory_space<vmem>>, vector<16x128xf32>
    %250 = arith.truncf %249 : vector<16x128xf32> to vector<16x128xbf16>
    %c0_52 = arith.constant 0 : index
    %c0_53 = arith.constant 0 : index
    %c0_54 = arith.constant 0 : index
    %251 = vector.load %arg4[%c0_52, %c0_53, %c0_54] : memref<2x128x512xbf16, #tpu.memory_space<vmem>>, vector<1x128x512xbf16>
    %252 = vector.shape_cast %251 : vector<1x128x512xbf16> to vector<128x512xbf16>
    %cst_55 = arith.constant dense<0.000000e+00> : vector<16x512xf32>
    %253 = tpu.matmul %250, %252, %cst_55 {dimension_numbers = #tpu.dot_dimension_numbers<[1], [0], [0], [1], [0, 0, 1, 1], [], []>} : vector<16x128xbf16>, vector<128x512xbf16>, vector<16x512xf32> -> vector<16x512xf32>
    %c0_56 = arith.constant 0 : index
    %c0_57 = arith.constant 0 : index
    %c0_58 = arith.constant 0 : index
    %254 = vector.load %arg6[%c0_56, %c0_57, %c0_58] : memref<2x1x512xf32, #tpu.memory_space<vmem>>, vector<1x1x512xf32>
    %255 = vector.shape_cast %254 : vector<1x1x512xf32> to vector<1x512xf32>
    %256 = vector.broadcast %255 : vector<1x512xf32> to vector<16x512xf32>
    %257 = arith.addf %253, %256 : vector<16x512xf32>
    %c0_59 = arith.constant 0 : index
    %c0_60 = arith.constant 0 : index
    %c0_61 = arith.constant 0 : index
    %258 = vector.load %arg5[%c0_59, %c0_60, %c0_61] : memref<2x128x512xbf16, #tpu.memory_space<vmem>>, vector<1x128x512xbf16>
    %259 = vector.shape_cast %258 : vector<1x128x512xbf16> to vector<128x512xbf16>
    %cst_62 = arith.constant 0.000000e+00 : f32
    %260 = vector.broadcast %cst_62 : f32 to vector<2x128xf32>
    %cst_63 = arith.constant 0.000000e+00 : f32
    %261 = vector.broadcast %cst_63 : f32 to vector<2x128xf32>
    %262 = vector.extract_strided_slice %257 {offsets = [0, 0], sizes = [2, 512], strides = [1, 1]} : vector<16x512xf32> to vector<2x512xf32>
    %263 = arith.truncf %260 : vector<2x128xf32> to vector<2x128xbf16>
    %cst_64 = arith.constant dense<0.000000e+00> : vector<2x512xf32>
    %264 = tpu.matmul %263, %259, %cst_64 {dimension_numbers = #tpu.dot_dimension_numbers<[1], [0], [0], [1], [0, 0, 1, 1], [], []>} : vector<2x128xbf16>, vector<128x512xbf16>, vector<2x512xf32> -> vector<2x512xf32>
    %265 = arith.addf %262, %264 : vector<2x512xf32>
    %266 = vector.extract_strided_slice %265 {offsets = [0, 0], sizes = [2, 128], strides = [1, 1]} : vector<2x512xf32> to vector<2x128xf32>
    %267 = arith.negf %266 : vector<2x128xf32>
    %268 = math.exp %267 : vector<2x128xf32>
    %cst_65 = arith.constant 1.000000e+00 : f32
    %269 = vector.broadcast %cst_65 : f32 to vector<2x128xf32>
    %270 = arith.addf %269, %268 : vector<2x128xf32>
    %271 = arith.divf %269, %270 : vector<2x128xf32>
    %272 = vector.extract_strided_slice %265 {offsets = [0, 128], sizes = [2, 128], strides = [1, 1]} : vector<2x512xf32> to vector<2x128xf32>
    %273 = arith.negf %272 : vector<2x128xf32>
    %274 = math.exp %273 : vector<2x128xf32>
    %cst_66 = arith.constant 1.000000e+00 : f32
    %275 = vector.broadcast %cst_66 : f32 to vector<2x128xf32>
    %276 = arith.addf %275, %274 : vector<2x128xf32>
    %277 = arith.divf %275, %276 : vector<2x128xf32>
    %278 = vector.extract_strided_slice %265 {offsets = [0, 256], sizes = [2, 128], strides = [1, 1]} : vector<2x512xf32> to vector<2x128xf32>
    %279 = math.tanh %278 : vector<2x128xf32>
    %280 = vector.extract_strided_slice %265 {offsets = [0, 384], sizes = [2, 128], strides = [1, 1]} : vector<2x512xf32> to vector<2x128xf32>
    %281 = arith.negf %280 : vector<2x128xf32>
    %282 = math.exp %281 : vector<2x128xf32>
    %cst_67 = arith.constant 1.000000e+00 : f32
    %283 = vector.broadcast %cst_67 : f32 to vector<2x128xf32>
    %284 = arith.addf %283, %282 : vector<2x128xf32>
    %285 = arith.divf %283, %284 : vector<2x128xf32>
    %286 = arith.mulf %277, %261 : vector<2x128xf32>
    %287 = arith.mulf %271, %279 : vector<2x128xf32>
    %288 = arith.addf %286, %287 : vector<2x128xf32>
    %289 = math.tanh %288 : vector<2x128xf32>
    %290 = arith.mulf %285, %289 : vector<2x128xf32>
    %c0_68 = arith.constant 0 : index
    %c0_69 = arith.constant 0 : index
    %291 = vector.load %arg16[%c0_68, %c0_69] : memref<16x128xf32, #tpu.memory_space<vmem>>, vector<2x128xf32>
    tpu.vector_store %arg16[%c0_68, %c0_69], %290 {strides = array<i32>} : memref<16x128xf32, #tpu.memory_space<vmem>>, vector<2x128xf32>,
    %292 = vector.extract_strided_slice %257 {offsets = [2, 0], sizes = [2, 512], strides = [1, 1]} : vector<16x512xf32> to vector<2x512xf32>
    %293 = arith.truncf %290 : vector<2x128xf32> to vector<2x128xbf16>
    %cst_70 = arith.constant dense<0.000000e+00> : vector<2x512xf32>
    %294 = tpu.matmul %293, %259, %cst_70 {dimension_numbers = #tpu.dot_dimension_numbers<[1], [0], [0], [1], [0, 0, 1, 1], [], []>} : vector<2x128xbf16>, vector<128x512xbf16>, vector<2x512xf32> -> vector<2x512xf32>
    %295 = arith.addf %292, %294 : vector<2x512xf32>
    %296 = vector.extract_strided_slice %295 {offsets = [0, 0], sizes = [2, 128], strides = [1, 1]} : vector<2x512xf32> to vector<2x128xf32>
    %297 = arith.negf %296 : vector<2x128xf32>
    %298 = math.exp %297 : vector<2x128xf32>
    %cst_71 = arith.constant 1.000000e+00 : f32
    %299 = vector.broadcast %cst_71 : f32 to vector<2x128xf32>
    %300 = arith.addf %299, %298 : vector<2x128xf32>
    %301 = arith.divf %299, %300 : vector<2x128xf32>
    %302 = vector.extract_strided_slice %295 {offsets = [0, 128], sizes = [2, 128], strides = [1, 1]} : vector<2x512xf32> to vector<2x128xf32>
    %303 = arith.negf %302 : vector<2x128xf32>
    %304 = math.exp %303 : vector<2x128xf32>
    %cst_72 = arith.constant 1.000000e+00 : f32
    %305 = vector.broadcast %cst_72 : f32 to vector<2x128xf32>
    %306 = arith.addf %305, %304 : vector<2x128xf32>
    %307 = arith.divf %305, %306 : vector<2x128xf32>
    %308 = vector.extract_strided_slice %295 {offsets = [0, 256], sizes = [2, 128], strides = [1, 1]} : vector<2x512xf32> to vector<2x128xf32>
    %309 = math.tanh %308 : vector<2x128xf32>
    %310 = vector.extract_strided_slice %295 {offsets = [0, 384], sizes = [2, 128], strides = [1, 1]} : vector<2x512xf32> to vector<2x128xf32>
    %311 = arith.negf %310 : vector<2x128xf32>
    %312 = math.exp %311 : vector<2x128xf32>
    %cst_73 = arith.constant 1.000000e+00 : f32
    %313 = vector.broadcast %cst_73 : f32 to vector<2x128xf32>
    %314 = arith.addf %313, %312 : vector<2x128xf32>
    %315 = arith.divf %313, %314 : vector<2x128xf32>
    %316 = arith.mulf %307, %288 : vector<2x128xf32>
    %317 = arith.mulf %301, %309 : vector<2x128xf32>
    %318 = arith.addf %316, %317 : vector<2x128xf32>
    %319 = math.tanh %318 : vector<2x128xf32>
    %320 = arith.mulf %315, %319 : vector<2x128xf32>
    %c2_74 = arith.constant 2 : index
    %c0_75 = arith.constant 0 : index
    %321 = vector.load %arg16[%c2_74, %c0_75] : memref<16x128xf32, #tpu.memory_space<vmem>>, vector<2x128xf32>
    tpu.vector_store %arg16[%c2_74, %c0_75], %320 {strides = array<i32>} : memref<16x128xf32, #tpu.memory_space<vmem>>, vector<2x128xf32>,
    %322 = vector.extract_strided_slice %257 {offsets = [4, 0], sizes = [2, 512], strides = [1, 1]} : vector<16x512xf32> to vector<2x512xf32>
    %323 = arith.truncf %320 : vector<2x128xf32> to vector<2x128xbf16>
    %cst_76 = arith.constant dense<0.000000e+00> : vector<2x512xf32>
    %324 = tpu.matmul %323, %259, %cst_76 {dimension_numbers = #tpu.dot_dimension_numbers<[1], [0], [0], [1], [0, 0, 1, 1], [], []>} : vector<2x128xbf16>, vector<128x512xbf16>, vector<2x512xf32> -> vector<2x512xf32>
    %325 = arith.addf %322, %324 : vector<2x512xf32>
    %326 = vector.extract_strided_slice %325 {offsets = [0, 0], sizes = [2, 128], strides = [1, 1]} : vector<2x512xf32> to vector<2x128xf32>
    %327 = arith.negf %326 : vector<2x128xf32>
    %328 = math.exp %327 : vector<2x128xf32>
    %cst_77 = arith.constant 1.000000e+00 : f32
    %329 = vector.broadcast %cst_77 : f32 to vector<2x128xf32>
    %330 = arith.addf %329, %328 : vector<2x128xf32>
    %331 = arith.divf %329, %330 : vector<2x128xf32>
    %332 = vector.extract_strided_slice %325 {offsets = [0, 128], sizes = [2, 128], strides = [1, 1]} : vector<2x512xf32> to vector<2x128xf32>
    %333 = arith.negf %332 : vector<2x128xf32>
    %334 = math.exp %333 : vector<2x128xf32>
    %cst_78 = arith.constant 1.000000e+00 : f32
    %335 = vector.broadcast %cst_78 : f32 to vector<2x128xf32>
    %336 = arith.addf %335, %334 : vector<2x128xf32>
    %337 = arith.divf %335, %336 : vector<2x128xf32>
    %338 = vector.extract_strided_slice %325 {offsets = [0, 256], sizes = [2, 128], strides = [1, 1]} : vector<2x512xf32> to vector<2x128xf32>
    %339 = math.tanh %338 : vector<2x128xf32>
    %340 = vector.extract_strided_slice %325 {offsets = [0, 384], sizes = [2, 128], strides = [1, 1]} : vector<2x512xf32> to vector<2x128xf32>
    %341 = arith.negf %340 : vector<2x128xf32>
    %342 = math.exp %341 : vector<2x128xf32>
    %cst_79 = arith.constant 1.000000e+00 : f32
    %343 = vector.broadcast %cst_79 : f32 to vector<2x128xf32>
    %344 = arith.addf %343, %342 : vector<2x128xf32>
    %345 = arith.divf %343, %344 : vector<2x128xf32>
    %346 = arith.mulf %337, %318 : vector<2x128xf32>
    %347 = arith.mulf %331, %339 : vector<2x128xf32>
    %348 = arith.addf %346, %347 : vector<2x128xf32>
    %349 = math.tanh %348 : vector<2x128xf32>
    %350 = arith.mulf %345, %349 : vector<2x128xf32>
    %c4_80 = arith.constant 4 : index
    %c0_81 = arith.constant 0 : index
    %351 = vector.load %arg16[%c4_80, %c0_81] : memref<16x128xf32, #tpu.memory_space<vmem>>, vector<2x128xf32>
    tpu.vector_store %arg16[%c4_80, %c0_81], %350 {strides = array<i32>} : memref<16x128xf32, #tpu.memory_space<vmem>>, vector<2x128xf32>,
    %352 = vector.extract_strided_slice %257 {offsets = [6, 0], sizes = [2, 512], strides = [1, 1]} : vector<16x512xf32> to vector<2x512xf32>
    %353 = arith.truncf %350 : vector<2x128xf32> to vector<2x128xbf16>
    %cst_82 = arith.constant dense<0.000000e+00> : vector<2x512xf32>
    %354 = tpu.matmul %353, %259, %cst_82 {dimension_numbers = #tpu.dot_dimension_numbers<[1], [0], [0], [1], [0, 0, 1, 1], [], []>} : vector<2x128xbf16>, vector<128x512xbf16>, vector<2x512xf32> -> vector<2x512xf32>
    %355 = arith.addf %352, %354 : vector<2x512xf32>
    %356 = vector.extract_strided_slice %355 {offsets = [0, 0], sizes = [2, 128], strides = [1, 1]} : vector<2x512xf32> to vector<2x128xf32>
    %357 = arith.negf %356 : vector<2x128xf32>
    %358 = math.exp %357 : vector<2x128xf32>
    %cst_83 = arith.constant 1.000000e+00 : f32
    %359 = vector.broadcast %cst_83 : f32 to vector<2x128xf32>
    %360 = arith.addf %359, %358 : vector<2x128xf32>
    %361 = arith.divf %359, %360 : vector<2x128xf32>
    %362 = vector.extract_strided_slice %355 {offsets = [0, 128], sizes = [2, 128], strides = [1, 1]} : vector<2x512xf32> to vector<2x128xf32>
    %363 = arith.negf %362 : vector<2x128xf32>
    %364 = math.exp %363 : vector<2x128xf32>
    %cst_84 = arith.constant 1.000000e+00 : f32
    %365 = vector.broadcast %cst_84 : f32 to vector<2x128xf32>
    %366 = arith.addf %365, %364 : vector<2x128xf32>
    %367 = arith.divf %365, %366 : vector<2x128xf32>
    %368 = vector.extract_strided_slice %355 {offsets = [0, 256], sizes = [2, 128], strides = [1, 1]} : vector<2x512xf32> to vector<2x128xf32>
    %369 = math.tanh %368 : vector<2x128xf32>
    %370 = vector.extract_strided_slice %355 {offsets = [0, 384], sizes = [2, 128], strides = [1, 1]} : vector<2x512xf32> to vector<2x128xf32>
    %371 = arith.negf %370 : vector<2x128xf32>
    %372 = math.exp %371 : vector<2x128xf32>
    %cst_85 = arith.constant 1.000000e+00 : f32
    %373 = vector.broadcast %cst_85 : f32 to vector<2x128xf32>
    %374 = arith.addf %373, %372 : vector<2x128xf32>
    %375 = arith.divf %373, %374 : vector<2x128xf32>
    %376 = arith.mulf %367, %348 : vector<2x128xf32>
    %377 = arith.mulf %361, %369 : vector<2x128xf32>
    %378 = arith.addf %376, %377 : vector<2x128xf32>
    %379 = math.tanh %378 : vector<2x128xf32>
    %380 = arith.mulf %375, %379 : vector<2x128xf32>
    %c6_86 = arith.constant 6 : index
    %c0_87 = arith.constant 0 : index
    %381 = vector.load %arg16[%c6_86, %c0_87] : memref<16x128xf32, #tpu.memory_space<vmem>>, vector<2x128xf32>
    tpu.vector_store %arg16[%c6_86, %c0_87], %380 {strides = array<i32>} : memref<16x128xf32, #tpu.memory_space<vmem>>, vector<2x128xf32>,
    %382 = vector.extract_strided_slice %257 {offsets = [8, 0], sizes = [2, 512], strides = [1, 1]} : vector<16x512xf32> to vector<2x512xf32>
    %383 = arith.truncf %380 : vector<2x128xf32> to vector<2x128xbf16>
    %cst_88 = arith.constant dense<0.000000e+00> : vector<2x512xf32>
    %384 = tpu.matmul %383, %259, %cst_88 {dimension_numbers = #tpu.dot_dimension_numbers<[1], [0], [0], [1], [0, 0, 1, 1], [], []>} : vector<2x128xbf16>, vector<128x512xbf16>, vector<2x512xf32> -> vector<2x512xf32>
    %385 = arith.addf %382, %384 : vector<2x512xf32>
    %386 = vector.extract_strided_slice %385 {offsets = [0, 0], sizes = [2, 128], strides = [1, 1]} : vector<2x512xf32> to vector<2x128xf32>
    %387 = arith.negf %386 : vector<2x128xf32>
    %388 = math.exp %387 : vector<2x128xf32>
    %cst_89 = arith.constant 1.000000e+00 : f32
    %389 = vector.broadcast %cst_89 : f32 to vector<2x128xf32>
    %390 = arith.addf %389, %388 : vector<2x128xf32>
    %391 = arith.divf %389, %390 : vector<2x128xf32>
    %392 = vector.extract_strided_slice %385 {offsets = [0, 128], sizes = [2, 128], strides = [1, 1]} : vector<2x512xf32> to vector<2x128xf32>
    %393 = arith.negf %392 : vector<2x128xf32>
    %394 = math.exp %393 : vector<2x128xf32>
    %cst_90 = arith.constant 1.000000e+00 : f32
    %395 = vector.broadcast %cst_90 : f32 to vector<2x128xf32>
    %396 = arith.addf %395, %394 : vector<2x128xf32>
    %397 = arith.divf %395, %396 : vector<2x128xf32>
    %398 = vector.extract_strided_slice %385 {offsets = [0, 256], sizes = [2, 128], strides = [1, 1]} : vector<2x512xf32> to vector<2x128xf32>
    %399 = math.tanh %398 : vector<2x128xf32>
    %400 = vector.extract_strided_slice %385 {offsets = [0, 384], sizes = [2, 128], strides = [1, 1]} : vector<2x512xf32> to vector<2x128xf32>
    %401 = arith.negf %400 : vector<2x128xf32>
    %402 = math.exp %401 : vector<2x128xf32>
    %cst_91 = arith.constant 1.000000e+00 : f32
    %403 = vector.broadcast %cst_91 : f32 to vector<2x128xf32>
    %404 = arith.addf %403, %402 : vector<2x128xf32>
    %405 = arith.divf %403, %404 : vector<2x128xf32>
    %406 = arith.mulf %397, %378 : vector<2x128xf32>
    %407 = arith.mulf %391, %399 : vector<2x128xf32>
    %408 = arith.addf %406, %407 : vector<2x128xf32>
    %409 = math.tanh %408 : vector<2x128xf32>
    %410 = arith.mulf %405, %409 : vector<2x128xf32>
    %c8_92 = arith.constant 8 : index
    %c0_93 = arith.constant 0 : index
    %411 = vector.load %arg16[%c8_92, %c0_93] : memref<16x128xf32, #tpu.memory_space<vmem>>, vector<2x128xf32>
    tpu.vector_store %arg16[%c8_92, %c0_93], %410 {strides = array<i32>} : memref<16x128xf32, #tpu.memory_space<vmem>>, vector<2x128xf32>,
    %412 = vector.extract_strided_slice %257 {offsets = [10, 0], sizes = [2, 512], strides = [1, 1]} : vector<16x512xf32> to vector<2x512xf32>
    %413 = arith.truncf %410 : vector<2x128xf32> to vector<2x128xbf16>
    %cst_94 = arith.constant dense<0.000000e+00> : vector<2x512xf32>
    %414 = tpu.matmul %413, %259, %cst_94 {dimension_numbers = #tpu.dot_dimension_numbers<[1], [0], [0], [1], [0, 0, 1, 1], [], []>} : vector<2x128xbf16>, vector<128x512xbf16>, vector<2x512xf32> -> vector<2x512xf32>
    %415 = arith.addf %412, %414 : vector<2x512xf32>
    %416 = vector.extract_strided_slice %415 {offsets = [0, 0], sizes = [2, 128], strides = [1, 1]} : vector<2x512xf32> to vector<2x128xf32>
    %417 = arith.negf %416 : vector<2x128xf32>
    %418 = math.exp %417 : vector<2x128xf32>
    %cst_95 = arith.constant 1.000000e+00 : f32
    %419 = vector.broadcast %cst_95 : f32 to vector<2x128xf32>
    %420 = arith.addf %419, %418 : vector<2x128xf32>
    %421 = arith.divf %419, %420 : vector<2x128xf32>
    %422 = vector.extract_strided_slice %415 {offsets = [0, 128], sizes = [2, 128], strides = [1, 1]} : vector<2x512xf32> to vector<2x128xf32>
    %423 = arith.negf %422 : vector<2x128xf32>
    %424 = math.exp %423 : vector<2x128xf32>
    %cst_96 = arith.constant 1.000000e+00 : f32
    %425 = vector.broadcast %cst_96 : f32 to vector<2x128xf32>
    %426 = arith.addf %425, %424 : vector<2x128xf32>
    %427 = arith.divf %425, %426 : vector<2x128xf32>
    %428 = vector.extract_strided_slice %415 {offsets = [0, 256], sizes = [2, 128], strides = [1, 1]} : vector<2x512xf32> to vector<2x128xf32>
    %429 = math.tanh %428 : vector<2x128xf32>
    %430 = vector.extract_strided_slice %415 {offsets = [0, 384], sizes = [2, 128], strides = [1, 1]} : vector<2x512xf32> to vector<2x128xf32>
    %431 = arith.negf %430 : vector<2x128xf32>
    %432 = math.exp %431 : vector<2x128xf32>
    %cst_97 = arith.constant 1.000000e+00 : f32
    %433 = vector.broadcast %cst_97 : f32 to vector<2x128xf32>
    %434 = arith.addf %433, %432 : vector<2x128xf32>
    %435 = arith.divf %433, %434 : vector<2x128xf32>
    %436 = arith.mulf %427, %408 : vector<2x128xf32>
    %437 = arith.mulf %421, %429 : vector<2x128xf32>
    %438 = arith.addf %436, %437 : vector<2x128xf32>
    %439 = math.tanh %438 : vector<2x128xf32>
    %440 = arith.mulf %435, %439 : vector<2x128xf32>
    %c10_98 = arith.constant 10 : index
    %c0_99 = arith.constant 0 : index
    %441 = vector.load %arg16[%c10_98, %c0_99] : memref<16x128xf32, #tpu.memory_space<vmem>>, vector<2x128xf32>
    tpu.vector_store %arg16[%c10_98, %c0_99], %440 {strides = array<i32>} : memref<16x128xf32, #tpu.memory_space<vmem>>, vector<2x128xf32>,
    %442 = vector.extract_strided_slice %257 {offsets = [12, 0], sizes = [2, 512], strides = [1, 1]} : vector<16x512xf32> to vector<2x512xf32>
    %443 = arith.truncf %440 : vector<2x128xf32> to vector<2x128xbf16>
    %cst_100 = arith.constant dense<0.000000e+00> : vector<2x512xf32>
    %444 = tpu.matmul %443, %259, %cst_100 {dimension_numbers = #tpu.dot_dimension_numbers<[1], [0], [0], [1], [0, 0, 1, 1], [], []>} : vector<2x128xbf16>, vector<128x512xbf16>, vector<2x512xf32> -> vector<2x512xf32>
    %445 = arith.addf %442, %444 : vector<2x512xf32>
    %446 = vector.extract_strided_slice %445 {offsets = [0, 0], sizes = [2, 128], strides = [1, 1]} : vector<2x512xf32> to vector<2x128xf32>
    %447 = arith.negf %446 : vector<2x128xf32>
    %448 = math.exp %447 : vector<2x128xf32>
    %cst_101 = arith.constant 1.000000e+00 : f32
    %449 = vector.broadcast %cst_101 : f32 to vector<2x128xf32>
    %450 = arith.addf %449, %448 : vector<2x128xf32>
    %451 = arith.divf %449, %450 : vector<2x128xf32>
    %452 = vector.extract_strided_slice %445 {offsets = [0, 128], sizes = [2, 128], strides = [1, 1]} : vector<2x512xf32> to vector<2x128xf32>
    %453 = arith.negf %452 : vector<2x128xf32>
    %454 = math.exp %453 : vector<2x128xf32>
    %cst_102 = arith.constant 1.000000e+00 : f32
    %455 = vector.broadcast %cst_102 : f32 to vector<2x128xf32>
    %456 = arith.addf %455, %454 : vector<2x128xf32>
    %457 = arith.divf %455, %456 : vector<2x128xf32>
    %458 = vector.extract_strided_slice %445 {offsets = [0, 256], sizes = [2, 128], strides = [1, 1]} : vector<2x512xf32> to vector<2x128xf32>
    %459 = math.tanh %458 : vector<2x128xf32>
    %460 = vector.extract_strided_slice %445 {offsets = [0, 384], sizes = [2, 128], strides = [1, 1]} : vector<2x512xf32> to vector<2x128xf32>
    %461 = arith.negf %460 : vector<2x128xf32>
    %462 = math.exp %461 : vector<2x128xf32>
    %cst_103 = arith.constant 1.000000e+00 : f32
    %463 = vector.broadcast %cst_103 : f32 to vector<2x128xf32>
    %464 = arith.addf %463, %462 : vector<2x128xf32>
    %465 = arith.divf %463, %464 : vector<2x128xf32>
    %466 = arith.mulf %457, %438 : vector<2x128xf32>
    %467 = arith.mulf %451, %459 : vector<2x128xf32>
    %468 = arith.addf %466, %467 : vector<2x128xf32>
    %469 = math.tanh %468 : vector<2x128xf32>
    %470 = arith.mulf %465, %469 : vector<2x128xf32>
    %c12_104 = arith.constant 12 : index
    %c0_105 = arith.constant 0 : index
    %471 = vector.load %arg16[%c12_104, %c0_105] : memref<16x128xf32, #tpu.memory_space<vmem>>, vector<2x128xf32>
    tpu.vector_store %arg16[%c12_104, %c0_105], %470 {strides = array<i32>} : memref<16x128xf32, #tpu.memory_space<vmem>>, vector<2x128xf32>,
    %472 = vector.extract_strided_slice %257 {offsets = [14, 0], sizes = [2, 512], strides = [1, 1]} : vector<16x512xf32> to vector<2x512xf32>
    %473 = arith.truncf %470 : vector<2x128xf32> to vector<2x128xbf16>
    %cst_106 = arith.constant dense<0.000000e+00> : vector<2x512xf32>
    %474 = tpu.matmul %473, %259, %cst_106 {dimension_numbers = #tpu.dot_dimension_numbers<[1], [0], [0], [1], [0, 0, 1, 1], [], []>} : vector<2x128xbf16>, vector<128x512xbf16>, vector<2x512xf32> -> vector<2x512xf32>
    %475 = arith.addf %472, %474 : vector<2x512xf32>
    %476 = vector.extract_strided_slice %475 {offsets = [0, 0], sizes = [2, 128], strides = [1, 1]} : vector<2x512xf32> to vector<2x128xf32>
    %477 = arith.negf %476 : vector<2x128xf32>
    %478 = math.exp %477 : vector<2x128xf32>
    %cst_107 = arith.constant 1.000000e+00 : f32
    %479 = vector.broadcast %cst_107 : f32 to vector<2x128xf32>
    %480 = arith.addf %479, %478 : vector<2x128xf32>
    %481 = arith.divf %479, %480 : vector<2x128xf32>
    %482 = vector.extract_strided_slice %475 {offsets = [0, 128], sizes = [2, 128], strides = [1, 1]} : vector<2x512xf32> to vector<2x128xf32>
    %483 = arith.negf %482 : vector<2x128xf32>
    %484 = math.exp %483 : vector<2x128xf32>
    %cst_108 = arith.constant 1.000000e+00 : f32
    %485 = vector.broadcast %cst_108 : f32 to vector<2x128xf32>
    %486 = arith.addf %485, %484 : vector<2x128xf32>
    %487 = arith.divf %485, %486 : vector<2x128xf32>
    %488 = vector.extract_strided_slice %475 {offsets = [0, 256], sizes = [2, 128], strides = [1, 1]} : vector<2x512xf32> to vector<2x128xf32>
    %489 = math.tanh %488 : vector<2x128xf32>
    %490 = vector.extract_strided_slice %475 {offsets = [0, 384], sizes = [2, 128], strides = [1, 1]} : vector<2x512xf32> to vector<2x128xf32>
    %491 = arith.negf %490 : vector<2x128xf32>
    %492 = math.exp %491 : vector<2x128xf32>
    %cst_109 = arith.constant 1.000000e+00 : f32
    %493 = vector.broadcast %cst_109 : f32 to vector<2x128xf32>
    %494 = arith.addf %493, %492 : vector<2x128xf32>
    %495 = arith.divf %493, %494 : vector<2x128xf32>
    %496 = arith.mulf %487, %468 : vector<2x128xf32>
    %497 = arith.mulf %481, %489 : vector<2x128xf32>
    %498 = arith.addf %496, %497 : vector<2x128xf32>
    %499 = math.tanh %498 : vector<2x128xf32>
    %500 = arith.mulf %495, %499 : vector<2x128xf32>
    %c14_110 = arith.constant 14 : index
    %c0_111 = arith.constant 0 : index
    %501 = vector.load %arg16[%c14_110, %c0_111] : memref<16x128xf32, #tpu.memory_space<vmem>>, vector<2x128xf32>
    tpu.vector_store %arg16[%c14_110, %c0_111], %500 {strides = array<i32>} : memref<16x128xf32, #tpu.memory_space<vmem>>, vector<2x128xf32>,
    %c0_112 = arith.constant 0 : index
    %c0_113 = arith.constant 0 : index
    %502 = vector.load %arg16[%c0_112, %c0_113] : memref<16x128xf32, #tpu.memory_space<vmem>>, vector<16x128xf32>
    %503 = arith.truncf %502 : vector<16x128xf32> to vector<16x128xbf16>
    %c1 = arith.constant 1 : index
    %c0_114 = arith.constant 0 : index
    %c0_115 = arith.constant 0 : index
    %504 = vector.load %arg4[%c1, %c0_114, %c0_115] : memref<2x128x512xbf16, #tpu.memory_space<vmem>>, vector<1x128x512xbf16>
    %505 = vector.shape_cast %504 : vector<1x128x512xbf16> to vector<128x512xbf16>
    %cst_116 = arith.constant dense<0.000000e+00> : vector<16x512xf32>
    %506 = tpu.matmul %503, %505, %cst_116 {dimension_numbers = #tpu.dot_dimension_numbers<[1], [0], [0], [1], [0, 0, 1, 1], [], []>} : vector<16x128xbf16>, vector<128x512xbf16>, vector<16x512xf32> -> vector<16x512xf32>
    %c1_117 = arith.constant 1 : index
    %c0_118 = arith.constant 0 : index
    %c0_119 = arith.constant 0 : index
    %507 = vector.load %arg6[%c1_117, %c0_118, %c0_119] : memref<2x1x512xf32, #tpu.memory_space<vmem>>, vector<1x1x512xf32>
    %508 = vector.shape_cast %507 : vector<1x1x512xf32> to vector<1x512xf32>
    %509 = vector.broadcast %508 : vector<1x512xf32> to vector<16x512xf32>
    %510 = arith.addf %506, %509 : vector<16x512xf32>
    %c1_120 = arith.constant 1 : index
    %c0_121 = arith.constant 0 : index
    %c0_122 = arith.constant 0 : index
    %511 = vector.load %arg5[%c1_120, %c0_121, %c0_122] : memref<2x128x512xbf16, #tpu.memory_space<vmem>>, vector<1x128x512xbf16>
    %512 = vector.shape_cast %511 : vector<1x128x512xbf16> to vector<128x512xbf16>
    %cst_123 = arith.constant 0.000000e+00 : f32
    %513 = vector.broadcast %cst_123 : f32 to vector<2x128xf32>
    %cst_124 = arith.constant 0.000000e+00 : f32
    %514 = vector.broadcast %cst_124 : f32 to vector<2x128xf32>
    %515 = vector.extract_strided_slice %510 {offsets = [0, 0], sizes = [2, 512], strides = [1, 1]} : vector<16x512xf32> to vector<2x512xf32>
    %516 = arith.truncf %513 : vector<2x128xf32> to vector<2x128xbf16>
    %cst_125 = arith.constant dense<0.000000e+00> : vector<2x512xf32>
    %517 = tpu.matmul %516, %512, %cst_125 {dimension_numbers = #tpu.dot_dimension_numbers<[1], [0], [0], [1], [0, 0, 1, 1], [], []>} : vector<2x128xbf16>, vector<128x512xbf16>, vector<2x512xf32> -> vector<2x512xf32>
    %518 = arith.addf %515, %517 : vector<2x512xf32>
    %519 = vector.extract_strided_slice %518 {offsets = [0, 0], sizes = [2, 128], strides = [1, 1]} : vector<2x512xf32> to vector<2x128xf32>
    %520 = arith.negf %519 : vector<2x128xf32>
    %521 = math.exp %520 : vector<2x128xf32>
    %cst_126 = arith.constant 1.000000e+00 : f32
    %522 = vector.broadcast %cst_126 : f32 to vector<2x128xf32>
    %523 = arith.addf %522, %521 : vector<2x128xf32>
    %524 = arith.divf %522, %523 : vector<2x128xf32>
    %525 = vector.extract_strided_slice %518 {offsets = [0, 128], sizes = [2, 128], strides = [1, 1]} : vector<2x512xf32> to vector<2x128xf32>
    %526 = arith.negf %525 : vector<2x128xf32>
    %527 = math.exp %526 : vector<2x128xf32>
    %cst_127 = arith.constant 1.000000e+00 : f32
    %528 = vector.broadcast %cst_127 : f32 to vector<2x128xf32>
    %529 = arith.addf %528, %527 : vector<2x128xf32>
    %530 = arith.divf %528, %529 : vector<2x128xf32>
    %531 = vector.extract_strided_slice %518 {offsets = [0, 256], sizes = [2, 128], strides = [1, 1]} : vector<2x512xf32> to vector<2x128xf32>
    %532 = math.tanh %531 : vector<2x128xf32>
    %533 = vector.extract_strided_slice %518 {offsets = [0, 384], sizes = [2, 128], strides = [1, 1]} : vector<2x512xf32> to vector<2x128xf32>
    %534 = arith.negf %533 : vector<2x128xf32>
    %535 = math.exp %534 : vector<2x128xf32>
    %cst_128 = arith.constant 1.000000e+00 : f32
    %536 = vector.broadcast %cst_128 : f32 to vector<2x128xf32>
    %537 = arith.addf %536, %535 : vector<2x128xf32>
    %538 = arith.divf %536, %537 : vector<2x128xf32>
    %539 = arith.mulf %530, %514 : vector<2x128xf32>
    %540 = arith.mulf %524, %532 : vector<2x128xf32>
    %541 = arith.addf %539, %540 : vector<2x128xf32>
    %542 = math.tanh %541 : vector<2x128xf32>
    %543 = arith.mulf %538, %542 : vector<2x128xf32>
    %544 = vector.extract_strided_slice %510 {offsets = [2, 0], sizes = [2, 512], strides = [1, 1]} : vector<16x512xf32> to vector<2x512xf32>
    %545 = arith.truncf %543 : vector<2x128xf32> to vector<2x128xbf16>
    %cst_129 = arith.constant dense<0.000000e+00> : vector<2x512xf32>
    %546 = tpu.matmul %545, %512, %cst_129 {dimension_numbers = #tpu.dot_dimension_numbers<[1], [0], [0], [1], [0, 0, 1, 1], [], []>} : vector<2x128xbf16>, vector<128x512xbf16>, vector<2x512xf32> -> vector<2x512xf32>
    %547 = arith.addf %544, %546 : vector<2x512xf32>
    %548 = vector.extract_strided_slice %547 {offsets = [0, 0], sizes = [2, 128], strides = [1, 1]} : vector<2x512xf32> to vector<2x128xf32>
    %549 = arith.negf %548 : vector<2x128xf32>
    %550 = math.exp %549 : vector<2x128xf32>
    %cst_130 = arith.constant 1.000000e+00 : f32
    %551 = vector.broadcast %cst_130 : f32 to vector<2x128xf32>
    %552 = arith.addf %551, %550 : vector<2x128xf32>
    %553 = arith.divf %551, %552 : vector<2x128xf32>
    %554 = vector.extract_strided_slice %547 {offsets = [0, 128], sizes = [2, 128], strides = [1, 1]} : vector<2x512xf32> to vector<2x128xf32>
    %555 = arith.negf %554 : vector<2x128xf32>
    %556 = math.exp %555 : vector<2x128xf32>
    %cst_131 = arith.constant 1.000000e+00 : f32
    %557 = vector.broadcast %cst_131 : f32 to vector<2x128xf32>
    %558 = arith.addf %557, %556 : vector<2x128xf32>
    %559 = arith.divf %557, %558 : vector<2x128xf32>
    %560 = vector.extract_strided_slice %547 {offsets = [0, 256], sizes = [2, 128], strides = [1, 1]} : vector<2x512xf32> to vector<2x128xf32>
    %561 = math.tanh %560 : vector<2x128xf32>
    %562 = vector.extract_strided_slice %547 {offsets = [0, 384], sizes = [2, 128], strides = [1, 1]} : vector<2x512xf32> to vector<2x128xf32>
    %563 = arith.negf %562 : vector<2x128xf32>
    %564 = math.exp %563 : vector<2x128xf32>
    %cst_132 = arith.constant 1.000000e+00 : f32
    %565 = vector.broadcast %cst_132 : f32 to vector<2x128xf32>
    %566 = arith.addf %565, %564 : vector<2x128xf32>
    %567 = arith.divf %565, %566 : vector<2x128xf32>
    %568 = arith.mulf %559, %541 : vector<2x128xf32>
    %569 = arith.mulf %553, %561 : vector<2x128xf32>
    %570 = arith.addf %568, %569 : vector<2x128xf32>
    %571 = math.tanh %570 : vector<2x128xf32>
    %572 = arith.mulf %567, %571 : vector<2x128xf32>
    %573 = vector.extract_strided_slice %510 {offsets = [4, 0], sizes = [2, 512], strides = [1, 1]} : vector<16x512xf32> to vector<2x512xf32>
    %574 = arith.truncf %572 : vector<2x128xf32> to vector<2x128xbf16>
    %cst_133 = arith.constant dense<0.000000e+00> : vector<2x512xf32>
    %575 = tpu.matmul %574, %512, %cst_133 {dimension_numbers = #tpu.dot_dimension_numbers<[1], [0], [0], [1], [0, 0, 1, 1], [], []>} : vector<2x128xbf16>, vector<128x512xbf16>, vector<2x512xf32> -> vector<2x512xf32>
    %576 = arith.addf %573, %575 : vector<2x512xf32>
    %577 = vector.extract_strided_slice %576 {offsets = [0, 0], sizes = [2, 128], strides = [1, 1]} : vector<2x512xf32> to vector<2x128xf32>
    %578 = arith.negf %577 : vector<2x128xf32>
    %579 = math.exp %578 : vector<2x128xf32>
    %cst_134 = arith.constant 1.000000e+00 : f32
    %580 = vector.broadcast %cst_134 : f32 to vector<2x128xf32>
    %581 = arith.addf %580, %579 : vector<2x128xf32>
    %582 = arith.divf %580, %581 : vector<2x128xf32>
    %583 = vector.extract_strided_slice %576 {offsets = [0, 128], sizes = [2, 128], strides = [1, 1]} : vector<2x512xf32> to vector<2x128xf32>
    %584 = arith.negf %583 : vector<2x128xf32>
    %585 = math.exp %584 : vector<2x128xf32>
    %cst_135 = arith.constant 1.000000e+00 : f32
    %586 = vector.broadcast %cst_135 : f32 to vector<2x128xf32>
    %587 = arith.addf %586, %585 : vector<2x128xf32>
    %588 = arith.divf %586, %587 : vector<2x128xf32>
    %589 = vector.extract_strided_slice %576 {offsets = [0, 256], sizes = [2, 128], strides = [1, 1]} : vector<2x512xf32> to vector<2x128xf32>
    %590 = math.tanh %589 : vector<2x128xf32>
    %591 = vector.extract_strided_slice %576 {offsets = [0, 384], sizes = [2, 128], strides = [1, 1]} : vector<2x512xf32> to vector<2x128xf32>
    %592 = arith.negf %591 : vector<2x128xf32>
    %593 = math.exp %592 : vector<2x128xf32>
    %cst_136 = arith.constant 1.000000e+00 : f32
    %594 = vector.broadcast %cst_136 : f32 to vector<2x128xf32>
    %595 = arith.addf %594, %593 : vector<2x128xf32>
    %596 = arith.divf %594, %595 : vector<2x128xf32>
    %597 = arith.mulf %588, %570 : vector<2x128xf32>
    %598 = arith.mulf %582, %590 : vector<2x128xf32>
    %599 = arith.addf %597, %598 : vector<2x128xf32>
    %600 = math.tanh %599 : vector<2x128xf32>
    %601 = arith.mulf %596, %600 : vector<2x128xf32>
    %602 = vector.extract_strided_slice %510 {offsets = [6, 0], sizes = [2, 512], strides = [1, 1]} : vector<16x512xf32> to vector<2x512xf32>
    %603 = arith.truncf %601 : vector<2x128xf32> to vector<2x128xbf16>
    %cst_137 = arith.constant dense<0.000000e+00> : vector<2x512xf32>
    %604 = tpu.matmul %603, %512, %cst_137 {dimension_numbers = #tpu.dot_dimension_numbers<[1], [0], [0], [1], [0, 0, 1, 1], [], []>} : vector<2x128xbf16>, vector<128x512xbf16>, vector<2x512xf32> -> vector<2x512xf32>
    %605 = arith.addf %602, %604 : vector<2x512xf32>
    %606 = vector.extract_strided_slice %605 {offsets = [0, 0], sizes = [2, 128], strides = [1, 1]} : vector<2x512xf32> to vector<2x128xf32>
    %607 = arith.negf %606 : vector<2x128xf32>
    %608 = math.exp %607 : vector<2x128xf32>
    %cst_138 = arith.constant 1.000000e+00 : f32
    %609 = vector.broadcast %cst_138 : f32 to vector<2x128xf32>
    %610 = arith.addf %609, %608 : vector<2x128xf32>
    %611 = arith.divf %609, %610 : vector<2x128xf32>
    %612 = vector.extract_strided_slice %605 {offsets = [0, 128], sizes = [2, 128], strides = [1, 1]} : vector<2x512xf32> to vector<2x128xf32>
    %613 = arith.negf %612 : vector<2x128xf32>
    %614 = math.exp %613 : vector<2x128xf32>
    %cst_139 = arith.constant 1.000000e+00 : f32
    %615 = vector.broadcast %cst_139 : f32 to vector<2x128xf32>
    %616 = arith.addf %615, %614 : vector<2x128xf32>
    %617 = arith.divf %615, %616 : vector<2x128xf32>
    %618 = vector.extract_strided_slice %605 {offsets = [0, 256], sizes = [2, 128], strides = [1, 1]} : vector<2x512xf32> to vector<2x128xf32>
    %619 = math.tanh %618 : vector<2x128xf32>
    %620 = vector.extract_strided_slice %605 {offsets = [0, 384], sizes = [2, 128], strides = [1, 1]} : vector<2x512xf32> to vector<2x128xf32>
    %621 = arith.negf %620 : vector<2x128xf32>
    %622 = math.exp %621 : vector<2x128xf32>
    %cst_140 = arith.constant 1.000000e+00 : f32
    %623 = vector.broadcast %cst_140 : f32 to vector<2x128xf32>
    %624 = arith.addf %623, %622 : vector<2x128xf32>
    %625 = arith.divf %623, %624 : vector<2x128xf32>
    %626 = arith.mulf %617, %599 : vector<2x128xf32>
    %627 = arith.mulf %611, %619 : vector<2x128xf32>
    %628 = arith.addf %626, %627 : vector<2x128xf32>
    %629 = math.tanh %628 : vector<2x128xf32>
    %630 = arith.mulf %625, %629 : vector<2x128xf32>
    %631 = vector.extract_strided_slice %510 {offsets = [8, 0], sizes = [2, 512], strides = [1, 1]} : vector<16x512xf32> to vector<2x512xf32>
    %632 = arith.truncf %630 : vector<2x128xf32> to vector<2x128xbf16>
    %cst_141 = arith.constant dense<0.000000e+00> : vector<2x512xf32>
    %633 = tpu.matmul %632, %512, %cst_141 {dimension_numbers = #tpu.dot_dimension_numbers<[1], [0], [0], [1], [0, 0, 1, 1], [], []>} : vector<2x128xbf16>, vector<128x512xbf16>, vector<2x512xf32> -> vector<2x512xf32>
    %634 = arith.addf %631, %633 : vector<2x512xf32>
    %635 = vector.extract_strided_slice %634 {offsets = [0, 0], sizes = [2, 128], strides = [1, 1]} : vector<2x512xf32> to vector<2x128xf32>
    %636 = arith.negf %635 : vector<2x128xf32>
    %637 = math.exp %636 : vector<2x128xf32>
    %cst_142 = arith.constant 1.000000e+00 : f32
    %638 = vector.broadcast %cst_142 : f32 to vector<2x128xf32>
    %639 = arith.addf %638, %637 : vector<2x128xf32>
    %640 = arith.divf %638, %639 : vector<2x128xf32>
    %641 = vector.extract_strided_slice %634 {offsets = [0, 128], sizes = [2, 128], strides = [1, 1]} : vector<2x512xf32> to vector<2x128xf32>
    %642 = arith.negf %641 : vector<2x128xf32>
    %643 = math.exp %642 : vector<2x128xf32>
    %cst_143 = arith.constant 1.000000e+00 : f32
    %644 = vector.broadcast %cst_143 : f32 to vector<2x128xf32>
    %645 = arith.addf %644, %643 : vector<2x128xf32>
    %646 = arith.divf %644, %645 : vector<2x128xf32>
    %647 = vector.extract_strided_slice %634 {offsets = [0, 256], sizes = [2, 128], strides = [1, 1]} : vector<2x512xf32> to vector<2x128xf32>
    %648 = math.tanh %647 : vector<2x128xf32>
    %649 = vector.extract_strided_slice %634 {offsets = [0, 384], sizes = [2, 128], strides = [1, 1]} : vector<2x512xf32> to vector<2x128xf32>
    %650 = arith.negf %649 : vector<2x128xf32>
    %651 = math.exp %650 : vector<2x128xf32>
    %cst_144 = arith.constant 1.000000e+00 : f32
    %652 = vector.broadcast %cst_144 : f32 to vector<2x128xf32>
    %653 = arith.addf %652, %651 : vector<2x128xf32>
    %654 = arith.divf %652, %653 : vector<2x128xf32>
    %655 = arith.mulf %646, %628 : vector<2x128xf32>
    %656 = arith.mulf %640, %648 : vector<2x128xf32>
    %657 = arith.addf %655, %656 : vector<2x128xf32>
    %658 = math.tanh %657 : vector<2x128xf32>
    %659 = arith.mulf %654, %658 : vector<2x128xf32>
    %660 = vector.extract_strided_slice %510 {offsets = [10, 0], sizes = [2, 512], strides = [1, 1]} : vector<16x512xf32> to vector<2x512xf32>
    %661 = arith.truncf %659 : vector<2x128xf32> to vector<2x128xbf16>
    %cst_145 = arith.constant dense<0.000000e+00> : vector<2x512xf32>
    %662 = tpu.matmul %661, %512, %cst_145 {dimension_numbers = #tpu.dot_dimension_numbers<[1], [0], [0], [1], [0, 0, 1, 1], [], []>} : vector<2x128xbf16>, vector<128x512xbf16>, vector<2x512xf32> -> vector<2x512xf32>
    %663 = arith.addf %660, %662 : vector<2x512xf32>
    %664 = vector.extract_strided_slice %663 {offsets = [0, 0], sizes = [2, 128], strides = [1, 1]} : vector<2x512xf32> to vector<2x128xf32>
    %665 = arith.negf %664 : vector<2x128xf32>
    %666 = math.exp %665 : vector<2x128xf32>
    %cst_146 = arith.constant 1.000000e+00 : f32
    %667 = vector.broadcast %cst_146 : f32 to vector<2x128xf32>
    %668 = arith.addf %667, %666 : vector<2x128xf32>
    %669 = arith.divf %667, %668 : vector<2x128xf32>
    %670 = vector.extract_strided_slice %663 {offsets = [0, 128], sizes = [2, 128], strides = [1, 1]} : vector<2x512xf32> to vector<2x128xf32>
    %671 = arith.negf %670 : vector<2x128xf32>
    %672 = math.exp %671 : vector<2x128xf32>
    %cst_147 = arith.constant 1.000000e+00 : f32
    %673 = vector.broadcast %cst_147 : f32 to vector<2x128xf32>
    %674 = arith.addf %673, %672 : vector<2x128xf32>
    %675 = arith.divf %673, %674 : vector<2x128xf32>
    %676 = vector.extract_strided_slice %663 {offsets = [0, 256], sizes = [2, 128], strides = [1, 1]} : vector<2x512xf32> to vector<2x128xf32>
    %677 = math.tanh %676 : vector<2x128xf32>
    %678 = vector.extract_strided_slice %663 {offsets = [0, 384], sizes = [2, 128], strides = [1, 1]} : vector<2x512xf32> to vector<2x128xf32>
    %679 = arith.negf %678 : vector<2x128xf32>
    %680 = math.exp %679 : vector<2x128xf32>
    %cst_148 = arith.constant 1.000000e+00 : f32
    %681 = vector.broadcast %cst_148 : f32 to vector<2x128xf32>
    %682 = arith.addf %681, %680 : vector<2x128xf32>
    %683 = arith.divf %681, %682 : vector<2x128xf32>
    %684 = arith.mulf %675, %657 : vector<2x128xf32>
    %685 = arith.mulf %669, %677 : vector<2x128xf32>
    %686 = arith.addf %684, %685 : vector<2x128xf32>
    %687 = math.tanh %686 : vector<2x128xf32>
    %688 = arith.mulf %683, %687 : vector<2x128xf32>
    %689 = vector.extract_strided_slice %510 {offsets = [12, 0], sizes = [2, 512], strides = [1, 1]} : vector<16x512xf32> to vector<2x512xf32>
    %690 = arith.truncf %688 : vector<2x128xf32> to vector<2x128xbf16>
    %cst_149 = arith.constant dense<0.000000e+00> : vector<2x512xf32>
    %691 = tpu.matmul %690, %512, %cst_149 {dimension_numbers = #tpu.dot_dimension_numbers<[1], [0], [0], [1], [0, 0, 1, 1], [], []>} : vector<2x128xbf16>, vector<128x512xbf16>, vector<2x512xf32> -> vector<2x512xf32>
    %692 = arith.addf %689, %691 : vector<2x512xf32>
    %693 = vector.extract_strided_slice %692 {offsets = [0, 0], sizes = [2, 128], strides = [1, 1]} : vector<2x512xf32> to vector<2x128xf32>
    %694 = arith.negf %693 : vector<2x128xf32>
    %695 = math.exp %694 : vector<2x128xf32>
    %cst_150 = arith.constant 1.000000e+00 : f32
    %696 = vector.broadcast %cst_150 : f32 to vector<2x128xf32>
    %697 = arith.addf %696, %695 : vector<2x128xf32>
    %698 = arith.divf %696, %697 : vector<2x128xf32>
    %699 = vector.extract_strided_slice %692 {offsets = [0, 128], sizes = [2, 128], strides = [1, 1]} : vector<2x512xf32> to vector<2x128xf32>
    %700 = arith.negf %699 : vector<2x128xf32>
    %701 = math.exp %700 : vector<2x128xf32>
    %cst_151 = arith.constant 1.000000e+00 : f32
    %702 = vector.broadcast %cst_151 : f32 to vector<2x128xf32>
    %703 = arith.addf %702, %701 : vector<2x128xf32>
    %704 = arith.divf %702, %703 : vector<2x128xf32>
    %705 = vector.extract_strided_slice %692 {offsets = [0, 256], sizes = [2, 128], strides = [1, 1]} : vector<2x512xf32> to vector<2x128xf32>
    %706 = math.tanh %705 : vector<2x128xf32>
    %707 = vector.extract_strided_slice %692 {offsets = [0, 384], sizes = [2, 128], strides = [1, 1]} : vector<2x512xf32> to vector<2x128xf32>
    %708 = arith.negf %707 : vector<2x128xf32>
    %709 = math.exp %708 : vector<2x128xf32>
    %cst_152 = arith.constant 1.000000e+00 : f32
    %710 = vector.broadcast %cst_152 : f32 to vector<2x128xf32>
    %711 = arith.addf %710, %709 : vector<2x128xf32>
    %712 = arith.divf %710, %711 : vector<2x128xf32>
    %713 = arith.mulf %704, %686 : vector<2x128xf32>
    %714 = arith.mulf %698, %706 : vector<2x128xf32>
    %715 = arith.addf %713, %714 : vector<2x128xf32>
    %716 = math.tanh %715 : vector<2x128xf32>
    %717 = arith.mulf %712, %716 : vector<2x128xf32>
    %718 = vector.extract_strided_slice %510 {offsets = [14, 0], sizes = [2, 512], strides = [1, 1]} : vector<16x512xf32> to vector<2x512xf32>
    %719 = arith.truncf %717 : vector<2x128xf32> to vector<2x128xbf16>
    %cst_153 = arith.constant dense<0.000000e+00> : vector<2x512xf32>
    %720 = tpu.matmul %719, %512, %cst_153 {dimension_numbers = #tpu.dot_dimension_numbers<[1], [0], [0], [1], [0, 0, 1, 1], [], []>} : vector<2x128xbf16>, vector<128x512xbf16>, vector<2x512xf32> -> vector<2x512xf32>
    %721 = arith.addf %718, %720 : vector<2x512xf32>
    %722 = vector.extract_strided_slice %721 {offsets = [0, 0], sizes = [2, 128], strides = [1, 1]} : vector<2x512xf32> to vector<2x128xf32>
    %723 = arith.negf %722 : vector<2x128xf32>
    %724 = math.exp %723 : vector<2x128xf32>
    %cst_154 = arith.constant 1.000000e+00 : f32
    %725 = vector.broadcast %cst_154 : f32 to vector<2x128xf32>
    %726 = arith.addf %725, %724 : vector<2x128xf32>
    %727 = arith.divf %725, %726 : vector<2x128xf32>
    %728 = vector.extract_strided_slice %721 {offsets = [0, 128], sizes = [2, 128], strides = [1, 1]} : vector<2x512xf32> to vector<2x128xf32>
    %729 = arith.negf %728 : vector<2x128xf32>
    %730 = math.exp %729 : vector<2x128xf32>
    %cst_155 = arith.constant 1.000000e+00 : f32
    %731 = vector.broadcast %cst_155 : f32 to vector<2x128xf32>
    %732 = arith.addf %731, %730 : vector<2x128xf32>
    %733 = arith.divf %731, %732 : vector<2x128xf32>
    %734 = vector.extract_strided_slice %721 {offsets = [0, 256], sizes = [2, 128], strides = [1, 1]} : vector<2x512xf32> to vector<2x128xf32>
    %735 = math.tanh %734 : vector<2x128xf32>
    %736 = vector.extract_strided_slice %721 {offsets = [0, 384], sizes = [2, 128], strides = [1, 1]} : vector<2x512xf32> to vector<2x128xf32>
    %737 = arith.negf %736 : vector<2x128xf32>
    %738 = math.exp %737 : vector<2x128xf32>
    %cst_156 = arith.constant 1.000000e+00 : f32
    %739 = vector.broadcast %cst_156 : f32 to vector<2x128xf32>
    %740 = arith.addf %739, %738 : vector<2x128xf32>
    %741 = arith.divf %739, %740 : vector<2x128xf32>
    %742 = arith.mulf %733, %715 : vector<2x128xf32>
    %743 = arith.mulf %727, %735 : vector<2x128xf32>
    %744 = arith.addf %742, %743 : vector<2x128xf32>
    %745 = math.tanh %744 : vector<2x128xf32>
    %746 = arith.mulf %741, %745 : vector<2x128xf32>
    %c0_157 = arith.constant 0 : index
    %c0_158 = arith.constant 0 : index
    %747 = vector.load %arg7[%c0_157, %c0_158] : memref<128x384xf32, #tpu.memory_space<vmem>>, vector<128x384xf32>
    %cst_159 = arith.constant dense<0.000000e+00> : vector<2x384xf32>
    %748 = tpu.matmul %746, %747, %cst_159 {dimension_numbers = #tpu.dot_dimension_numbers<[1], [0], [0], [1], [0, 0, 1, 1], [], []>} : vector<2x128xf32>, vector<128x384xf32>, vector<2x384xf32> -> vector<2x384xf32>
    %c0_160 = arith.constant 0 : index
    %c0_161 = arith.constant 0 : index
    %749 = vector.load %arg8[%c0_160, %c0_161] : memref<1x384xf32, #tpu.memory_space<vmem>>, vector<1x384xf32>
    %750 = vector.broadcast %749 : vector<1x384xf32> to vector<2x384xf32>
    %751 = arith.addf %748, %750 : vector<2x384xf32>
    %752 = vector.extract_strided_slice %751 {offsets = [0, 0], sizes = [2, 128], strides = [1, 1]} : vector<2x384xf32> to vector<2x128xf32>
    %753 = vector.extract_strided_slice %751 {offsets = [0, 128], sizes = [2, 128], strides = [1, 1]} : vector<2x384xf32> to vector<2x128xf32>
    %754 = vector.extract_strided_slice %751 {offsets = [0, 256], sizes = [2, 128], strides = [1, 1]} : vector<2x384xf32> to vector<2x128xf32>
    %755 = arith.mulf %752, %753 : vector<2x128xf32>
    %c0_162 = arith.constant 0 : index
    %c0_163 = arith.constant 0 : index
    %756 = vector.load %arg9[%c0_162, %c0_163] : memref<128x16xf32, #tpu.memory_space<vmem>>, vector<128x16xf32>
    %cst_164 = arith.constant dense<0.000000e+00> : vector<2x16xf32>
    %757 = tpu.matmul %755, %756, %cst_164 {dimension_numbers = #tpu.dot_dimension_numbers<[1], [0], [0], [1], [0, 0, 1, 1], [], []>} : vector<2x128xf32>, vector<128x16xf32>, vector<2x16xf32> -> vector<2x16xf32>
    %cst_165 = arith.constant dense<0xFF800000> : vector<2xf32>
    %758 = vector.multi_reduction <maximumf>, %757, %cst_165 [1] : vector<2x16xf32> to vector<2xf32>
    %759 = vector.shape_cast %758 : vector<2xf32> to vector<2x1xf32>
    %760 = vector.broadcast %759 : vector<2x1xf32> to vector<2x16xf32>
    %761 = arith.subf %757, %760 : vector<2x16xf32>
    %762 = math.exp %761 : vector<2x16xf32>
    %c0_166 = arith.constant 0 : index
    %c0_167 = arith.constant 0 : index
    %763 = vector.load %arg10[%c0_166, %c0_167] : memref<16x16xf32, #tpu.memory_space<vmem>>, vector<16x16xf32>
    %cst_168 = arith.constant dense<0.000000e+00> : vector<2x16xf32>
    %764 = tpu.matmul %762, %763, %cst_168 {dimension_numbers = #tpu.dot_dimension_numbers<[1], [0], [0], [1], [0, 0, 1, 1], [], []>} : vector<2x16xf32>, vector<16x16xf32>, vector<2x16xf32> -> vector<2x16xf32>
    %765 = tpu.reciprocal %764 {approx = true} : vector<2x16xf32> -> vector<2x16xf32>
    %766 = arith.mulf %762, %765 : vector<2x16xf32>
    %c0_169 = arith.constant 0 : index
    %c0_170 = arith.constant 0 : index
    %767 = vector.load %arg11[%c0_169, %c0_170] : memref<16x128xf32, #tpu.memory_space<vmem>>, vector<16x128xf32>
    %cst_171 = arith.constant dense<0.000000e+00> : vector<2x128xf32>
    %768 = tpu.matmul %766, %767, %cst_171 {dimension_numbers = #tpu.dot_dimension_numbers<[1], [0], [0], [1], [0, 0, 1, 1], [], []>} : vector<2x16xf32>, vector<16x128xf32>, vector<2x128xf32> -> vector<2x128xf32>
    %769 = arith.mulf %768, %754 : vector<2x128xf32>
    %c0_172 = arith.constant 0 : index
    %c0_173 = arith.constant 0 : index
    %770 = vector.load %arg12[%c0_172, %c0_173] : memref<128x32xf32, #tpu.memory_space<vmem>>, vector<128x32xf32>
    %cst_174 = arith.constant dense<0.000000e+00> : vector<2x32xf32>
    %771 = tpu.matmul %769, %770, %cst_174 {dimension_numbers = #tpu.dot_dimension_numbers<[1], [0], [0], [1], [0, 0, 1, 1], [], []>} : vector<2x128xf32>, vector<128x32xf32>, vector<2x32xf32> -> vector<2x32xf32>
    %c0_175 = arith.constant 0 : index
    %c0_176 = arith.constant 0 : index
    %772 = vector.load %arg13[%c0_175, %c0_176] : memref<32x8xf32, #tpu.memory_space<vmem>>, vector<32x8xf32>
    %cst_177 = arith.constant dense<0.000000e+00> : vector<2x8xf32>
    %773 = tpu.matmul %771, %772, %cst_177 {dimension_numbers = #tpu.dot_dimension_numbers<[1], [0], [0], [1], [0, 0, 1, 1], [], []>} : vector<2x32xf32>, vector<32x8xf32>, vector<2x8xf32> -> vector<2x8xf32>
    %c0_178 = arith.constant 0 : index
    %c0_179 = arith.constant 0 : index
    %774 = vector.load %arg14[%c0_178, %c0_179] : memref<1x8xf32, #tpu.memory_space<vmem>>, vector<1x8xf32>
    %775 = vector.broadcast %774 : vector<1x8xf32> to vector<2x8xf32>
    %776 = arith.addf %773, %775 : vector<2x8xf32>
    %c0_180 = arith.constant 0 : index
    %c0_181 = arith.constant 0 : index
    %777 = vector.load %arg15[%c0_180, %c0_181] : memref<2x8xf32, #tpu.memory_space<vmem>>, vector<2x8xf32>
    tpu.vector_store %arg15[%c0_180, %c0_181], %776 {strides = array<i32>} : memref<2x8xf32, #tpu.memory_space<vmem>>, vector<2x8xf32>,
    return
  }
}

</mosaic_0001>

<bundles_post_ra>
// kernel: coinwise_forward.1
= control target key start
LH: loop header
LB: loop body
LE: loop exit
PB: predicated region body
PF: predicated region fallthrough
CT: control target
= control target key end

     0   :  { %20 = vsyncpa [#allocation4], 0  ;;  %s8048_s0 = inlined_call_operand.vmem [shape: bf16[16,16], index: 0, kind: input, shape index: {}]   ;;  %s8049_s1 = inlined_call_operand.vmem [shape: bf16[16,512], index: 1, kind: input, shape index: {}]   ;;  %s8050_s2 = inlined_call_operand.hbm [shape: bf16[128,512], index: 2, kind: input, shape index: {}]   ;;  %s8051_s3 = inlined_call_operand.vmem [shape: f32[1,512], index: 3, kind: input, shape index: {}]   ;;  %s8052_s4 = inlined_call_operand.hbm [shape: bf16[2,128,512], index: 4, kind: input, shape index: {}]   ;;  %s8053_s5 = inlined_call_operand.hbm [shape: bf16[2,128,512], index: 5, kind: input, shape index: {}]   ;;  %s8054_s6 = inlined_call_operand.vmem [shape: f32[2,1,512], index: 6, kind: input, shape index: {}]   ;;  %s8055_s7 = inlined_call_operand.vmem [shape: f32[128,384], index: 7, kind: input, shape index: {}]   ;;  %s8056_s8 = inlined_call_operand.vmem [shape: f32[1,384], index: 8, kind: input, shape index: {}]   ;;  %s8057_s9 = inlined_call_operand.vmem [shape: f32[128,16], index: 9, kind: input, shape index: {}]   ;;  %s8058_s10 = inlined_call_operand.vmem [shape: f32[16,16], index: 10, kind: input, shape index: {}]   ;;  %s8059_s11 = inlined_call_operand.vmem [shape: f32[16,128], index: 11, kind: input, shape index: {}]   ;;  %s8060_s12 = inlined_call_operand.vmem [shape: f32[128,32], index: 12, kind: input, shape index: {}]   ;;  %s8061_s13 = inlined_call_operand.vmem [shape: f32[32,8], index: 13, kind: input, shape index: {}]   ;;  %s8062_s14 = inlined_call_operand.vmem [shape: f32[1,8], index: 14, kind: input, shape index: {}]   ;;  %s8063_s15 = inlined_call_operand.vmem [shape: f32[2,8], index: 15, kind: output, shape index: {}]  }
   0x1   :  { %21 = vsyncpa [#allocation6], 0  ;;  %s6295_s18 = smov [#allocation5]   ;;  %s6296_s20 = smov [#allocation3]  }
   0x2   :  { %s45_s19 = sshll.u32 %s6295_s18, 4  ;;  %s31_s21 = sshll.u32 %s6296_s20, 4  ;;  %s46_s19 = int_to_ptr.vmem [resolvable:$true] %s45_s19  ;;  %s32_s21 = int_to_ptr.vmem [resolvable:$true] %s31_s21 }
   0x3   :  { %s6239_s22 = scalar_lea.vmem %s46_s19, 8192  ;;  %p6244_p1 = scmp.lt.s32.totalorder %s46_s19, %s46_s19 }
   0x4   :  { %p6240_p0 = scmp.ne.s32.totalorder %s46_s19, %s6239_s22  ;;  %p6245_p2 = scmp.lt.s32.totalorder %s6239_s22, %s6239_s22 }
   0x6   :  { %p6246_p3 = por %p6245_p2, %p6244_p1 }
   0x8   :  { %p6247_p4 = pnand %p6246_p3, %p6240_p0 }
   0xa   :  { %6250 = shalt.err (!%p6247_p4)
}
   0xb   :  { %s6297_s23 = smov 256   ;;  %s6298_s24 = smov 16  }
   0xc   :  { %51 = dma.hbm_to_vmem [thread:$0]  %s8052_s4, 8192, %s46_s19, [#allocation6], %s6297_s23, %s6297_s23, %s6298_s24  }
   0xd   :  { %s6259_s27 = scalar_lea.vmem %s32_s21, 4096  ;;  %p6264_p6 = scmp.lt.s32.totalorder %s32_s21, %s32_s21 }
   0xe   :  { %p6260_p5 = scmp.ne.s32.totalorder %s32_s21, %s6259_s27  ;;  %p6265_p7 = scmp.lt.s32.totalorder %s6259_s27, %s6259_s27 }
  0x10   :  { %p6266_p8 = por %p6265_p7, %p6264_p6 }
  0x12   :  { %p6267_p9 = pnand %p6266_p8, %p6260_p5 }
  0x14   :  { %6270 = shalt.err (!%p6267_p9)
}
  0x15   :  { %37 = dma.hbm_to_vmem [thread:$0]  %s8050_s2, 4096, %s32_s21, [#allocation4], %s6297_s23, %s6297_s23, %s6298_s24  }
  0x16   :  { %s6299_s30 = smov [#allocation7]  }
  0x17   :  { %s57_s16 = sshll.u32 %s6299_s30, 4  ;;  %s58_s16 = int_to_ptr.vmem [resolvable:$true] %s57_s16 }
  0x18   :  { %s6279_s17 = scalar_lea.vmem %s58_s16, 8192  ;;  %p6284_p11 = scmp.lt.s32.totalorder %s58_s16, %s58_s16 }
  0x19   :  { %p6280_p10 = scmp.ne.s32.totalorder %s58_s16, %s6279_s17  ;;  %p6285_p12 = scmp.lt.s32.totalorder %s6279_s17, %s6279_s17 }
  0x1b   :  { %p6286_p13 = por %p6285_p12, %p6284_p11 }
  0x1d   :  { %p6287_p0 = pnand %p6286_p13, %p6280_p10 }
  0x1f   :  { %6290 = shalt.err (!%p6287_p0)
}
  0x20   :  { %63 = dma.hbm_to_vmem [thread:$0]  %s8053_s5, 8192, %s58_s16, [#allocation6], %s6297_s23, %s6297_s23, %s6298_s24  }
  0x21   :  { %6291 = dma.done.wait [#allocation4], 4096  }
  0x22   :  { %6292 = vsyncadd [#allocation4], 4294963200 }
  0x23   :  { %6293 = dma.done.wait [#allocation6], 16384  }
  0x24   :  { %6294 = vsyncadd [#allocation6], 4294950912  ;;  %v8064_v0 = vmov 0   ;;  %v5500_v1 = vld [vmem:[%s8049_s1 + $0x4] ss:$16 sps:$4 sm:$0xff]   ;;  %vm145_vm0 = vcmask 130048   ;;  %v100_v38 = vlaneseq }
  0x25   :  { %181 = vmatprep.mubr.bf16.mxu0 %v8064_v0  ;;  %224 = vmatprep.mubr.bf16.mxu1 %v8064_v0  ;;  %v5502_v2 = vld [vmem:[%s8049_s1 + $0xc] ss:$16 sps:$4 sm:$0xff]   ;;  %v5504_v3 = vld [vmem:[%s8049_s1] ss:$16 sps:$4 sm:$0xff]   ;;  %v5505_v4 = vld [vmem:[%s8049_s1 + $0x8] ss:$16 sps:$4 sm:$0xff]  }
  0x26   :  { %163 = vmatprep.subr.bf16.mxu0 %v5500_v1  ;;  %206 = vmatprep.subr.bf16.mxu1 %v5502_v2  ;;  %v5506_v5 = vld [vmem:[%s8048_s0] sm:$0xff]   ;;  %v6411_v7 = vld [vmem:[#allocation3 + $0xec] ss:$16 sps:$4 sm:$0xff]   ;;  %v6416_v9 = vld [vmem:[#allocation3 + $0xe8] ss:$16 sps:$4 sm:$0xff]   ;;  %v101_v39 = vshrl.u32 %v100_v38, 7 }
  0x27   :  { %164 = vmatpush1.bf16.msra.mxu0 %v5504_v3  ;;  %207 = vmatpush1.bf16.msra.mxu1 %v5505_v4  ;;  %v6409_v6 = vld [vmem:[#allocation3 + $0xe4] ss:$16 sps:$4 sm:$0xff]   ;;  %v6413_v8 = vld [vmem:[#allocation3 + $0xe0] ss:$16 sps:$4 sm:$0xff]   ;;  %v6424_v11 = vld [vmem:[#allocation3 + $0xcc] ss:$16 sps:$4 sm:$0xff]  }
  0x28   :  { %427 = vmatprep.subr.bf16.mxu0 %v6409_v6  ;;  %468 = vmatprep.subr.bf16.mxu1 %v6411_v7  ;;  %v6420_v10 = vld [vmem:[#allocation3 + $0xc4] ss:$16 sps:$4 sm:$0xff]   ;;  %v6426_v12 = vld [vmem:[#allocation3 + $0xc0] ss:$16 sps:$4 sm:$0xff]   ;;  %v6428_v13 = vld [vmem:[#allocation3 + $0xc8] ss:$16 sps:$4 sm:$0xff]  }
  0x29   :  { %v6432_v14 = vld [vmem:[#allocation3 + $0xa4] ss:$16 sps:$4 sm:$0xff]   ;;  %v6435_v15 = vld [vmem:[#allocation3 + $0xac] ss:$16 sps:$4 sm:$0xff]   ;;  %v6440_v16 = vld [vmem:[#allocation3 + $0xa0] ss:$16 sps:$4 sm:$0xff]  }
  0x2a   :  { %5061 = vmatmul.mubr.msk.bf16.vlgmr.msra.gmra.mxu0 %vm145_vm0, %v5506_v5  ;;  %5062 = vmatmul.mubr.msk.bf16.vlgmr.msra.gmra.mxu1 %vm145_vm0, %v5506_v5  ;;  %v6444_v17 = vld [vmem:[#allocation3 + $0xa8] ss:$16 sps:$4 sm:$0xff]   ;;  %v6446_v18 = vld [vmem:[#allocation3 + $0x84] ss:$16 sps:$4 sm:$0xff]   ;;  %v6449_v19 = vld [vmem:[#allocation3 + $0x8c] ss:$16 sps:$4 sm:$0xff]  }
  0x2b   :  { %428 = vmatpush1.bf16.msra.mxu0 %v6413_v8  ;;  %469 = vmatpush1.bf16.msra.mxu1 %v6416_v9  ;;  %v6452_v20 = vld [vmem:[#allocation3 + $0x80] ss:$16 sps:$4 sm:$0xff]   ;;  %v6454_v21 = vld [vmem:[#allocation3 + $0x88] ss:$16 sps:$4 sm:$0xff]   ;;  %v6458_v22 = vld [vmem:[#allocation3 + $0x64] ss:$16 sps:$4 sm:$0xff]  }
  0x2c   :  { %429 = vmatprep.subr.bf16.mxu0 %v6420_v10  ;;  %470 = vmatprep.subr.bf16.mxu1 %v6424_v11  ;;  %v6461_v23 = vld [vmem:[#allocation3 + $0x6c] ss:$16 sps:$4 sm:$0xff]   ;;  %v6464_v24 = vld [vmem:[#allocation3 + $0x60] ss:$16 sps:$4 sm:$0xff]   ;;  %v6468_v25 = vld [vmem:[#allocation3 + $0x68] ss:$16 sps:$4 sm:$0xff]  }
  0x2d   :  { %459 = vmatprep.mubr.bf16.mxu0 %v8064_v0  ;;  %500 = vmatprep.mubr.bf16.mxu1 %v8064_v0  ;;  %v6470_v26 = vld [vmem:[#allocation3 + $0x44] ss:$16 sps:$4 sm:$0xff]   ;;  %v6473_v27 = vld [vmem:[#allocation3 + $0x4c] ss:$16 sps:$4 sm:$0xff]   ;;  %v6476_v28 = vld [vmem:[#allocation3 + $0x40] ss:$16 sps:$4 sm:$0xff]  }
  0x2e   :  { %v6478_v29 = vld [vmem:[#allocation3 + $0x48] ss:$16 sps:$4 sm:$0xff]   ;;  %v6480_v30 = vld [vmem:[#allocation3 + $0x24] ss:$16 sps:$4 sm:$0xff]   ;;  %v6484_v31 = vld [vmem:[#allocation3 + $0x2c] ss:$16 sps:$4 sm:$0xff]  }
  0x2f   :  { %430 = vmatpush1.bf16.msra.mxu0 %v6426_v12  ;;  %471 = vmatpush1.bf16.msra.mxu1 %v6428_v13  ;;  %v6487_v32 = vld [vmem:[#allocation3 + $0x20] ss:$16 sps:$4 sm:$0xff]   ;;  %v6489_v33 = vld [vmem:[#allocation3 + $0x28] ss:$16 sps:$4 sm:$0xff]   ;;  %v6491_v34 = vld [vmem:[#allocation3 + $0x4] ss:$16 sps:$4 sm:$0xff]  }
  0x30   :  { %431 = vmatprep.subr.bf16.mxu0 %v6432_v14  ;;  %472 = vmatprep.subr.bf16.mxu1 %v6435_v15  ;;  %v6494_v35 = vld [vmem:[#allocation3 + $0xc] ss:$16 sps:$4 sm:$0xff]   ;;  %v6499_v36 = vld [vmem:[#allocation3] ss:$16 sps:$4 sm:$0xff]   ;;  %v6501_v37 = vld [vmem:[#allocation3 + $0x8] ss:$16 sps:$4 sm:$0xff]  }
  0x31   :  { %v6547_v40 = vsub.s32 2, %v101_v39  ;;  %v6549_v41 = vsub.s32 0, %v101_v39  ;;  %v98_v42 = vld [vmem:[%s8051_s3] sm:$0xf]  ;;  %v6554_v44 = vsub.s32 1, %v101_v39  ;;  %v6572_v63 = vsub.s32 3, %v101_v39 }
  0x32   :  { %vm6302_vm1 = vmmov 0   ;;  %vm4717_vm2 = vcmask 123904   ;;  %vm4974_vm3 = vcmask 261120   ;;  %vm5048_vm4 = vcmask 58368  }
  0x33   :  { %432 = vmatpush1.bf16.msra.mxu0 %v6440_v16  ;;  %473 = vmatpush1.bf16.msra.mxu1 %v6444_v17  ;;  %v111_v47 = vrot.slane %v98_v42, %v6547_v40  ;;  %v103_v48 = vrot.slane %v98_v42, %v6549_v41  ;;  %v107_v51 = vrot.slane %v98_v42, %v6554_v44 }
  0x34   :  { %433 = vmatprep.subr.bf16.mxu0 %v6446_v18  ;;  %474 = vmatprep.subr.bf16.mxu1 %v6449_v19  ;;  %8068 = vst [vmem:[#allocation10_spill] sm:$0xff] %v6572_v63 }
  0x37   :  { %434 = vmatpush1.bf16.msra.mxu0 %v6452_v20  ;;  %475 = vmatpush1.bf16.msra.mxu1 %v6454_v21 }
  0x38   :  { %435 = vmatprep.subr.bf16.mxu0 %v6458_v22  ;;  %476 = vmatprep.subr.bf16.mxu1 %v6461_v23 }
  0x3b   :  { %436 = vmatpush1.bf16.msra.mxu0 %v6464_v24  ;;  %477 = vmatpush1.bf16.msra.mxu1 %v6468_v25 }
  0x3c   :  { %437 = vmatprep.subr.bf16.mxu0 %v6470_v26  ;;  %478 = vmatprep.subr.bf16.mxu1 %v6473_v27 }
  0x3f   :  { %438 = vmatpush1.bf16.msra.mxu0 %v6476_v28  ;;  %479 = vmatpush1.bf16.msra.mxu1 %v6478_v29 }
  0x40   :  { %439 = vmatprep.subr.bf16.mxu0 %v6480_v30  ;;  %480 = vmatprep.subr.bf16.mxu1 %v6484_v31 }
  0x43   :  { %440 = vmatpush1.bf16.msra.mxu0 %v6487_v32  ;;  %481 = vmatpush1.bf16.msra.mxu1 %v6489_v33 }
  0x44   :  { %441 = vmatprep.subr.bf16.mxu0 %v6491_v34  ;;  %482 = vmatprep.subr.bf16.mxu1 %v6494_v35 }
  0x47   :  { %442 = vmatpush1.bf16.msra.mxu0 %v6499_v36  ;;  %483 = vmatpush1.bf16.msra.mxu1 %v6501_v37 }
  0x48   :  { %539 = vmatprep.subr.bf16.mxu0 %v6409_v6  ;;  %580 = vmatprep.subr.bf16.mxu1 %v6411_v7 }
  0x4a   :  { %460 = vmatmul.mubr.bf16.vlgmr.msra.gmra.mxu0 %v8064_v0  ;;  %501 = vmatmul.mubr.bf16.vlgmr.msra.gmra.mxu1 %v8064_v0 }
  0x4b   :  { %540 = vmatpush1.bf16.msra.mxu0 %v6413_v8  ;;  %581 = vmatpush1.bf16.msra.mxu1 %v6416_v9 }
  0x4c   :  { %541 = vmatprep.subr.bf16.mxu0 %v6420_v10  ;;  %582 = vmatprep.subr.bf16.mxu1 %v6424_v11 }
  0x4d   :  { %571 = vmatprep.mubr.bf16.mxu0 %v8064_v0  ;;  %612 = vmatprep.mubr.bf16.mxu1 %v8064_v0 }
  0x4f   :  { %542 = vmatpush1.bf16.msra.mxu0 %v6426_v12  ;;  %583 = vmatpush1.bf16.msra.mxu1 %v6428_v13 }
  0x50   :  { %543 = vmatprep.subr.bf16.mxu0 %v6432_v14  ;;  %584 = vmatprep.subr.bf16.mxu1 %v6435_v15 }
  0x53   :  { %544 = vmatpush1.bf16.msra.mxu0 %v6440_v16  ;;  %585 = vmatpush1.bf16.msra.mxu1 %v6444_v17 }
  0x54   :  { %545 = vmatprep.subr.bf16.mxu0 %v6446_v18  ;;  %586 = vmatprep.subr.bf16.mxu1 %v6449_v19 }
  0x57   :  { %546 = vmatpush1.bf16.msra.mxu0 %v6452_v20  ;;  %587 = vmatpush1.bf16.msra.mxu1 %v6454_v21 }
  0x58   :  { %547 = vmatprep.subr.bf16.mxu0 %v6458_v22  ;;  %588 = vmatprep.subr.bf16.mxu1 %v6461_v23 }
  0x5b   :  { %548 = vmatpush1.bf16.msra.mxu0 %v6464_v24  ;;  %589 = vmatpush1.bf16.msra.mxu1 %v6468_v25 }
  0x5c   :  { %549 = vmatprep.subr.bf16.mxu0 %v6470_v26  ;;  %590 = vmatprep.subr.bf16.mxu1 %v6473_v27 }
  0x5f   :  { %550 = vmatpush1.bf16.msra.mxu0 %v6476_v28  ;;  %591 = vmatpush1.bf16.msra.mxu1 %v6478_v29 }
  0x60   :  { %551 = vmatprep.subr.bf16.mxu0 %v6480_v30  ;;  %592 = vmatprep.subr.bf16.mxu1 %v6484_v31 }
  0x63   :  { %552 = vmatpush1.bf16.msra.mxu0 %v6487_v32  ;;  %593 = vmatpush1.bf16.msra.mxu1 %v6489_v33 }
  0x64   :  { %553 = vmatprep.subr.bf16.mxu0 %v6491_v34  ;;  %594 = vmatprep.subr.bf16.mxu1 %v6494_v35 }
  0x67   :  { %554 = vmatpush1.bf16.msra.mxu0 %v6499_v36  ;;  %595 = vmatpush1.bf16.msra.mxu1 %v6501_v37 }
  0x68   :  { %669 = vmatprep.subr.bf16.mxu0 %v6409_v6  ;;  %710 = vmatprep.subr.bf16.mxu1 %v6411_v7 }
  0xea   :  { %v183_v43 = vpop.f32.mrf.mxu0  ;;  %v226_v45 = vpop.f32.mrf.mxu1 }
  0xeb   :  { %v6565_v57 = vadd.f32 %v183_v43, %v103_v48 }
  0xec   :  { %v185_v46 = vpop.f32.mrf.mxu0  ;;  %v228_v49 = vpop.f32.mrf.mxu1 }
  0xed   :  { %v6569_v60 = vadd.f32 %v185_v46, %v107_v51 }
  0xee   :  { %v187_v50 = vpop.f32.mrf.mxu0  ;;  %v230_v53 = vpop.f32.mrf.mxu1 }
  0xef   :  { %v6559_v52 = vadd.f32 %v187_v50, %v103_v48  ;;  %v6561_v55 = vadd.f32 %v230_v53, %v111_v47  ;;  %v6576_v48 = vrot.slane %v98_v42, %v6572_v63  ;;  %v6582_v53 = vadd.f32 %v226_v45, %v111_v47 }
  0xf0   :  { %v189_v54 = vpop.f32.mrf.mxu0  ;;  %v6567_v58 = vpop.f32.mrf.mxu1 }
  0xf1   :  { %v6563_v56 = vadd.f32 %v189_v54, %v107_v51  ;;  %v6579_v51 = vadd.f32 %v228_v49, %v6576_v48 }
 0x10a   :  { %v461_v59 = vpop.f32.mrf.mxu0  ;;  %v502_v62 = vpop.f32.mrf.mxu1 }
 0x10b   :  { %v509_v61 = vadd.f32 %v461_v59, %v6565_v57 }
 0x10c   :  { %v463_v1 = vpop.f32.mrf.mxu0  ;;  %v504_v4 = vpop.f32.mrf.mxu1 }
 0x10d   :  { %v5095_v2 = vmul.f32 -1.442695, %v509_v61  ;;  %v510_v3 = vadd.f32 %v463_v1, %v6569_v60  ;;  %v512_v39 = vadd.f32 %v504_v4, %v6579_v51  ;;  %v511_v61 = vadd.f32 %v502_v62, %v6582_v53 }
 0x10e   :  { %v465_v5 = vpop.f32.mrf.mxu0  ;;  %v506_v43 = vpop.f32.mrf.mxu1 }
 0x10f   :  { %5747 = vpow2.f32 %v5095_v2  ;;  %v5096_v38 = vmul.f32 -1.442695, %v510_v3  ;;  %v5097_v54 = vmul.f32 -1.442695, %v512_v39 }
 0x110   :  { %v466_v50 = vpop.f32.mrf.mxu0  ;;  %v507_v46 = vpop.f32.mrf.mxu1 }
 0x111   :  { %5749 = vpow2.f32 %v5096_v38 }
 0x112   :  { %5751 = vpow2.f32 %v5097_v54 }
 0x11c   :  { %v5748_v59 = vpop.eup %5747 }
 0x11d   :  { %v516_v1 = vadd.f32 1.0, %v5748_v59 }
 0x11e   :  { %v5750_v2 = vpop.eup %5749 }
 0x11f   :  { %5753 = vrcp.f32 %v516_v1  ;;  %v522_v42 = vadd.f32 1.0, %v5750_v2  ;;  %v5752_v3 = vpop.eup %5751 }
 0x120   :  { %5755 = vtanh.f32 %v511_v61  ;;  %v529_v43 = vadd.f32 1.0, %v5752_v3 }
 0x121   :  { %5757 = vrcp.f32 %v522_v42 }
 0x122   :  { %5759 = vrcp.f32 %v529_v43 }
 0x12c   :  { %v5754_v5 = vpop.eup %5753 }
 0x12d   :  { %v5756_v38 = vpop.eup %5755 }
 0x12e   :  { %v5758_v49 = vpop.eup %5757  ;;  %v533_v4 = vmul.f32 %v5756_v38, %v5754_v5 }
 0x12f   :  { %v532_v50 = vmul.f32 0.0, %v5758_v49  ;;  %v5760_v47 = vpop.eup %5759 }
 0x131   :  { %v6585_v45 = vadd.f32 %v533_v4, %v532_v50 }
 0x133   :  { %5761 = vtanh.f32 %v6585_v45 }
 0x140   :  { %v5762_v62 = vpop.eup %5761 }
 0x141   :  { %v536_v46 = vmul.f32 %v5762_v62, %v5760_v47 }
 0x143   :  { %537 = vst [vmem:[#allocation2] sm:$0x3] %v536_v46  ;;  %v538_v39 = vpack.c.bf16 %v536_v46, %v536_v46 }
 0x145   :  { %572 = vmatmul.mubr.bf16.vlgmr.msra.gmra.mxu0 %v538_v39  ;;  %613 = vmatmul.mubr.bf16.vlgmr.msra.gmra.mxu1 %v538_v39 }
 0x146   :  { %670 = vmatpush1.bf16.msra.mxu0 %v6413_v8  ;;  %711 = vmatpush1.bf16.msra.mxu1 %v6416_v9 }
 0x147   :  { %671 = vmatprep.subr.bf16.mxu0 %v6420_v10  ;;  %712 = vmatprep.subr.bf16.mxu1 %v6424_v11 }
 0x148   :  { %701 = vmatprep.mubr.bf16.mxu0 %v8064_v0  ;;  %742 = vmatprep.mubr.bf16.mxu1 %v8064_v0 }
 0x14a   :  { %672 = vmatpush1.bf16.msra.mxu0 %v6426_v12  ;;  %713 = vmatpush1.bf16.msra.mxu1 %v6428_v13 }
 0x14b   :  { %673 = vmatprep.subr.bf16.mxu0 %v6432_v14  ;;  %714 = vmatprep.subr.bf16.mxu1 %v6435_v15 }
 0x14e   :  { %674 = vmatpush1.bf16.msra.mxu0 %v6440_v16  ;;  %715 = vmatpush1.bf16.msra.mxu1 %v6444_v17 }
 0x14f   :  { %675 = vmatprep.subr.bf16.mxu0 %v6446_v18  ;;  %716 = vmatprep.subr.bf16.mxu1 %v6449_v19 }
 0x152   :  { %676 = vmatpush1.bf16.msra.mxu0 %v6452_v20  ;;  %717 = vmatpush1.bf16.msra.mxu1 %v6454_v21 }
 0x153   :  { %677 = vmatprep.subr.bf16.mxu0 %v6458_v22  ;;  %718 = vmatprep.subr.bf16.mxu1 %v6461_v23 }
 0x156   :  { %678 = vmatpush1.bf16.msra.mxu0 %v6464_v24  ;;  %719 = vmatpush1.bf16.msra.mxu1 %v6468_v25 }
 0x157   :  { %679 = vmatprep.subr.bf16.mxu0 %v6470_v26  ;;  %720 = vmatprep.subr.bf16.mxu1 %v6473_v27 }
 0x15a   :  { %680 = vmatpush1.bf16.msra.mxu0 %v6476_v28  ;;  %721 = vmatpush1.bf16.msra.mxu1 %v6478_v29 }
 0x15b   :  { %681 = vmatprep.subr.bf16.mxu0 %v6480_v30  ;;  %722 = vmatprep.subr.bf16.mxu1 %v6484_v31 }
 0x15e   :  { %682 = vmatpush1.bf16.msra.mxu0 %v6487_v32  ;;  %723 = vmatpush1.bf16.msra.mxu1 %v6489_v33 }
 0x15f   :  { %683 = vmatprep.subr.bf16.mxu0 %v6491_v34  ;;  %724 = vmatprep.subr.bf16.mxu1 %v6494_v35 }
 0x162   :  { %684 = vmatpush1.bf16.msra.mxu0 %v6499_v36  ;;  %725 = vmatpush1.bf16.msra.mxu1 %v6501_v37 }
 0x163   :  { %799 = vmatprep.subr.bf16.mxu0 %v6409_v6  ;;  %840 = vmatprep.subr.bf16.mxu1 %v6411_v7 }
 0x205   :  { %v573_v54 = vpop.f32.mrf.mxu0  ;;  %v614_v59 = vpop.f32.mrf.mxu1 }
 0x206   :  { %v625_v61 = vrot.slane %v573_v54, 6  ;;  %v627_v39 = vrot.slane %v614_v59, 6 }
 0x207   :  { %v575_v1 = vpop.f32.mrf.mxu0  ;;  %v616_v2 = vpop.f32.mrf.mxu1 }
 0x208   :  { %v633_v42 = vadd.f32 %v625_v61, %v6565_v57  ;;  %v626_v3 = vrot.slane %v575_v1, 6  ;;  %v628_v62 = vrot.slane %v616_v2, 6  ;;  %v635_v63 = vadd.f32 %v627_v39, %v6582_v53 }
 0x209   :  { %v577_v5 = vpop.f32.mrf.mxu0  ;;  %v618_v38 = vpop.f32.mrf.mxu1 }
 0x20a   :  { %v5098_v49 = vmul.f32 -1.442695, %v633_v42  ;;  %v634_v43 = vadd.f32 %v626_v3, %v6569_v60  ;;  %v636_v46 = vadd.f32 %v628_v62, %v6579_v51 }
 0x20b   :  { %v578_v50 = vpop.f32.mrf.mxu0  ;;  %v619_v4 = vpop.f32.mrf.mxu1 }
 0x20c   :  { %5763 = vpow2.f32 %v5098_v49  ;;  %v5099_v47 = vmul.f32 -1.442695, %v634_v43  ;;  %v5100_v54 = vmul.f32 -1.442695, %v636_v46  ;;  %v657_v49 = vrot.slane %v6585_v45, 6 }
 0x20d   :  { %v8069_v45 = vmov 0  }
 0x20e   :  { %5765 = vpow2.f32 %v5099_v47 }
 0x20f   :  { %5767 = vpow2.f32 %v5100_v54 }
 0x219   :  { %v5764_v0 = vpop.eup %5763 }
 0x21a   :  { %v640_v61 = vadd.f32 1.0, %v5764_v0 }
 0x21b   :  { %v5766_v1 = vpop.eup %5765 }
 0x21c   :  { %5769 = vrcp.f32 %v640_v61  ;;  %v646_v42 = vadd.f32 1.0, %v5766_v1  ;;  %v5768_v3 = vpop.eup %5767 }
 0x21d   :  { %5771 = vtanh.f32 %v635_v63  ;;  %v653_v43 = vadd.f32 1.0, %v5768_v3 }
 0x21e   :  { %5773 = vrcp.f32 %v646_v42 }
 0x21f   :  { %5775 = vrcp.f32 %v653_v43 }
 0x229   :  { %v5770_v5 = vpop.eup %5769 }
 0x22a   :  { %v5772_v38 = vpop.eup %5771 }
 0x22b   :  { %v5774_v2 = vpop.eup %5773  ;;  %v660_v50 = vmul.f32 %v5772_v38, %v5770_v5 }
 0x22c   :  { %v659_v59 = vmul.f32 %v5774_v2, %v657_v49  ;;  %v5776_v0 = vpop.eup %5775 }
 0x22e   :  { %v6627_v4 = vadd.f32 %v660_v50, %v659_v59 }
 0x230   :  { %5777 = vtanh.f32 %v6627_v4 }
 0x23d   :  { %v5778_v47 = vpop.eup %5777 }
 0x23e   :  { %v663_v62 = vmul.f32 %v5778_v47, %v5776_v0 }
 0x240   :  { %664 = vst [vmem:[#allocation2] sm:$0xc] %v663_v62  ;;  %v665_v63 = vpack.c.bf16 %v663_v62, %v663_v62 }
 0x242   :  { %v667_v46 = vrot.slane %v665_v63, 1 }
 0x244   :  { %702 = vmatmul.mubr.bf16.vlgmr.msra.gmra.mxu0 %v667_v46  ;;  %743 = vmatmul.mubr.bf16.vlgmr.msra.gmra.mxu1 %v667_v46 }
 0x245   :  { %800 = vmatpush1.bf16.msra.mxu0 %v6413_v8  ;;  %841 = vmatpush1.bf16.msra.mxu1 %v6416_v9 }
 0x246   :  { %801 = vmatprep.subr.bf16.mxu0 %v6420_v10  ;;  %842 = vmatprep.subr.bf16.mxu1 %v6424_v11 }
 0x247   :  { %831 = vmatprep.mubr.bf16.mxu0 %v8069_v45  ;;  %872 = vmatprep.mubr.bf16.mxu1 %v8069_v45 }
 0x249   :  { %802 = vmatpush1.bf16.msra.mxu0 %v6426_v12  ;;  %843 = vmatpush1.bf16.msra.mxu1 %v6428_v13 }
 0x24a   :  { %803 = vmatprep.subr.bf16.mxu0 %v6432_v14  ;;  %844 = vmatprep.subr.bf16.mxu1 %v6435_v15 }
 0x24d   :  { %804 = vmatpush1.bf16.msra.mxu0 %v6440_v16  ;;  %845 = vmatpush1.bf16.msra.mxu1 %v6444_v17 }
 0x24e   :  { %805 = vmatprep.subr.bf16.mxu0 %v6446_v18  ;;  %846 = vmatprep.subr.bf16.mxu1 %v6449_v19 }
 0x251   :  { %806 = vmatpush1.bf16.msra.mxu0 %v6452_v20  ;;  %847 = vmatpush1.bf16.msra.mxu1 %v6454_v21 }
 0x252   :  { %807 = vmatprep.subr.bf16.mxu0 %v6458_v22  ;;  %848 = vmatprep.subr.bf16.mxu1 %v6461_v23 }
 0x255   :  { %808 = vmatpush1.bf16.msra.mxu0 %v6464_v24  ;;  %849 = vmatpush1.bf16.msra.mxu1 %v6468_v25 }
 0x256   :  { %809 = vmatprep.subr.bf16.mxu0 %v6470_v26  ;;  %850 = vmatprep.subr.bf16.mxu1 %v6473_v27 }
 0x259   :  { %810 = vmatpush1.bf16.msra.mxu0 %v6476_v28  ;;  %851 = vmatpush1.bf16.msra.mxu1 %v6478_v29 }
 0x25a   :  { %811 = vmatprep.subr.bf16.mxu0 %v6480_v30  ;;  %852 = vmatprep.subr.bf16.mxu1 %v6484_v31 }
 0x25d   :  { %812 = vmatpush1.bf16.msra.mxu0 %v6487_v32  ;;  %853 = vmatpush1.bf16.msra.mxu1 %v6489_v33 }
 0x25e   :  { %813 = vmatprep.subr.bf16.mxu0 %v6491_v34  ;;  %854 = vmatprep.subr.bf16.mxu1 %v6494_v35 }
 0x261   :  { %814 = vmatpush1.bf16.msra.mxu0 %v6499_v36  ;;  %855 = vmatpush1.bf16.msra.mxu1 %v6501_v37 }
 0x262   :  { %929 = vmatprep.subr.bf16.mxu0 %v6409_v6  ;;  %970 = vmatprep.subr.bf16.mxu1 %v6411_v7 }
 0x304   :  { %v703_v39 = vpop.f32.mrf.mxu0  ;;  %v744_v54 = vpop.f32.mrf.mxu1 }
 0x305   :  { %v755_v61 = vrot.slane %v703_v39, 4  ;;  %v757_v47 = vrot.slane %v744_v54, 4 }
 0x306   :  { %v705_v1 = vpop.f32.mrf.mxu0  ;;  %v746_v42 = vpop.f32.mrf.mxu1 }
 0x307   :  { %v763_v3 = vadd.f32 %v755_v61, %v6565_v57  ;;  %v756_v5 = vrot.slane %v705_v1, 4  ;;  %v758_v6 = vrot.slane %v746_v42, 4  ;;  %v765_v46 = vadd.f32 %v757_v47, %v6582_v53 }
 0x308   :  { %v707_v38 = vpop.f32.mrf.mxu0  ;;  %v748_v49 = vpop.f32.mrf.mxu1 }
 0x309   :  { %v5101_v2 = vmul.f32 -1.442695, %v763_v3  ;;  %v764_v43 = vadd.f32 %v756_v5, %v6569_v60  ;;  %v766_v7 = vadd.f32 %v758_v6, %v6579_v51  ;;  %v787_v49 = vrot.slane %v6627_v4, 6 }
 0x30a   :  { %v708_v50 = vpop.f32.mrf.mxu0  ;;  %v749_v59 = vpop.f32.mrf.mxu1 }
 0x30b   :  { %5779 = vpow2.f32 %v5101_v2  ;;  %v5102_v0 = vmul.f32 -1.442695, %v764_v43  ;;  %v5103_v62 = vmul.f32 -1.442695, %v766_v7 }
 0x30d   :  { %5781 = vpow2.f32 %v5102_v0 }
 0x30e   :  { %5783 = vpow2.f32 %v5103_v62 }
 0x318   :  { %v5780_v63 = vpop.eup %5779 }
 0x319   :  { %v770_v39 = vadd.f32 1.0, %v5780_v63 }
 0x31a   :  { %v5782_v61 = vpop.eup %5781 }
 0x31b   :  { %5785 = vrcp.f32 %v770_v39  ;;  %v776_v1 = vadd.f32 1.0, %v5782_v61  ;;  %v5784_v3 = vpop.eup %5783 }
 0x31c   :  { %5787 = vtanh.f32 %v765_v46  ;;  %v783_v2 = vadd.f32 1.0, %v5784_v3  ;;  %v6718_v3 = vld [vmem:[#allocation3 + $0xe0] ss:$16 sps:$4 sm:$0xff]  }
 0x31d   :  { %5789 = vrcp.f32 %v776_v1 }
 0x31e   :  { %5791 = vrcp.f32 %v783_v2  ;;  %v6735_v2 = vld [vmem:[#allocation3 + $0xc8] ss:$16 sps:$4 sm:$0xff]  }
 0x328   :  { %v5786_v5 = vpop.eup %5785 }
 0x329   :  { %v5788_v38 = vpop.eup %5787 }
 0x32a   :  { %v5790_v42 = vpop.eup %5789  ;;  %v790_v43 = vmul.f32 %v5788_v38, %v5786_v5  ;;  %v6721_v5 = vld [vmem:[#allocation3 + $0xe8] ss:$16 sps:$4 sm:$0xff]   ;;  %v6724_v38 = vld [vmem:[#allocation3 + $0xc4] ss:$16 sps:$4 sm:$0xff]  }
 0x32b   :  { %v789_v54 = vmul.f32 %v5790_v42, %v787_v49  ;;  %v5792_v59 = vpop.eup %5791  ;;  %v6727_v49 = vld [vmem:[#allocation3 + $0xcc] ss:$16 sps:$4 sm:$0xff]   ;;  %v6732_v42 = vld [vmem:[#allocation3 + $0xc0] ss:$16 sps:$4 sm:$0xff]  }
 0x32d   :  { %v6669_v50 = vadd.f32 %v790_v43, %v789_v54  ;;  %v6738_v43 = vld [vmem:[#allocation3 + $0xa4] ss:$16 sps:$4 sm:$0xff]   ;;  %v6741_v54 = vld [vmem:[#allocation3 + $0xac] ss:$16 sps:$4 sm:$0xff]  }
 0x32f   :  { %5793 = vtanh.f32 %v6669_v50 }
 0x33c   :  { %v5794_v0 = vpop.eup %5793 }
 0x33d   :  { %v793_v6 = vmul.f32 %v5794_v0, %v5792_v59  ;;  %v6747_v59 = vld [vmem:[#allocation3 + $0xa8] ss:$16 sps:$4 sm:$0xff]   ;;  %v6750_v0 = vld [vmem:[#allocation3 + $0x84] ss:$16 sps:$4 sm:$0xff]  }
 0x33f   :  { %794 = vst [vmem:[#allocation2] sm:$0x30] %v793_v6  ;;  %v795_v7 = vpack.c.bf16 %v793_v6, %v793_v6  ;;  %v6753_v6 = vld [vmem:[#allocation3 + $0x8c] ss:$16 sps:$4 sm:$0xff]  }
 0x341   :  { %v797_v47 = vrot.slane %v795_v7, 2  ;;  %v6756_v7 = vld [vmem:[#allocation3 + $0x80] ss:$16 sps:$4 sm:$0xff]  }
 0x343   :  { %832 = vmatmul.mubr.bf16.vlgmr.msra.gmra.mxu0 %v797_v47  ;;  %873 = vmatmul.mubr.bf16.vlgmr.msra.gmra.mxu1 %v797_v47  ;;  %v6759_v47 = vld [vmem:[#allocation3 + $0x88] ss:$16 sps:$4 sm:$0xff]  }
 0x344   :  { %930 = vmatpush1.bf16.msra.mxu0 %v6413_v8  ;;  %971 = vmatpush1.bf16.msra.mxu1 %v6416_v9  ;;  %v6704_v8 = vld [vmem:[#allocation3 + $0xe4] ss:$16 sps:$4 sm:$0xff]   ;;  %v6707_v9 = vld [vmem:[#allocation3 + $0xec] ss:$16 sps:$4 sm:$0xff]  }
 0x345   :  { %931 = vmatprep.subr.bf16.mxu0 %v6420_v10  ;;  %972 = vmatprep.subr.bf16.mxu1 %v6424_v11 }
 0x346   :  { %961 = vmatprep.mubr.bf16.mxu0 %v8069_v45  ;;  %1002 = vmatprep.mubr.bf16.mxu1 %v8069_v45 }
 0x348   :  { %932 = vmatpush1.bf16.msra.mxu0 %v6426_v12  ;;  %973 = vmatpush1.bf16.msra.mxu1 %v6428_v13 }
 0x349   :  { %933 = vmatprep.subr.bf16.mxu0 %v6432_v14  ;;  %974 = vmatprep.subr.bf16.mxu1 %v6435_v15 }
 0x34c   :  { %934 = vmatpush1.bf16.msra.mxu0 %v6440_v16  ;;  %975 = vmatpush1.bf16.msra.mxu1 %v6444_v17 }
 0x34d   :  { %935 = vmatprep.subr.bf16.mxu0 %v6446_v18  ;;  %976 = vmatprep.subr.bf16.mxu1 %v6449_v19 }
 0x350   :  { %936 = vmatpush1.bf16.msra.mxu0 %v6452_v20  ;;  %977 = vmatpush1.bf16.msra.mxu1 %v6454_v21 }
 0x351   :  { %937 = vmatprep.subr.bf16.mxu0 %v6458_v22  ;;  %978 = vmatprep.subr.bf16.mxu1 %v6461_v23 }
 0x354   :  { %938 = vmatpush1.bf16.msra.mxu0 %v6464_v24  ;;  %979 = vmatpush1.bf16.msra.mxu1 %v6468_v25 }
 0x355   :  { %939 = vmatprep.subr.bf16.mxu0 %v6470_v26  ;;  %980 = vmatprep.subr.bf16.mxu1 %v6473_v27 }
 0x358   :  { %940 = vmatpush1.bf16.msra.mxu0 %v6476_v28  ;;  %981 = vmatpush1.bf16.msra.mxu1 %v6478_v29 }
 0x359   :  { %941 = vmatprep.subr.bf16.mxu0 %v6480_v30  ;;  %982 = vmatprep.subr.bf16.mxu1 %v6484_v31 }
 0x35c   :  { %942 = vmatpush1.bf16.msra.mxu0 %v6487_v32  ;;  %983 = vmatpush1.bf16.msra.mxu1 %v6489_v33 }
 0x35d   :  { %943 = vmatprep.subr.bf16.mxu0 %v6491_v34  ;;  %984 = vmatprep.subr.bf16.mxu1 %v6494_v35 }
 0x360   :  { %944 = vmatpush1.bf16.msra.mxu0 %v6499_v36  ;;  %985 = vmatpush1.bf16.msra.mxu1 %v6501_v37 }
 0x361   :  { %1044 = vmatprep.subr.bf16.mxu0 %v6704_v8  ;;  %1085 = vmatprep.subr.bf16.mxu1 %v6707_v9 }
 0x403   :  { %v833_v10 = vpop.f32.mrf.mxu0  ;;  %v874_v11 = vpop.f32.mrf.mxu1 }
 0x404   :  { %v885_v12 = vrot.slane %v833_v10, 2  ;;  %v887_v26 = vrot.slane %v874_v11, 2  ;;  %v6762_v10 = vld [vmem:[#allocation3 + $0x64] ss:$16 sps:$4 sm:$0xff]   ;;  %v6765_v11 = vld [vmem:[#allocation3 + $0x6c] ss:$16 sps:$4 sm:$0xff]  }
 0x405   :  { %v835_v13 = vpop.f32.mrf.mxu0  ;;  %v876_v14 = vpop.f32.mrf.mxu1 }
 0x406   :  { %v893_v15 = vadd.f32 %v885_v12, %v6565_v57  ;;  %v886_v16 = vrot.slane %v835_v13, 2  ;;  %v888_v24 = vrot.slane %v876_v14, 2  ;;  %v895_v29 = vadd.f32 %v887_v26, %v6582_v53  ;;  %v6768_v12 = vld [vmem:[#allocation3 + $0x60] ss:$16 sps:$4 sm:$0xff]   ;;  %v6771_v13 = vld [vmem:[#allocation3 + $0x68] ss:$16 sps:$4 sm:$0xff]  }
 0x407   :  { %v837_v17 = vpop.f32.mrf.mxu0  ;;  %v878_v18 = vpop.f32.mrf.mxu1  ;;  %v917_v57 = vrot.slane %v6669_v50, 6  ;;  %v6744_v50 = vld [vmem:[#allocation3 + $0xa0] ss:$16 sps:$4 sm:$0xff]   ;;  %v6774_v14 = vld [vmem:[#allocation3 + $0x44] ss:$16 sps:$4 sm:$0xff]  }
 0x408   :  { %v5104_v19 = vmul.f32 -1.442695, %v893_v15  ;;  %v894_v20 = vadd.f32 %v886_v16, %v6569_v60  ;;  %v896_v25 = vadd.f32 %v888_v24, %v6579_v51  ;;  %v6777_v15 = vld [vmem:[#allocation3 + $0x4c] ss:$16 sps:$4 sm:$0xff]   ;;  %v6780_v16 = vld [vmem:[#allocation3 + $0x40] ss:$16 sps:$4 sm:$0xff]  }
 0x409   :  { %v838_v21 = vpop.f32.mrf.mxu0  ;;  %v879_v22 = vpop.f32.mrf.mxu1  ;;  %v6783_v17 = vld [vmem:[#allocation3 + $0x48] ss:$16 sps:$4 sm:$0xff]   ;;  %v6786_v18 = vld [vmem:[#allocation3 + $0x24] ss:$16 sps:$4 sm:$0xff]  }
 0x40a   :  { %5795 = vpow2.f32 %v5104_v19  ;;  %v5105_v23 = vmul.f32 -1.442695, %v894_v20  ;;  %v5106_v27 = vmul.f32 -1.442695, %v896_v25  ;;  %v6789_v19 = vld [vmem:[#allocation3 + $0x2c] ss:$16 sps:$4 sm:$0xff]  }
 0x40b   :  { %v6792_v20 = vld [vmem:[#allocation3 + $0x20] ss:$16 sps:$4 sm:$0xff]   ;;  %v6795_v21 = vld [vmem:[#allocation3 + $0x28] ss:$16 sps:$4 sm:$0xff]   ;;  %v6798_v22 = vld [vmem:[#allocation3 + $0x4] ss:$16 sps:$4 sm:$0xff]  }
 0x40c   :  { %5797 = vpow2.f32 %v5105_v23  ;;  %v6801_v23 = vld [vmem:[#allocation3 + $0xc] ss:$16 sps:$4 sm:$0xff]  }
 0x40d   :  { %5799 = vpow2.f32 %v5106_v27 }
 0x417   :  { %v5796_v28 = vpop.eup %5795 }
 0x418   :  { %v900_v30 = vadd.f32 1.0, %v5796_v28 }
 0x419   :  { %v5798_v31 = vpop.eup %5797 }
 0x41a   :  { %5801 = vrcp.f32 %v900_v30  ;;  %v906_v32 = vadd.f32 1.0, %v5798_v31  ;;  %v5800_v33 = vpop.eup %5799 }
 0x41b   :  { %5803 = vtanh.f32 %v895_v29  ;;  %v913_v4 = vadd.f32 1.0, %v5800_v33 }
 0x41c   :  { %5805 = vrcp.f32 %v906_v32 }
 0x41d   :  { %5807 = vrcp.f32 %v913_v4 }
 0x427   :  { %v5802_v34 = vpop.eup %5801 }
 0x428   :  { %v5804_v35 = vpop.eup %5803 }
 0x429   :  { %v5806_v60 = vpop.eup %5805  ;;  %v920_v51 = vmul.f32 %v5804_v35, %v5802_v34 }
 0x42a   :  { %v919_v62 = vmul.f32 %v5806_v60, %v917_v57  ;;  %v5808_v53 = vpop.eup %5807 }
 0x42c   :  { %v6715_v63 = vadd.f32 %v920_v51, %v919_v62 }
 0x42e   :  { %5809 = vtanh.f32 %v6715_v63 }
 0x43b   :  { %v5810_v46 = vpop.eup %5809 }
 0x43c   :  { %v923_v39 = vmul.f32 %v5810_v46, %v5808_v53 }
 0x43e   :  { %924 = vst [vmem:[#allocation2] sm:$0xc0] %v923_v39  ;;  %v925_v61 = vpack.c.bf16 %v923_v39, %v923_v39 }
 0x440   :  { %v927_v1 = vrot.slane %v925_v61, 3 }
 0x442   :  { %962 = vmatmul.mubr.bf16.vlgmr.msra.gmra.mxu0 %v927_v1  ;;  %1003 = vmatmul.mubr.bf16.vlgmr.msra.gmra.mxu1 %v927_v1  ;;  %v1035_v1 = vrot.slane %v6715_v63, 6  ;;  %v6850_v63 = vld [vmem:[#allocation3] ss:$16 sps:$4 sm:$0xff]  }
 0x443   :  { %1045 = vmatpush1.bf16.msra.mxu0 %v6718_v3  ;;  %1086 = vmatpush1.bf16.msra.mxu1 %v6721_v5 }
 0x444   :  { %1046 = vmatprep.subr.bf16.mxu0 %v6724_v38  ;;  %1087 = vmatprep.subr.bf16.mxu1 %v6727_v49 }
 0x445   :  { %1076 = vmatprep.mubr.bf16.mxu0 %v8069_v45  ;;  %1117 = vmatprep.mubr.bf16.mxu1 %v8069_v45 }
 0x447   :  { %1047 = vmatpush1.bf16.msra.mxu0 %v6732_v42  ;;  %1088 = vmatpush1.bf16.msra.mxu1 %v6735_v2 }
 0x448   :  { %1048 = vmatprep.subr.bf16.mxu0 %v6738_v43  ;;  %1089 = vmatprep.subr.bf16.mxu1 %v6741_v54 }
 0x44b   :  { %1049 = vmatpush1.bf16.msra.mxu0 %v6744_v50  ;;  %1090 = vmatpush1.bf16.msra.mxu1 %v6747_v59 }
 0x44c   :  { %1050 = vmatprep.subr.bf16.mxu0 %v6750_v0  ;;  %1091 = vmatprep.subr.bf16.mxu1 %v6753_v6 }
 0x44f   :  { %1051 = vmatpush1.bf16.msra.mxu0 %v6756_v7  ;;  %1092 = vmatpush1.bf16.msra.mxu1 %v6759_v47 }
 0x450   :  { %1052 = vmatprep.subr.bf16.mxu0 %v6762_v10  ;;  %1093 = vmatprep.subr.bf16.mxu1 %v6765_v11 }
 0x453   :  { %1053 = vmatpush1.bf16.msra.mxu0 %v6768_v12  ;;  %1094 = vmatpush1.bf16.msra.mxu1 %v6771_v13 }
 0x454   :  { %1054 = vmatprep.subr.bf16.mxu0 %v6774_v14  ;;  %1095 = vmatprep.subr.bf16.mxu1 %v6777_v15 }
 0x457   :  { %1055 = vmatpush1.bf16.msra.mxu0 %v6780_v16  ;;  %1096 = vmatpush1.bf16.msra.mxu1 %v6783_v17 }
 0x458   :  { %1056 = vmatprep.subr.bf16.mxu0 %v6786_v18  ;;  %1097 = vmatprep.subr.bf16.mxu1 %v6789_v19 }
 0x45b   :  { %1057 = vmatpush1.bf16.msra.mxu0 %v6792_v20  ;;  %1098 = vmatpush1.bf16.msra.mxu1 %v6795_v21 }
 0x45c   :  { %1058 = vmatprep.subr.bf16.mxu0 %v6798_v22  ;;  %1099 = vmatprep.subr.bf16.mxu1 %v6801_v23 }
 0x45f   :  { %1059 = vmatpush1.bf16.msra.mxu0 %v6499_v36  ;;  %1100 = vmatpush1.bf16.msra.mxu1 %v6501_v37  ;;  %v6812_v37 = vadd.f32 %v6567_v58, %v6576_v48 }
 0x460   :  { %1174 = vmatprep.subr.bf16.mxu0 %v6704_v8  ;;  %1215 = vmatprep.subr.bf16.mxu1 %v6707_v9 }
 0x502   :  { %v963_v24 = vpop.f32.mrf.mxu0  ;;  %v1004_v25 = vpop.f32.mrf.mxu1 }
 0x503   :  { %v1011_v26 = vadd.f32 %v963_v24, %v6559_v52  ;;  %v1013_v4 = vadd.f32 %v1004_v25, %v6561_v55 }
 0x504   :  { %v965_v27 = vpop.f32.mrf.mxu0  ;;  %v1006_v28 = vpop.f32.mrf.mxu1 }
 0x505   :  { %v5107_v29 = vmul.f32 -1.442695, %v1011_v26  ;;  %v1012_v30 = vadd.f32 %v965_v27, %v6563_v56  ;;  %v1014_v35 = vadd.f32 %v1006_v28, %v6812_v37 }
 0x506   :  { %v967_v31 = vpop.f32.mrf.mxu0  ;;  %v1008_v32 = vpop.f32.mrf.mxu1 }
 0x507   :  { %5811 = vpow2.f32 %v5107_v29  ;;  %v5108_v33 = vmul.f32 -1.442695, %v1012_v30  ;;  %v5109_v57 = vmul.f32 -1.442695, %v1014_v35  ;;  %v6853_v31 = vld [vmem:[#allocation3 + $0x8] ss:$16 sps:$4 sm:$0xff]  }
 0x508   :  { %v968_v36 = vpop.f32.mrf.mxu0  ;;  %v1009_v34 = vpop.f32.mrf.mxu1 }
 0x509   :  { %5813 = vpow2.f32 %v5108_v33 }
 0x50a   :  { %5815 = vpow2.f32 %v5109_v57 }
 0x514   :  { %v5812_v60 = vpop.eup %5811 }
 0x515   :  { %v1018_v51 = vadd.f32 1.0, %v5812_v60 }
 0x516   :  { %v5814_v62 = vpop.eup %5813 }
 0x517   :  { %5817 = vrcp.f32 %v1018_v51  ;;  %v1024_v53 = vadd.f32 1.0, %v5814_v62  ;;  %v5816_v46 = vpop.eup %5815 }
 0x518   :  { %5819 = vtanh.f32 %v1013_v4  ;;  %v1031_v48 = vadd.f32 1.0, %v5816_v46 }
 0x519   :  { %5821 = vrcp.f32 %v1024_v53 }
 0x51a   :  { %5823 = vrcp.f32 %v1031_v48 }
 0x524   :  { %v5818_v39 = vpop.eup %5817 }
 0x525   :  { %v5820_v61 = vpop.eup %5819 }
 0x526   :  { %v5822_v58 = vpop.eup %5821  ;;  %v1038_v24 = vmul.f32 %v5820_v61, %v5818_v39 }
 0x527   :  { %v1037_v26 = vmul.f32 %v5822_v58, %v1035_v1  ;;  %v5824_v25 = vpop.eup %5823 }
 0x529   :  { %v6817_v27 = vadd.f32 %v1038_v24, %v1037_v26 }
 0x52b   :  { %5825 = vtanh.f32 %v6817_v27 }
 0x538   :  { %v5826_v28 = vpop.eup %5825 }
 0x539   :  { %v1041_v29 = vmul.f32 %v5826_v28, %v5824_v25 }
 0x53b   :  { %1042 = vst [vmem:[#allocation2 + $0x8] sm:$0x3] %v1041_v29  ;;  %v1043_v30 = vpack.c.bf16 %v1041_v29, %v1041_v29 }
 0x53d   :  { %1077 = vmatmul.mubr.bf16.vlgmr.msra.gmra.mxu0 %v1043_v30  ;;  %1118 = vmatmul.mubr.bf16.vlgmr.msra.gmra.mxu1 %v1043_v30 }
 0x53e   :  { %1175 = vmatpush1.bf16.msra.mxu0 %v6718_v3  ;;  %1216 = vmatpush1.bf16.msra.mxu1 %v6721_v5 }
 0x53f   :  { %1176 = vmatprep.subr.bf16.mxu0 %v6724_v38  ;;  %1217 = vmatprep.subr.bf16.mxu1 %v6727_v49 }
 0x540   :  { %1206 = vmatprep.mubr.bf16.mxu0 %v8069_v45  ;;  %1247 = vmatprep.mubr.bf16.mxu1 %v8069_v45 }
 0x542   :  { %1177 = vmatpush1.bf16.msra.mxu0 %v6732_v42  ;;  %1218 = vmatpush1.bf16.msra.mxu1 %v6735_v2 }
 0x543   :  { %1178 = vmatprep.subr.bf16.mxu0 %v6738_v43  ;;  %1219 = vmatprep.subr.bf16.mxu1 %v6741_v54 }
 0x546   :  { %1179 = vmatpush1.bf16.msra.mxu0 %v6744_v50  ;;  %1220 = vmatpush1.bf16.msra.mxu1 %v6747_v59 }
 0x547   :  { %1180 = vmatprep.subr.bf16.mxu0 %v6750_v0  ;;  %1221 = vmatprep.subr.bf16.mxu1 %v6753_v6 }
 0x54a   :  { %1181 = vmatpush1.bf16.msra.mxu0 %v6756_v7  ;;  %1222 = vmatpush1.bf16.msra.mxu1 %v6759_v47 }
 0x54b   :  { %1182 = vmatprep.subr.bf16.mxu0 %v6762_v10  ;;  %1223 = vmatprep.subr.bf16.mxu1 %v6765_v11 }
 0x54e   :  { %1183 = vmatpush1.bf16.msra.mxu0 %v6768_v12  ;;  %1224 = vmatpush1.bf16.msra.mxu1 %v6771_v13 }
 0x54f   :  { %1184 = vmatprep.subr.bf16.mxu0 %v6774_v14  ;;  %1225 = vmatprep.subr.bf16.mxu1 %v6777_v15 }
 0x552   :  { %1185 = vmatpush1.bf16.msra.mxu0 %v6780_v16  ;;  %1226 = vmatpush1.bf16.msra.mxu1 %v6783_v17 }
 0x553   :  { %1186 = vmatprep.subr.bf16.mxu0 %v6786_v18  ;;  %1227 = vmatprep.subr.bf16.mxu1 %v6789_v19 }
 0x556   :  { %1187 = vmatpush1.bf16.msra.mxu0 %v6792_v20  ;;  %1228 = vmatpush1.bf16.msra.mxu1 %v6795_v21 }
 0x557   :  { %1188 = vmatprep.subr.bf16.mxu0 %v6798_v22  ;;  %1229 = vmatprep.subr.bf16.mxu1 %v6801_v23 }
 0x55a   :  { %1189 = vmatpush1.bf16.msra.mxu0 %v6850_v63  ;;  %1230 = vmatpush1.bf16.msra.mxu1 %v6853_v31 }
 0x55b   :  { %1304 = vmatprep.subr.bf16.mxu0 %v6704_v8  ;;  %1345 = vmatprep.subr.bf16.mxu1 %v6707_v9 }
 0x5fd   :  { %v1078_v32 = vpop.f32.mrf.mxu0  ;;  %v1119_v33 = vpop.f32.mrf.mxu1 }
 0x5fe   :  { %v1130_v36 = vrot.slane %v1078_v32, 6  ;;  %v1132_v1 = vrot.slane %v1119_v33, 6 }
 0x5ff   :  { %v1080_v34 = vpop.f32.mrf.mxu0  ;;  %v1121_v35 = vpop.f32.mrf.mxu1 }
 0x600   :  { %v1138_v57 = vadd.f32 %v1130_v36, %v6559_v52  ;;  %v1131_v60 = vrot.slane %v1080_v34, 6  ;;  %v1133_v8 = vrot.slane %v1121_v35, 6  ;;  %v1140_v24 = vadd.f32 %v1132_v1, %v6561_v55 }
 0x601   :  { %v1082_v4 = vpop.f32.mrf.mxu0  ;;  %v1123_v51 = vpop.f32.mrf.mxu1  ;;  %v1162_v36 = vrot.slane %v6817_v27, 6 }
 0x602   :  { %v5110_v62 = vmul.f32 -1.442695, %v1138_v57  ;;  %v1139_v53 = vadd.f32 %v1131_v60, %v6563_v56  ;;  %v1141_v9 = vadd.f32 %v1133_v8, %v6812_v37 }
 0x603   :  { %v1083_v46 = vpop.f32.mrf.mxu0  ;;  %v1124_v39 = vpop.f32.mrf.mxu1 }
 0x604   :  { %5827 = vpow2.f32 %v5110_v62  ;;  %v5111_v61 = vmul.f32 -1.442695, %v1139_v53  ;;  %v5112_v58 = vmul.f32 -1.442695, %v1141_v9 }
 0x606   :  { %5829 = vpow2.f32 %v5111_v61 }
 0x607   :  { %5831 = vpow2.f32 %v5112_v58 }
 0x611   :  { %v5828_v48 = vpop.eup %5827 }
 0x612   :  { %v1145_v26 = vadd.f32 1.0, %v5828_v48  ;;  %v5557_v48 = vld [vmem:[#allocation5 + $0xe4] ss:$16 sps:$4 sm:$0xff]  }
 0x613   :  { %v5830_v25 = vpop.eup %5829 }
 0x614   :  { %5833 = vrcp.f32 %v1145_v26  ;;  %v1151_v28 = vadd.f32 1.0, %v5830_v25  ;;  %v5832_v29 = vpop.eup %5831  ;;  %v5555_v26 = vld [vmem:[#allocation5 + $0xe0] ss:$16 sps:$4 sm:$0xff]   ;;  %v5558_v25 = vld [vmem:[#allocation5 + $0xe8] ss:$16 sps:$4 sm:$0xff]  }
 0x615   :  { %5835 = vtanh.f32 %v1140_v24  ;;  %v1158_v35 = vadd.f32 1.0, %v5832_v29  ;;  %v5560_v24 = vld [vmem:[#allocation5 + $0xec] ss:$16 sps:$4 sm:$0xff]  }
 0x616   :  { %5837 = vrcp.f32 %v1151_v28  ;;  %v5563_v28 = vld [vmem:[#allocation5 + $0xc4] ss:$16 sps:$4 sm:$0xff]   ;;  %v5566_v29 = vld [vmem:[#allocation5 + $0xcc] ss:$16 sps:$4 sm:$0xff]  }
 0x617   :  { %5839 = vrcp.f32 %v1158_v35  ;;  %v5567_v35 = vld [vmem:[#allocation5 + $0xa0] ss:$16 sps:$4 sm:$0xff]  }
 0x621   :  { %v5834_v30 = vpop.eup %5833 }
 0x622   :  { %v5836_v32 = vpop.eup %5835 }
 0x623   :  { %v5838_v34 = vpop.eup %5837  ;;  %v1165_v57 = vmul.f32 %v5836_v32, %v5834_v30  ;;  %v5561_v30 = vld [vmem:[#allocation5 + $0xc0] ss:$16 sps:$4 sm:$0xff]   ;;  %v5564_v32 = vld [vmem:[#allocation5 + $0xc8] ss:$16 sps:$4 sm:$0xff]  }
 0x624   :  { %v1164_v33 = vmul.f32 %v5838_v34, %v1162_v36  ;;  %v5840_v4 = vpop.eup %5839  ;;  %v5569_v36 = vld [vmem:[#allocation5 + $0xa4] ss:$16 sps:$4 sm:$0xff]   ;;  %v5572_v34 = vld [vmem:[#allocation5 + $0xac] ss:$16 sps:$4 sm:$0xff]  }
 0x626   :  { %v6863_v60 = vadd.f32 %v1165_v57, %v1164_v33  ;;  %v5570_v57 = vld [vmem:[#allocation5 + $0xa8] ss:$16 sps:$4 sm:$0xff]   ;;  %v5575_v33 = vld [vmem:[#allocation5 + $0x84] ss:$16 sps:$4 sm:$0xff]  }
 0x628   :  { %5841 = vtanh.f32 %v6863_v60 }
 0x635   :  { %v5842_v51 = vpop.eup %5841 }
 0x636   :  { %v1168_v62 = vmul.f32 %v5842_v51, %v5840_v4  ;;  %v5573_v4 = vld [vmem:[#allocation5 + $0x80] ss:$16 sps:$4 sm:$0xff]   ;;  %v5576_v51 = vld [vmem:[#allocation5 + $0x88] ss:$16 sps:$4 sm:$0xff]  }
 0x638   :  { %1169 = vst [vmem:[#allocation2 + $0x8] sm:$0xc] %v1168_v62  ;;  %v1170_v53 = vpack.c.bf16 %v1168_v62, %v1168_v62  ;;  %v5581_v62 = vld [vmem:[#allocation5 + $0x64] ss:$16 sps:$4 sm:$0xff]  }
 0x63a   :  { %v1172_v46 = vrot.slane %v1170_v53, 1  ;;  %v5584_v53 = vld [vmem:[#allocation5 + $0x6c] ss:$16 sps:$4 sm:$0xff]  }
 0x63c   :  { %1207 = vmatmul.mubr.bf16.vlgmr.msra.gmra.mxu0 %v1172_v46  ;;  %1248 = vmatmul.mubr.bf16.vlgmr.msra.gmra.mxu1 %v1172_v46  ;;  %v5579_v46 = vld [vmem:[#allocation5 + $0x60] ss:$16 sps:$4 sm:$0xff]  }
 0x63d   :  { %1305 = vmatpush1.bf16.msra.mxu0 %v6718_v3  ;;  %1346 = vmatpush1.bf16.msra.mxu1 %v6721_v5 }
 0x63e   :  { %1306 = vmatprep.subr.bf16.mxu0 %v6724_v38  ;;  %1347 = vmatprep.subr.bf16.mxu1 %v6727_v49 }
 0x63f   :  { %1336 = vmatprep.mubr.bf16.mxu0 %v8069_v45  ;;  %1377 = vmatprep.mubr.bf16.mxu1 %v8069_v45 }
 0x641   :  { %1307 = vmatpush1.bf16.msra.mxu0 %v6732_v42  ;;  %1348 = vmatpush1.bf16.msra.mxu1 %v6735_v2 }
 0x642   :  { %1308 = vmatprep.subr.bf16.mxu0 %v6738_v43  ;;  %1349 = vmatprep.subr.bf16.mxu1 %v6741_v54 }
 0x645   :  { %1309 = vmatpush1.bf16.msra.mxu0 %v6744_v50  ;;  %1350 = vmatpush1.bf16.msra.mxu1 %v6747_v59 }
 0x646   :  { %1310 = vmatprep.subr.bf16.mxu0 %v6750_v0  ;;  %1351 = vmatprep.subr.bf16.mxu1 %v6753_v6 }
 0x649   :  { %1311 = vmatpush1.bf16.msra.mxu0 %v6756_v7  ;;  %1352 = vmatpush1.bf16.msra.mxu1 %v6759_v47 }
 0x64a   :  { %1312 = vmatprep.subr.bf16.mxu0 %v6762_v10  ;;  %1353 = vmatprep.subr.bf16.mxu1 %v6765_v11 }
 0x64d   :  { %1313 = vmatpush1.bf16.msra.mxu0 %v6768_v12  ;;  %1354 = vmatpush1.bf16.msra.mxu1 %v6771_v13 }
 0x64e   :  { %1314 = vmatprep.subr.bf16.mxu0 %v6774_v14  ;;  %1355 = vmatprep.subr.bf16.mxu1 %v6777_v15 }
 0x651   :  { %1315 = vmatpush1.bf16.msra.mxu0 %v6780_v16  ;;  %1356 = vmatpush1.bf16.msra.mxu1 %v6783_v17 }
 0x652   :  { %1316 = vmatprep.subr.bf16.mxu0 %v6786_v18  ;;  %1357 = vmatprep.subr.bf16.mxu1 %v6789_v19 }
 0x655   :  { %1317 = vmatpush1.bf16.msra.mxu0 %v6792_v20  ;;  %1358 = vmatpush1.bf16.msra.mxu1 %v6795_v21 }
 0x656   :  { %1318 = vmatprep.subr.bf16.mxu0 %v6798_v22  ;;  %1359 = vmatprep.subr.bf16.mxu1 %v6801_v23  ;;  %v1292_v22 = vrot.slane %v6863_v60, 6  ;;  %v5578_v60 = vld [vmem:[#allocation5 + $0x8c] ss:$16 sps:$4 sm:$0xff]  }
 0x659   :  { %1319 = vmatpush1.bf16.msra.mxu0 %v6850_v63  ;;  %1360 = vmatpush1.bf16.msra.mxu1 %v6853_v31 }
 0x65a   :  { %1647 = vmatprep.subr.bf16.mxu0 %v5557_v48  ;;  %1690 = vmatprep.subr.bf16.mxu1 %v5560_v24 }
 0x6fc   :  { %v1208_v3 = vpop.f32.mrf.mxu0  ;;  %v1249_v5 = vpop.f32.mrf.mxu1 }
 0x6fd   :  { %v1260_v38 = vrot.slane %v1208_v3, 4  ;;  %v1262_v12 = vrot.slane %v1249_v5, 4  ;;  %v5582_v3 = vld [vmem:[#allocation5 + $0x68] ss:$16 sps:$4 sm:$0xff]   ;;  %v5587_v5 = vld [vmem:[#allocation5 + $0x44] ss:$16 sps:$4 sm:$0xff]  }
 0x6fe   :  { %v1210_v49 = vpop.f32.mrf.mxu0  ;;  %v1251_v42 = vpop.f32.mrf.mxu1 }
 0x6ff   :  { %v1268_v2 = vadd.f32 %v1260_v38, %v6559_v52  ;;  %v1261_v43 = vrot.slane %v1210_v49, 4  ;;  %v1263_v10 = vrot.slane %v1251_v42, 4  ;;  %v1270_v15 = vadd.f32 %v1262_v12, %v6561_v55  ;;  %v5590_v38 = vld [vmem:[#allocation5 + $0x4c] ss:$16 sps:$4 sm:$0xff]   ;;  %v5585_v49 = vld [vmem:[#allocation5 + $0x40] ss:$16 sps:$4 sm:$0xff]  }
 0x700   :  { %v1212_v54 = vpop.f32.mrf.mxu0  ;;  %v1253_v50 = vpop.f32.mrf.mxu1  ;;  %v5588_v42 = vld [vmem:[#allocation5 + $0x48] ss:$16 sps:$4 sm:$0xff]  }
 0x701   :  { %v5113_v59 = vmul.f32 -1.442695, %v1268_v2  ;;  %v1269_v0 = vadd.f32 %v1261_v43, %v6563_v56  ;;  %v1271_v11 = vadd.f32 %v1263_v10, %v6812_v37  ;;  %v5591_v2 = vld [vmem:[#allocation5 + $0x20] ss:$16 sps:$4 sm:$0xff]   ;;  %v5593_v43 = vld [vmem:[#allocation5 + $0x24] ss:$16 sps:$4 sm:$0xff]  }
 0x702   :  { %v1213_v6 = vpop.f32.mrf.mxu0  ;;  %v1254_v7 = vpop.f32.mrf.mxu1  ;;  %v5594_v54 = vld [vmem:[#allocation5 + $0x28] ss:$16 sps:$4 sm:$0xff]   ;;  %v5596_v50 = vld [vmem:[#allocation5 + $0x2c] ss:$16 sps:$4 sm:$0xff]  }
 0x703   :  { %5843 = vpow2.f32 %v5113_v59  ;;  %v5114_v47 = vmul.f32 -1.442695, %v1269_v0  ;;  %v5115_v13 = vmul.f32 -1.442695, %v1271_v11  ;;  %v5599_v59 = vld [vmem:[#allocation5 + $0x4] ss:$16 sps:$4 sm:$0xff]  }
 0x704   :  { %v5602_v0 = vld [vmem:[#allocation5 + $0xc] ss:$16 sps:$4 sm:$0xff]   ;;  %v5597_v6 = vld [vmem:[#allocation5] ss:$16 sps:$4 sm:$0xff]   ;;  %v5600_v7 = vld [vmem:[#allocation5 + $0x8] ss:$16 sps:$4 sm:$0xff]  }
 0x705   :  { %5845 = vpow2.f32 %v5114_v47  ;;  %v6908_v47 = vld [vmem:[#allocation7 + $0xe4] ss:$16 sps:$4 sm:$0xff]   ;;  %v6910_v10 = vld [vmem:[#allocation7 + $0xec] ss:$16 sps:$4 sm:$0xff]  }
 0x706   :  { %5847 = vpow2.f32 %v5115_v13 }
 0x710   :  { %v5844_v14 = vpop.eup %5843 }
 0x711   :  { %v1275_v16 = vadd.f32 1.0, %v5844_v14 }
 0x712   :  { %v5846_v17 = vpop.eup %5845 }
 0x713   :  { %5849 = vrcp.f32 %v1275_v16  ;;  %v1281_v18 = vadd.f32 1.0, %v5846_v17  ;;  %v5848_v19 = vpop.eup %5847 }
 0x714   :  { %5851 = vtanh.f32 %v1270_v15  ;;  %v1288_v27 = vadd.f32 1.0, %v5848_v19 }
 0x715   :  { %5853 = vrcp.f32 %v1281_v18 }
 0x716   :  { %5855 = vrcp.f32 %v1288_v27 }
 0x720   :  { %v5850_v20 = vpop.eup %5849 }
 0x721   :  { %v5852_v21 = vpop.eup %5851 }
 0x722   :  { %v5854_v23 = vpop.eup %5853  ;;  %v1295_v63 = vmul.f32 %v5852_v21, %v5850_v20 }
 0x723   :  { %v1294_v31 = vmul.f32 %v5854_v23, %v1292_v22  ;;  %v5856_v61 = vpop.eup %5855 }
 0x725   :  { %v6903_v39 = vadd.f32 %v1295_v63, %v1294_v31 }
 0x727   :  { %5857 = vtanh.f32 %v6903_v39 }
 0x734   :  { %v5858_v8 = vpop.eup %5857 }
 0x735   :  { %v1298_v9 = vmul.f32 %v5858_v8, %v5856_v61 }
 0x737   :  { %1299 = vst [vmem:[#allocation2 + $0x8] sm:$0x30] %v1298_v9  ;;  %v1300_v1 = vpack.c.bf16 %v1298_v9, %v1298_v9 }
 0x739   :  { %v1302_v58 = vrot.slane %v1300_v1, 2 }
 0x73b   :  { %1337 = vmatmul.mubr.bf16.vlgmr.msra.gmra.mxu0 %v1302_v58  ;;  %1378 = vmatmul.mubr.bf16.vlgmr.msra.gmra.mxu1 %v1302_v58 }
 0x73c   :  { %1679 = vmatprep.mubr.bf16.mxu0 %v8069_v45  ;;  %1722 = vmatprep.mubr.bf16.mxu1 %v8069_v45 }
 0x73d   :  { %1648 = vmatpush1.bf16.msra.mxu0 %v5555_v26  ;;  %1691 = vmatpush1.bf16.msra.mxu1 %v5558_v25  ;;  %v1422_v25 = vrot.slane %v6903_v39, 6  ;;  %v6925_v39 = vld [vmem:[#allocation7 + $0xcc] ss:$16 sps:$4 sm:$0xff]  }
 0x73e   :  { %1649 = vmatprep.subr.bf16.mxu0 %v5563_v28  ;;  %1692 = vmatprep.subr.bf16.mxu1 %v5566_v29 }
 0x741   :  { %1650 = vmatpush1.bf16.msra.mxu0 %v5561_v30  ;;  %1693 = vmatpush1.bf16.msra.mxu1 %v5564_v32 }
 0x742   :  { %1651 = vmatprep.subr.bf16.mxu0 %v5569_v36  ;;  %1694 = vmatprep.subr.bf16.mxu1 %v5572_v34 }
 0x745   :  { %1652 = vmatpush1.bf16.msra.mxu0 %v5567_v35  ;;  %1695 = vmatpush1.bf16.msra.mxu1 %v5570_v57  ;;  %v1430_v35 = vld [vmem:[#allocation2] sm:$0xff] }
 0x746   :  { %1653 = vmatprep.subr.bf16.mxu0 %v5575_v33  ;;  %1696 = vmatprep.subr.bf16.mxu1 %v5578_v60  ;;  %v6919_v33 = vld [vmem:[#allocation7 + $0xe0] ss:$16 sps:$4 sm:$0xff]   ;;  %v6921_v60 = vld [vmem:[#allocation7 + $0xe8] ss:$16 sps:$4 sm:$0xff]  }
 0x749   :  { %1654 = vmatpush1.bf16.msra.mxu0 %v5573_v4  ;;  %1697 = vmatpush1.bf16.msra.mxu1 %v5576_v51  ;;  %v6923_v51 = vld [vmem:[#allocation7 + $0xc4] ss:$16 sps:$4 sm:$0xff]  }
 0x74a   :  { %1655 = vmatprep.subr.bf16.mxu0 %v5581_v62  ;;  %1698 = vmatprep.subr.bf16.mxu1 %v5584_v53  ;;  %v6929_v62 = vld [vmem:[#allocation7 + $0xc0] ss:$16 sps:$4 sm:$0xff]   ;;  %v6931_v53 = vld [vmem:[#allocation7 + $0xc8] ss:$16 sps:$4 sm:$0xff]  }
 0x74d   :  { %1656 = vmatpush1.bf16.msra.mxu0 %v5579_v46  ;;  %1699 = vmatpush1.bf16.msra.mxu1 %v5582_v3  ;;  %v6935_v46 = vld [vmem:[#allocation7 + $0xa4] ss:$16 sps:$4 sm:$0xff]   ;;  %v6937_v3 = vld [vmem:[#allocation7 + $0xac] ss:$16 sps:$4 sm:$0xff]  }
 0x74e   :  { %1657 = vmatprep.subr.bf16.mxu0 %v5587_v5  ;;  %1700 = vmatprep.subr.bf16.mxu1 %v5590_v38  ;;  %v6943_v5 = vld [vmem:[#allocation7 + $0xa0] ss:$16 sps:$4 sm:$0xff]   ;;  %v6945_v38 = vld [vmem:[#allocation7 + $0xa8] ss:$16 sps:$4 sm:$0xff]  }
 0x751   :  { %1658 = vmatpush1.bf16.msra.mxu0 %v5585_v49  ;;  %1701 = vmatpush1.bf16.msra.mxu1 %v5588_v42  ;;  %v6949_v49 = vld [vmem:[#allocation7 + $0x84] ss:$16 sps:$4 sm:$0xff]   ;;  %v6951_v42 = vld [vmem:[#allocation7 + $0x8c] ss:$16 sps:$4 sm:$0xff]  }
 0x752   :  { %1659 = vmatprep.subr.bf16.mxu0 %v5593_v43  ;;  %1702 = vmatprep.subr.bf16.mxu1 %v5596_v50  ;;  %v6957_v43 = vld [vmem:[#allocation7 + $0x88] ss:$16 sps:$4 sm:$0xff]   ;;  %v6963_v50 = vld [vmem:[#allocation7 + $0x6c] ss:$16 sps:$4 sm:$0xff]  }
 0x755   :  { %1660 = vmatpush1.bf16.msra.mxu0 %v5591_v2  ;;  %1703 = vmatpush1.bf16.msra.mxu1 %v5594_v54  ;;  %v6955_v2 = vld [vmem:[#allocation7 + $0x80] ss:$16 sps:$4 sm:$0xff]   ;;  %v6961_v54 = vld [vmem:[#allocation7 + $0x64] ss:$16 sps:$4 sm:$0xff]  }
 0x756   :  { %1661 = vmatprep.subr.bf16.mxu0 %v5599_v59  ;;  %1704 = vmatprep.subr.bf16.mxu1 %v5602_v0  ;;  %v6967_v59 = vld [vmem:[#allocation7 + $0x60] ss:$16 sps:$4 sm:$0xff]   ;;  %v6969_v0 = vld [vmem:[#allocation7 + $0x68] ss:$16 sps:$4 sm:$0xff]  }
 0x759   :  { %1662 = vmatpush1.bf16.msra.mxu0 %v5597_v6  ;;  %1705 = vmatpush1.bf16.msra.mxu1 %v5600_v7  ;;  %v6973_v6 = vld [vmem:[#allocation7 + $0x44] ss:$16 sps:$4 sm:$0xff]   ;;  %v6975_v7 = vld [vmem:[#allocation7 + $0x4c] ss:$16 sps:$4 sm:$0xff]  }
 0x75a   :  { %1925 = vmatprep.subr.bf16.mxu0 %v6908_v47  ;;  %1966 = vmatprep.subr.bf16.mxu1 %v6910_v10 }
 0x7fb   :  { %v1338_v11 = vpop.f32.mrf.mxu0  ;;  %v1379_v12 = vpop.f32.mrf.mxu1 }
 0x7fc   :  { %v1390_v13 = vrot.slane %v1338_v11, 2  ;;  %v1392_v61 = vrot.slane %v1379_v12, 2  ;;  %v6979_v11 = vld [vmem:[#allocation7 + $0x40] ss:$16 sps:$4 sm:$0xff]   ;;  %v6981_v12 = vld [vmem:[#allocation7 + $0x48] ss:$16 sps:$4 sm:$0xff]  }
 0x7fd   :  { %v1340_v14 = vpop.f32.mrf.mxu0  ;;  %v1381_v15 = vpop.f32.mrf.mxu1 }
 0x7fe   :  { %v1398_v16 = vadd.f32 %v1390_v13, %v6559_v52  ;;  %v1391_v17 = vrot.slane %v1340_v14, 2  ;;  %v1393_v63 = vrot.slane %v1381_v15, 2  ;;  %v1400_v1 = vadd.f32 %v1392_v61, %v6561_v55  ;;  %v6985_v13 = vld [vmem:[#allocation7 + $0x24] ss:$16 sps:$4 sm:$0xff]   ;;  %v6987_v14 = vld [vmem:[#allocation7 + $0x2c] ss:$16 sps:$4 sm:$0xff]  }
 0x7ff   :  { %v1342_v18 = vpop.f32.mrf.mxu0  ;;  %v1383_v19 = vpop.f32.mrf.mxu1  ;;  %v6991_v15 = vld [vmem:[#allocation7 + $0x20] ss:$16 sps:$4 sm:$0xff]  }
 0x800   :  { %v5116_v20 = vmul.f32 -1.442695, %v1398_v16  ;;  %v1399_v21 = vadd.f32 %v1391_v17, %v6563_v56  ;;  %v1401_v31 = vadd.f32 %v1393_v63, %v6812_v37  ;;  %v6993_v16 = vld [vmem:[#allocation7 + $0x28] ss:$16 sps:$4 sm:$0xff]   ;;  %v6997_v17 = vld [vmem:[#allocation7 + $0x4] ss:$16 sps:$4 sm:$0xff]  }
 0x801   :  { %v1343_v22 = vpop.f32.mrf.mxu0  ;;  %v1384_v23 = vpop.f32.mrf.mxu1  ;;  %v6999_v18 = vld [vmem:[#allocation7 + $0xc] ss:$16 sps:$4 sm:$0xff]   ;;  %v7003_v19 = vld [vmem:[#allocation7] ss:$16 sps:$4 sm:$0xff]  }
 0x802   :  { %5859 = vpow2.f32 %v5116_v20  ;;  %v5117_v27 = vmul.f32 -1.442695, %v1399_v21  ;;  %v5118_v8 = vmul.f32 -1.442695, %v1401_v31  ;;  %v7005_v20 = vld [vmem:[#allocation7 + $0x8] ss:$16 sps:$4 sm:$0xff]  }
 0x803   :  { %v1465_v21 = vld [vmem:[%s8054_s6] sm:$0xf] }
 0x804   :  { %5861 = vpow2.f32 %v5117_v27  ;;  %v1470_v31 = vrot.slane %v1465_v21, %v6549_v41  ;;  %v1478_v61 = vrot.slane %v1465_v21, %v6547_v40 }
 0x805   :  { %5863 = vpow2.f32 %v5118_v8 }
 0x80f   :  { %v5860_v9 = vpop.eup %5859 }
 0x810   :  { %v1405_v52 = vadd.f32 1.0, %v5860_v9 }
 0x811   :  { %v5862_v58 = vpop.eup %5861 }
 0x812   :  { %5865 = vrcp.f32 %v1405_v52  ;;  %v1411_v48 = vadd.f32 1.0, %v5862_v58  ;;  %v5864_v56 = vpop.eup %5863  ;;  %v8070_v52 = vld [vmem:[#allocation10_spill] sm:$0xff] }
 0x813   :  { %5867 = vtanh.f32 %v1400_v1  ;;  %v1418_v29 = vadd.f32 1.0, %v5864_v56  ;;  %v1474_v1 = vrot.slane %v1465_v21, %v6554_v44  ;;  %v1482_v58 = vrot.slane %v1465_v21, %v8070_v52 }
 0x814   :  { %5869 = vrcp.f32 %v1411_v48 }
 0x815   :  { %5871 = vrcp.f32 %v1418_v29 }
 0x81f   :  { %v5866_v24 = vpop.eup %5865 }
 0x820   :  { %v5868_v26 = vpop.eup %5867 }
 0x821   :  { %v5870_v28 = vpop.eup %5869  ;;  %v1425_v37 = vmul.f32 %v5868_v26, %v5866_v24 }
 0x822   :  { %v1424_v30 = vmul.f32 %v5870_v28, %v1422_v25  ;;  %v5872_v55 = vpop.eup %5871 }
 0x824   :  { %v1426_v32 = vadd.f32 %v1425_v37, %v1424_v30 }
 0x826   :  { %5873 = vtanh.f32 %v1426_v32 }
 0x833   :  { %v5874_v36 = vpop.eup %5873 }
 0x834   :  { %v1428_v34 = vmul.f32 %v5874_v36, %v5872_v55 }
 0x836   :  { %1429 = vst [vmem:[#allocation2 + $0x8] sm:$0xc0] %v1428_v34 }
 0x83d   :  { %v1431_v57 = vld [vmem:[#allocation2 + $0x8] sm:$0xff] }
 0x83e   :  { %v1432_v4 = vpack.c.bf16 %v1431_v57, %v1430_v35 }
 0x840   :  { %1680 = vmatmul.mubr.bf16.vlgmr.msra.gmra.mxu0 %v1432_v4  ;;  %1723 = vmatmul.mubr.bf16.vlgmr.msra.gmra.mxu1 %v1432_v4 }
 0x841   :  { %1926 = vmatpush1.bf16.msra.mxu0 %v6919_v33  ;;  %1967 = vmatpush1.bf16.msra.mxu1 %v6921_v60 }
 0x842   :  { %1927 = vmatprep.subr.bf16.mxu0 %v6923_v51  ;;  %1968 = vmatprep.subr.bf16.mxu1 %v6925_v39 }
 0x843   :  { %1957 = vmatprep.mubr.bf16.mxu0 %v8069_v45  ;;  %1998 = vmatprep.mubr.bf16.mxu1 %v8069_v45 }
 0x845   :  { %1928 = vmatpush1.bf16.msra.mxu0 %v6929_v62  ;;  %1969 = vmatpush1.bf16.msra.mxu1 %v6931_v53 }
 0x846   :  { %1929 = vmatprep.subr.bf16.mxu0 %v6935_v46  ;;  %1970 = vmatprep.subr.bf16.mxu1 %v6937_v3 }
 0x849   :  { %1930 = vmatpush1.bf16.msra.mxu0 %v6943_v5  ;;  %1971 = vmatpush1.bf16.msra.mxu1 %v6945_v38 }
 0x84a   :  { %1931 = vmatprep.subr.bf16.mxu0 %v6949_v49  ;;  %1972 = vmatprep.subr.bf16.mxu1 %v6951_v42 }
 0x84d   :  { %1932 = vmatpush1.bf16.msra.mxu0 %v6955_v2  ;;  %1973 = vmatpush1.bf16.msra.mxu1 %v6957_v43 }
 0x84e   :  { %1933 = vmatprep.subr.bf16.mxu0 %v6961_v54  ;;  %1974 = vmatprep.subr.bf16.mxu1 %v6963_v50 }
 0x851   :  { %1934 = vmatpush1.bf16.msra.mxu0 %v6967_v59  ;;  %1975 = vmatpush1.bf16.msra.mxu1 %v6969_v0 }
 0x852   :  { %1935 = vmatprep.subr.bf16.mxu0 %v6973_v6  ;;  %1976 = vmatprep.subr.bf16.mxu1 %v6975_v7 }
 0x855   :  { %1936 = vmatpush1.bf16.msra.mxu0 %v6979_v11  ;;  %1977 = vmatpush1.bf16.msra.mxu1 %v6981_v12 }
 0x856   :  { %1937 = vmatprep.subr.bf16.mxu0 %v6985_v13  ;;  %1978 = vmatprep.subr.bf16.mxu1 %v6987_v14 }
 0x859   :  { %1938 = vmatpush1.bf16.msra.mxu0 %v6991_v15  ;;  %1979 = vmatpush1.bf16.msra.mxu1 %v6993_v16 }
 0x85a   :  { %1939 = vmatprep.subr.bf16.mxu0 %v6997_v17  ;;  %1980 = vmatprep.subr.bf16.mxu1 %v6999_v18 }
 0x85d   :  { %1940 = vmatpush1.bf16.msra.mxu0 %v7003_v19  ;;  %1981 = vmatpush1.bf16.msra.mxu1 %v7005_v20 }
 0x85e   :  { %2037 = vmatprep.subr.bf16.mxu0 %v6908_v47  ;;  %2078 = vmatprep.subr.bf16.mxu1 %v6910_v10 }
 0x860   :  { %1958 = vmatmul.mubr.bf16.vlgmr.msra.gmra.mxu0 %v8069_v45  ;;  %1999 = vmatmul.mubr.bf16.vlgmr.msra.gmra.mxu1 %v8069_v45 }
 0x861   :  { %2038 = vmatpush1.bf16.msra.mxu0 %v6919_v33  ;;  %2079 = vmatpush1.bf16.msra.mxu1 %v6921_v60 }
 0x862   :  { %2039 = vmatprep.subr.bf16.mxu0 %v6923_v51  ;;  %2080 = vmatprep.subr.bf16.mxu1 %v6925_v39 }
 0x863   :  { %2069 = vmatprep.mubr.bf16.mxu0 %v8069_v45  ;;  %2110 = vmatprep.mubr.bf16.mxu1 %v8069_v45 }
 0x865   :  { %2040 = vmatpush1.bf16.msra.mxu0 %v6929_v62  ;;  %2081 = vmatpush1.bf16.msra.mxu1 %v6931_v53 }
 0x866   :  { %2041 = vmatprep.subr.bf16.mxu0 %v6935_v46  ;;  %2082 = vmatprep.subr.bf16.mxu1 %v6937_v3 }
 0x869   :  { %2042 = vmatpush1.bf16.msra.mxu0 %v6943_v5  ;;  %2083 = vmatpush1.bf16.msra.mxu1 %v6945_v38 }
 0x86a   :  { %2043 = vmatprep.subr.bf16.mxu0 %v6949_v49  ;;  %2084 = vmatprep.subr.bf16.mxu1 %v6951_v42 }
 0x86d   :  { %2044 = vmatpush1.bf16.msra.mxu0 %v6955_v2  ;;  %2085 = vmatpush1.bf16.msra.mxu1 %v6957_v43 }
 0x86e   :  { %2045 = vmatprep.subr.bf16.mxu0 %v6961_v54  ;;  %2086 = vmatprep.subr.bf16.mxu1 %v6963_v50 }
 0x871   :  { %2046 = vmatpush1.bf16.msra.mxu0 %v6967_v59  ;;  %2087 = vmatpush1.bf16.msra.mxu1 %v6969_v0 }
 0x872   :  { %2047 = vmatprep.subr.bf16.mxu0 %v6973_v6  ;;  %2088 = vmatprep.subr.bf16.mxu1 %v6975_v7 }
 0x875   :  { %2048 = vmatpush1.bf16.msra.mxu0 %v6979_v11  ;;  %2089 = vmatpush1.bf16.msra.mxu1 %v6981_v12 }
 0x876   :  { %2049 = vmatprep.subr.bf16.mxu0 %v6985_v13  ;;  %2090 = vmatprep.subr.bf16.mxu1 %v6987_v14 }
 0x879   :  { %2050 = vmatpush1.bf16.msra.mxu0 %v6991_v15  ;;  %2091 = vmatpush1.bf16.msra.mxu1 %v6993_v16 }
 0x87a   :  { %2051 = vmatprep.subr.bf16.mxu0 %v6997_v17  ;;  %2092 = vmatprep.subr.bf16.mxu1 %v6999_v18 }
 0x87d   :  { %2052 = vmatpush1.bf16.msra.mxu0 %v7003_v19  ;;  %2093 = vmatpush1.bf16.msra.mxu1 %v7005_v20 }
 0x87e   :  { %2167 = vmatprep.subr.bf16.mxu0 %v6908_v47  ;;  %2208 = vmatprep.subr.bf16.mxu1 %v6910_v10 }
 0x900   :  { %v1681_v22 = vpop.f32.mrf.mxu0  ;;  %v1724_v23 = vpop.f32.mrf.mxu1 }
 0x901   :  { %v7064_v29 = vadd.f32 %v1681_v22, %v1470_v31 }
 0x902   :  { %v1683_v27 = vpop.f32.mrf.mxu0  ;;  %v1726_v63 = vpop.f32.mrf.mxu1 }
 0x903   :  { %v7066_v32 = vadd.f32 %v1683_v27, %v1474_v1  ;;  %v7070_v22 = vadd.f32 %v1726_v63, %v1482_v58  ;;  %v7073_v27 = vadd.f32 %v1724_v23, %v1478_v61 }
 0x904   :  { %v1685_v8 = vpop.f32.mrf.mxu0  ;;  %v1728_v9 = vpop.f32.mrf.mxu1 }
 0x905   :  { %v7056_v48 = vadd.f32 %v1685_v8, %v1470_v31  ;;  %v7058_v56 = vadd.f32 %v1728_v9, %v1478_v61 }
 0x906   :  { %v1687_v24 = vpop.f32.mrf.mxu0  ;;  %v1730_v26 = vpop.f32.mrf.mxu1 }
 0x907   :  { %v7060_v25 = vadd.f32 %v1687_v24, %v1474_v1  ;;  %v7062_v28 = vadd.f32 %v1730_v26, %v1482_v58 }
 0x920   :  { %v1959_v37 = vpop.f32.mrf.mxu0  ;;  %v2000_v30 = vpop.f32.mrf.mxu1 }
 0x921   :  { %v2007_v55 = vadd.f32 %v1959_v37, %v7064_v29  ;;  %v2009_v37 = vadd.f32 %v2000_v30, %v7073_v27 }
 0x922   :  { %v1961_v36 = vpop.f32.mrf.mxu0  ;;  %v2002_v34 = vpop.f32.mrf.mxu1 }
 0x923   :  { %v5183_v35 = vmul.f32 -1.442695, %v2007_v55  ;;  %v2008_v57 = vadd.f32 %v1961_v36, %v7066_v32  ;;  %v2010_v31 = vadd.f32 %v2002_v34, %v7070_v22 }
 0x924   :  { %v1963_v4 = vpop.f32.mrf.mxu0  ;;  %v2004_v21 = vpop.f32.mrf.mxu1 }
 0x925   :  { %5875 = vpow2.f32 %v5183_v35  ;;  %v5184_v8 = vmul.f32 -1.442695, %v2008_v57  ;;  %v5185_v1 = vmul.f32 -1.442695, %v2010_v31 }
 0x926   :  { %v1964_v9 = vpop.f32.mrf.mxu0  ;;  %v2005_v24 = vpop.f32.mrf.mxu1 }
 0x927   :  { %5877 = vpow2.f32 %v5184_v8 }
 0x928   :  { %5879 = vpow2.f32 %v5185_v1 }
 0x932   :  { %v5876_v26 = vpop.eup %5875 }
 0x933   :  { %v2014_v55 = vadd.f32 1.0, %v5876_v26 }
 0x934   :  { %v5878_v52 = vpop.eup %5877 }
 0x935   :  { %5881 = vrcp.f32 %v2014_v55  ;;  %v2020_v36 = vadd.f32 1.0, %v5878_v52  ;;  %v5880_v35 = vpop.eup %5879 }
 0x936   :  { %5883 = vtanh.f32 %v2009_v37  ;;  %v2027_v58 = vadd.f32 1.0, %v5880_v35 }
 0x937   :  { %5885 = vrcp.f32 %v2020_v36 }
 0x938   :  { %5887 = vrcp.f32 %v2027_v58 }
 0x942   :  { %v5882_v57 = vpop.eup %5881 }
 0x943   :  { %v5884_v4 = vpop.eup %5883 }
 0x944   :  { %v5886_v63 = vpop.eup %5885  ;;  %v2031_v34 = vmul.f32 %v5884_v4, %v5882_v57 }
 0x945   :  { %v2030_v21 = vmul.f32 0.0, %v5886_v63  ;;  %v5888_v61 = vpop.eup %5887 }
 0x947   :  { %v7076_v23 = vadd.f32 %v2031_v34, %v2030_v21 }
 0x949   :  { %5889 = vtanh.f32 %v7076_v23 }
 0x956   :  { %v5890_v30 = vpop.eup %5889 }
 0x957   :  { %v2034_v8 = vmul.f32 %v5890_v30, %v5888_v61 }
 0x959   :  { %2035 = vst [vmem:[#allocation2] sm:$0x3] %v2034_v8  ;;  %v2036_v9 = vpack.c.bf16 %v2034_v8, %v2034_v8 }
 0x95b   :  { %2070 = vmatmul.mubr.bf16.vlgmr.msra.gmra.mxu0 %v2036_v9  ;;  %2111 = vmatmul.mubr.bf16.vlgmr.msra.gmra.mxu1 %v2036_v9 }
 0x95c   :  { %2168 = vmatpush1.bf16.msra.mxu0 %v6919_v33  ;;  %2209 = vmatpush1.bf16.msra.mxu1 %v6921_v60 }
 0x95d   :  { %2169 = vmatprep.subr.bf16.mxu0 %v6923_v51  ;;  %2210 = vmatprep.subr.bf16.mxu1 %v6925_v39 }
 0x95e   :  { %2199 = vmatprep.mubr.bf16.mxu0 %v8069_v45  ;;  %2240 = vmatprep.mubr.bf16.mxu1 %v8069_v45 }
 0x960   :  { %2170 = vmatpush1.bf16.msra.mxu0 %v6929_v62  ;;  %2211 = vmatpush1.bf16.msra.mxu1 %v6931_v53 }
 0x961   :  { %2171 = vmatprep.subr.bf16.mxu0 %v6935_v46  ;;  %2212 = vmatprep.subr.bf16.mxu1 %v6937_v3 }
 0x964   :  { %2172 = vmatpush1.bf16.msra.mxu0 %v6943_v5  ;;  %2213 = vmatpush1.bf16.msra.mxu1 %v6945_v38 }
 0x965   :  { %2173 = vmatprep.subr.bf16.mxu0 %v6949_v49  ;;  %2214 = vmatprep.subr.bf16.mxu1 %v6951_v42 }
 0x968   :  { %2174 = vmatpush1.bf16.msra.mxu0 %v6955_v2  ;;  %2215 = vmatpush1.bf16.msra.mxu1 %v6957_v43 }
 0x969   :  { %2175 = vmatprep.subr.bf16.mxu0 %v6961_v54  ;;  %2216 = vmatprep.subr.bf16.mxu1 %v6963_v50 }
 0x96c   :  { %2176 = vmatpush1.bf16.msra.mxu0 %v6967_v59  ;;  %2217 = vmatpush1.bf16.msra.mxu1 %v6969_v0 }
 0x96d   :  { %2177 = vmatprep.subr.bf16.mxu0 %v6973_v6  ;;  %2218 = vmatprep.subr.bf16.mxu1 %v6975_v7 }
 0x970   :  { %2178 = vmatpush1.bf16.msra.mxu0 %v6979_v11  ;;  %2219 = vmatpush1.bf16.msra.mxu1 %v6981_v12 }
 0x971   :  { %2179 = vmatprep.subr.bf16.mxu0 %v6985_v13  ;;  %2220 = vmatprep.subr.bf16.mxu1 %v6987_v14 }
 0x974   :  { %2180 = vmatpush1.bf16.msra.mxu0 %v6991_v15  ;;  %2221 = vmatpush1.bf16.msra.mxu1 %v6993_v16 }
 0x975   :  { %2181 = vmatprep.subr.bf16.mxu0 %v6997_v17  ;;  %2222 = vmatprep.subr.bf16.mxu1 %v6999_v18 }
 0x978   :  { %2182 = vmatpush1.bf16.msra.mxu0 %v7003_v19  ;;  %2223 = vmatpush1.bf16.msra.mxu1 %v7005_v20 }
 0x979   :  { %2297 = vmatprep.subr.bf16.mxu0 %v6908_v47  ;;  %2338 = vmatprep.subr.bf16.mxu1 %v6910_v10 }
 0xa1b   :  { %v2071_v52 = vpop.f32.mrf.mxu0  ;;  %v2112_v24 = vpop.f32.mrf.mxu1 }
 0xa1c   :  { %v2123_v31 = vrot.slane %v2071_v52, 6  ;;  %v2125_v30 = vrot.slane %v2112_v24, 6 }
 0xa1d   :  { %v2073_v1 = vpop.f32.mrf.mxu0  ;;  %v2114_v26 = vpop.f32.mrf.mxu1 }
 0xa1e   :  { %v2131_v37 = vadd.f32 %v2123_v31, %v7064_v29  ;;  %v2124_v55 = vrot.slane %v2073_v1, 6  ;;  %v2126_v34 = vrot.slane %v2114_v26, 6  ;;  %v2133_v52 = vadd.f32 %v2125_v30, %v7073_v27 }
 0xa1f   :  { %v2075_v36 = vpop.f32.mrf.mxu0  ;;  %v2116_v35 = vpop.f32.mrf.mxu1 }
 0xa20   :  { %v5186_v57 = vmul.f32 -1.442695, %v2131_v37  ;;  %v2132_v4 = vadd.f32 %v2124_v55, %v7066_v32  ;;  %v2134_v61 = vadd.f32 %v2126_v34, %v7070_v22 }
 0xa21   :  { %v2076_v63 = vpop.f32.mrf.mxu0  ;;  %v2117_v58 = vpop.f32.mrf.mxu1 }
 0xa22   :  { %5891 = vpow2.f32 %v5186_v57  ;;  %v5187_v21 = vmul.f32 -1.442695, %v2132_v4  ;;  %v5188_v8 = vmul.f32 -1.442695, %v2134_v61  ;;  %v2155_v57 = vrot.slane %v7076_v23, 6 }
 0xa24   :  { %5893 = vpow2.f32 %v5187_v21 }
 0xa25   :  { %5895 = vpow2.f32 %v5188_v8 }
 0xa2f   :  { %v5892_v9 = vpop.eup %5891 }
 0xa30   :  { %v2138_v31 = vadd.f32 1.0, %v5892_v9 }
 0xa31   :  { %v5894_v1 = vpop.eup %5893 }
 0xa32   :  { %5897 = vrcp.f32 %v2138_v31  ;;  %v2144_v37 = vadd.f32 1.0, %v5894_v1  ;;  %v5896_v55 = vpop.eup %5895 }
 0xa33   :  { %5899 = vtanh.f32 %v2133_v52  ;;  %v2151_v4 = vadd.f32 1.0, %v5896_v55 }
 0xa34   :  { %5901 = vrcp.f32 %v2144_v37 }
 0xa35   :  { %5903 = vrcp.f32 %v2151_v4 }
 0xa3f   :  { %v5898_v36 = vpop.eup %5897 }
 0xa40   :  { %v5900_v35 = vpop.eup %5899 }
 0xa41   :  { %v5902_v26 = vpop.eup %5901  ;;  %v2158_v63 = vmul.f32 %v5900_v35, %v5898_v36 }
 0xa42   :  { %v2157_v24 = vmul.f32 %v5902_v26, %v2155_v57  ;;  %v5904_v21 = vpop.eup %5903 }
 0xa44   :  { %v7118_v58 = vadd.f32 %v2158_v63, %v2157_v24 }
 0xa46   :  { %5905 = vtanh.f32 %v7118_v58 }
 0xa53   :  { %v5906_v34 = vpop.eup %5905 }
 0xa54   :  { %v2161_v61 = vmul.f32 %v5906_v34, %v5904_v21 }
 0xa56   :  { %2162 = vst [vmem:[#allocation2] sm:$0xc] %v2161_v61  ;;  %v2163_v30 = vpack.c.bf16 %v2161_v61, %v2161_v61 }
 0xa58   :  { %v2165_v8 = vrot.slane %v2163_v30, 1 }
 0xa5a   :  { %2200 = vmatmul.mubr.bf16.vlgmr.msra.gmra.mxu0 %v2165_v8  ;;  %2241 = vmatmul.mubr.bf16.vlgmr.msra.gmra.mxu1 %v2165_v8 }
 0xa5b   :  { %2298 = vmatpush1.bf16.msra.mxu0 %v6919_v33  ;;  %2339 = vmatpush1.bf16.msra.mxu1 %v6921_v60 }
 0xa5c   :  { %2299 = vmatprep.subr.bf16.mxu0 %v6923_v51  ;;  %2340 = vmatprep.subr.bf16.mxu1 %v6925_v39 }
 0xa5d   :  { %2329 = vmatprep.mubr.bf16.mxu0 %v8069_v45  ;;  %2370 = vmatprep.mubr.bf16.mxu1 %v8069_v45 }
 0xa5f   :  { %2300 = vmatpush1.bf16.msra.mxu0 %v6929_v62  ;;  %2341 = vmatpush1.bf16.msra.mxu1 %v6931_v53 }
 0xa60   :  { %2301 = vmatprep.subr.bf16.mxu0 %v6935_v46  ;;  %2342 = vmatprep.subr.bf16.mxu1 %v6937_v3 }
 0xa63   :  { %2302 = vmatpush1.bf16.msra.mxu0 %v6943_v5  ;;  %2343 = vmatpush1.bf16.msra.mxu1 %v6945_v38 }
 0xa64   :  { %2303 = vmatprep.subr.bf16.mxu0 %v6949_v49  ;;  %2344 = vmatprep.subr.bf16.mxu1 %v6951_v42 }
 0xa67   :  { %2304 = vmatpush1.bf16.msra.mxu0 %v6955_v2  ;;  %2345 = vmatpush1.bf16.msra.mxu1 %v6957_v43 }
 0xa68   :  { %2305 = vmatprep.subr.bf16.mxu0 %v6961_v54  ;;  %2346 = vmatprep.subr.bf16.mxu1 %v6963_v50 }
 0xa6b   :  { %2306 = vmatpush1.bf16.msra.mxu0 %v6967_v59  ;;  %2347 = vmatpush1.bf16.msra.mxu1 %v6969_v0 }
 0xa6c   :  { %2307 = vmatprep.subr.bf16.mxu0 %v6973_v6  ;;  %2348 = vmatprep.subr.bf16.mxu1 %v6975_v7 }
 0xa6f   :  { %2308 = vmatpush1.bf16.msra.mxu0 %v6979_v11  ;;  %2349 = vmatpush1.bf16.msra.mxu1 %v6981_v12 }
 0xa70   :  { %2309 = vmatprep.subr.bf16.mxu0 %v6985_v13  ;;  %2350 = vmatprep.subr.bf16.mxu1 %v6987_v14 }
 0xa73   :  { %2310 = vmatpush1.bf16.msra.mxu0 %v6991_v15  ;;  %2351 = vmatpush1.bf16.msra.mxu1 %v6993_v16 }
 0xa74   :  { %2311 = vmatprep.subr.bf16.mxu0 %v6997_v17  ;;  %2352 = vmatprep.subr.bf16.mxu1 %v6999_v18 }
 0xa77   :  { %2312 = vmatpush1.bf16.msra.mxu0 %v7003_v19  ;;  %2353 = vmatpush1.bf16.msra.mxu1 %v7005_v20 }
 0xa78   :  { %2427 = vmatprep.subr.bf16.mxu0 %v6908_v47  ;;  %2468 = vmatprep.subr.bf16.mxu1 %v6910_v10 }
 0xb1a   :  { %v2201_v23 = vpop.f32.mrf.mxu0  ;;  %v2242_v9 = vpop.f32.mrf.mxu1 }
 0xb1b   :  { %v2253_v52 = vrot.slane %v2201_v23, 4  ;;  %v2255_v61 = vrot.slane %v2242_v9, 4 }
 0xb1c   :  { %v2203_v31 = vpop.f32.mrf.mxu0  ;;  %v2244_v1 = vpop.f32.mrf.mxu1 }
 0xb1d   :  { %v2261_v37 = vadd.f32 %v2253_v52, %v7064_v29  ;;  %v2254_v55 = vrot.slane %v2203_v31, 4  ;;  %v2256_v21 = vrot.slane %v2244_v1, 4  ;;  %v2263_v23 = vadd.f32 %v2255_v61, %v7073_v27 }
 0xb1e   :  { %v2205_v36 = vpop.f32.mrf.mxu0  ;;  %v2246_v35 = vpop.f32.mrf.mxu1 }
 0xb1f   :  { %v5189_v57 = vmul.f32 -1.442695, %v2261_v37  ;;  %v2262_v26 = vadd.f32 %v2254_v55, %v7066_v32  ;;  %v2264_v34 = vadd.f32 %v2256_v21, %v7070_v22 }
 0xb20   :  { %v2206_v4 = vpop.f32.mrf.mxu0  ;;  %v2247_v63 = vpop.f32.mrf.mxu1 }
 0xb21   :  { %5907 = vpow2.f32 %v5189_v57  ;;  %v5190_v24 = vmul.f32 -1.442695, %v2262_v26  ;;  %v5191_v30 = vmul.f32 -1.442695, %v2264_v34  ;;  %v2285_v57 = vrot.slane %v7118_v58, 6 }
 0xb23   :  { %5909 = vpow2.f32 %v5190_v24 }
 0xb24   :  { %5911 = vpow2.f32 %v5191_v30 }
 0xb2e   :  { %v5908_v8 = vpop.eup %5907 }
 0xb2f   :  { %v2268_v52 = vadd.f32 1.0, %v5908_v8 }
 0xb30   :  { %v5910_v31 = vpop.eup %5909 }
 0xb31   :  { %5913 = vrcp.f32 %v2268_v52  ;;  %v2274_v37 = vadd.f32 1.0, %v5910_v31  ;;  %v5912_v55 = vpop.eup %5911 }
 0xb32   :  { %5915 = vtanh.f32 %v2263_v23  ;;  %v2281_v26 = vadd.f32 1.0, %v5912_v55 }
 0xb33   :  { %5917 = vrcp.f32 %v2274_v37 }
 0xb34   :  { %5919 = vrcp.f32 %v2281_v26 }
 0xb3e   :  { %v5914_v36 = vpop.eup %5913 }
 0xb3f   :  { %v5916_v35 = vpop.eup %5915 }
 0xb40   :  { %v5918_v1 = vpop.eup %5917  ;;  %v2288_v4 = vmul.f32 %v5916_v35, %v5914_v36 }
 0xb41   :  { %v2287_v9 = vmul.f32 %v5918_v1, %v2285_v57  ;;  %v5920_v24 = vpop.eup %5919 }
 0xb43   :  { %v7160_v63 = vadd.f32 %v2288_v4, %v2287_v9 }
 0xb45   :  { %5921 = vtanh.f32 %v7160_v63 }
 0xb52   :  { %v5922_v21 = vpop.eup %5921 }
 0xb53   :  { %v2291_v34 = vmul.f32 %v5922_v21, %v5920_v24 }
 0xb55   :  { %2292 = vst [vmem:[#allocation2] sm:$0x30] %v2291_v34  ;;  %v2293_v61 = vpack.c.bf16 %v2291_v34, %v2291_v34 }
 0xb57   :  { %v2295_v30 = vrot.slane %v2293_v61, 2 }
 0xb59   :  { %2330 = vmatmul.mubr.bf16.vlgmr.msra.gmra.mxu0 %v2295_v30  ;;  %2371 = vmatmul.mubr.bf16.vlgmr.msra.gmra.mxu1 %v2295_v30 }
 0xb5a   :  { %2428 = vmatpush1.bf16.msra.mxu0 %v6919_v33  ;;  %2469 = vmatpush1.bf16.msra.mxu1 %v6921_v60 }
 0xb5b   :  { %2429 = vmatprep.subr.bf16.mxu0 %v6923_v51  ;;  %2470 = vmatprep.subr.bf16.mxu1 %v6925_v39 }
 0xb5c   :  { %2459 = vmatprep.mubr.bf16.mxu0 %v8069_v45  ;;  %2500 = vmatprep.mubr.bf16.mxu1 %v8069_v45 }
 0xb5e   :  { %2430 = vmatpush1.bf16.msra.mxu0 %v6929_v62  ;;  %2471 = vmatpush1.bf16.msra.mxu1 %v6931_v53 }
 0xb5f   :  { %2431 = vmatprep.subr.bf16.mxu0 %v6935_v46  ;;  %2472 = vmatprep.subr.bf16.mxu1 %v6937_v3 }
 0xb62   :  { %2432 = vmatpush1.bf16.msra.mxu0 %v6943_v5  ;;  %2473 = vmatpush1.bf16.msra.mxu1 %v6945_v38 }
 0xb63   :  { %2433 = vmatprep.subr.bf16.mxu0 %v6949_v49  ;;  %2474 = vmatprep.subr.bf16.mxu1 %v6951_v42 }
 0xb66   :  { %2434 = vmatpush1.bf16.msra.mxu0 %v6955_v2  ;;  %2475 = vmatpush1.bf16.msra.mxu1 %v6957_v43 }
 0xb67   :  { %2435 = vmatprep.subr.bf16.mxu0 %v6961_v54  ;;  %2476 = vmatprep.subr.bf16.mxu1 %v6963_v50 }
 0xb6a   :  { %2436 = vmatpush1.bf16.msra.mxu0 %v6967_v59  ;;  %2477 = vmatpush1.bf16.msra.mxu1 %v6969_v0 }
 0xb6b   :  { %2437 = vmatprep.subr.bf16.mxu0 %v6973_v6  ;;  %2478 = vmatprep.subr.bf16.mxu1 %v6975_v7 }
 0xb6e   :  { %2438 = vmatpush1.bf16.msra.mxu0 %v6979_v11  ;;  %2479 = vmatpush1.bf16.msra.mxu1 %v6981_v12 }
 0xb6f   :  { %2439 = vmatprep.subr.bf16.mxu0 %v6985_v13  ;;  %2480 = vmatprep.subr.bf16.mxu1 %v6987_v14 }
 0xb72   :  { %2440 = vmatpush1.bf16.msra.mxu0 %v6991_v15  ;;  %2481 = vmatpush1.bf16.msra.mxu1 %v6993_v16 }
 0xb73   :  { %2441 = vmatprep.subr.bf16.mxu0 %v6997_v17  ;;  %2482 = vmatprep.subr.bf16.mxu1 %v6999_v18 }
 0xb76   :  { %2442 = vmatpush1.bf16.msra.mxu0 %v7003_v19  ;;  %2483 = vmatpush1.bf16.msra.mxu1 %v7005_v20 }
 0xb77   :  { %2542 = vmatprep.subr.bf16.mxu0 %v6908_v47  ;;  %2583 = vmatprep.subr.bf16.mxu1 %v6910_v10 }
 0xc19   :  { %v2331_v58 = vpop.f32.mrf.mxu0  ;;  %v2372_v8 = vpop.f32.mrf.mxu1 }
 0xc1a   :  { %v2383_v23 = vrot.slane %v2331_v58, 2  ;;  %v2385_v34 = vrot.slane %v2372_v8, 2 }
 0xc1b   :  { %v2333_v52 = vpop.f32.mrf.mxu0  ;;  %v2374_v31 = vpop.f32.mrf.mxu1 }
 0xc1c   :  { %v2391_v37 = vadd.f32 %v2383_v23, %v7064_v29  ;;  %v2384_v55 = vrot.slane %v2333_v52, 2  ;;  %v2386_v24 = vrot.slane %v2374_v31, 2  ;;  %v2393_v58 = vadd.f32 %v2385_v34, %v7073_v27 }
 0xc1d   :  { %v2335_v36 = vpop.f32.mrf.mxu0  ;;  %v2376_v35 = vpop.f32.mrf.mxu1 }
 0xc1e   :  { %v5192_v57 = vmul.f32 -1.442695, %v2391_v37  ;;  %v2392_v1 = vadd.f32 %v2384_v55, %v7066_v32  ;;  %v2394_v21 = vadd.f32 %v2386_v24, %v7070_v22  ;;  %v2415_v36 = vrot.slane %v7160_v63, 6 }
 0xc1f   :  { %v2336_v26 = vpop.f32.mrf.mxu0  ;;  %v2377_v4 = vpop.f32.mrf.mxu1 }
 0xc20   :  { %5923 = vpow2.f32 %v5192_v57  ;;  %v5193_v9 = vmul.f32 -1.442695, %v2392_v1  ;;  %v5194_v61 = vmul.f32 -1.442695, %v2394_v21 }
 0xc22   :  { %5925 = vpow2.f32 %v5193_v9 }
 0xc23   :  { %5927 = vpow2.f32 %v5194_v61 }
 0xc2d   :  { %v5924_v30 = vpop.eup %5923 }
 0xc2e   :  { %v2398_v29 = vadd.f32 1.0, %v5924_v30 }
 0xc2f   :  { %v5926_v23 = vpop.eup %5925 }
 0xc30   :  { %5929 = vrcp.f32 %v2398_v29  ;;  %v2404_v52 = vadd.f32 1.0, %v5926_v23  ;;  %v5928_v32 = vpop.eup %5927 }
 0xc31   :  { %5931 = vtanh.f32 %v2393_v58  ;;  %v2411_v35 = vadd.f32 1.0, %v5928_v32 }
 0xc32   :  { %5933 = vrcp.f32 %v2404_v52 }
 0xc33   :  { %5935 = vrcp.f32 %v2411_v35 }
 0xc3d   :  { %v5930_v37 = vpop.eup %5929 }
 0xc3e   :  { %v5932_v55 = vpop.eup %5931 }
 0xc3f   :  { %v5934_v31 = vpop.eup %5933  ;;  %v2418_v22 = vmul.f32 %v5932_v55, %v5930_v37 }
 0xc40   :  { %v2417_v8 = vmul.f32 %v5934_v31, %v2415_v36  ;;  %v5936_v27 = vpop.eup %5935 }
 0xc42   :  { %v7202_v57 = vadd.f32 %v2418_v22, %v2417_v8 }
 0xc44   :  { %5937 = vtanh.f32 %v7202_v57 }
 0xc51   :  { %v5938_v1 = vpop.eup %5937 }
 0xc52   :  { %v2421_v26 = vmul.f32 %v5938_v1, %v5936_v27 }
 0xc54   :  { %2422 = vst [vmem:[#allocation2] sm:$0xc0] %v2421_v26  ;;  %v2423_v4 = vpack.c.bf16 %v2421_v26, %v2421_v26  ;;  %v2533_v26 = vrot.slane %v7202_v57, 6 }
 0xc56   :  { %v2425_v9 = vrot.slane %v2423_v4, 3 }
 0xc58   :  { %2460 = vmatmul.mubr.bf16.vlgmr.msra.gmra.mxu0 %v2425_v9  ;;  %2501 = vmatmul.mubr.bf16.vlgmr.msra.gmra.mxu1 %v2425_v9 }
 0xc59   :  { %2543 = vmatpush1.bf16.msra.mxu0 %v6919_v33  ;;  %2584 = vmatpush1.bf16.msra.mxu1 %v6921_v60 }
 0xc5a   :  { %2544 = vmatprep.subr.bf16.mxu0 %v6923_v51  ;;  %2585 = vmatprep.subr.bf16.mxu1 %v6925_v39 }
 0xc5b   :  { %2574 = vmatprep.mubr.bf16.mxu0 %v8069_v45  ;;  %2615 = vmatprep.mubr.bf16.mxu1 %v8069_v45 }
 0xc5d   :  { %2545 = vmatpush1.bf16.msra.mxu0 %v6929_v62  ;;  %2586 = vmatpush1.bf16.msra.mxu1 %v6931_v53 }
 0xc5e   :  { %2546 = vmatprep.subr.bf16.mxu0 %v6935_v46  ;;  %2587 = vmatprep.subr.bf16.mxu1 %v6937_v3 }
 0xc61   :  { %2547 = vmatpush1.bf16.msra.mxu0 %v6943_v5  ;;  %2588 = vmatpush1.bf16.msra.mxu1 %v6945_v38 }
 0xc62   :  { %2548 = vmatprep.subr.bf16.mxu0 %v6949_v49  ;;  %2589 = vmatprep.subr.bf16.mxu1 %v6951_v42 }
 0xc65   :  { %2549 = vmatpush1.bf16.msra.mxu0 %v6955_v2  ;;  %2590 = vmatpush1.bf16.msra.mxu1 %v6957_v43 }
 0xc66   :  { %2550 = vmatprep.subr.bf16.mxu0 %v6961_v54  ;;  %2591 = vmatprep.subr.bf16.mxu1 %v6963_v50 }
 0xc69   :  { %2551 = vmatpush1.bf16.msra.mxu0 %v6967_v59  ;;  %2592 = vmatpush1.bf16.msra.mxu1 %v6969_v0 }
 0xc6a   :  { %2552 = vmatprep.subr.bf16.mxu0 %v6973_v6  ;;  %2593 = vmatprep.subr.bf16.mxu1 %v6975_v7 }
 0xc6d   :  { %2553 = vmatpush1.bf16.msra.mxu0 %v6979_v11  ;;  %2594 = vmatpush1.bf16.msra.mxu1 %v6981_v12 }
 0xc6e   :  { %2554 = vmatprep.subr.bf16.mxu0 %v6985_v13  ;;  %2595 = vmatprep.subr.bf16.mxu1 %v6987_v14 }
 0xc71   :  { %2555 = vmatpush1.bf16.msra.mxu0 %v6991_v15  ;;  %2596 = vmatpush1.bf16.msra.mxu1 %v6993_v16 }
 0xc72   :  { %2556 = vmatprep.subr.bf16.mxu0 %v6997_v17  ;;  %2597 = vmatprep.subr.bf16.mxu1 %v6999_v18 }
 0xc75   :  { %2557 = vmatpush1.bf16.msra.mxu0 %v7003_v19  ;;  %2598 = vmatpush1.bf16.msra.mxu1 %v7005_v20 }
 0xc76   :  { %2672 = vmatprep.subr.bf16.mxu0 %v6908_v47  ;;  %2713 = vmatprep.subr.bf16.mxu1 %v6910_v10 }
 0xd18   :  { %v2461_v63 = vpop.f32.mrf.mxu0  ;;  %v2502_v24 = vpop.f32.mrf.mxu1 }
 0xd19   :  { %v2509_v21 = vadd.f32 %v2461_v63, %v7056_v48  ;;  %v2511_v36 = vadd.f32 %v2502_v24, %v7058_v56 }
 0xd1a   :  { %v2463_v34 = vpop.f32.mrf.mxu0  ;;  %v2504_v61 = vpop.f32.mrf.mxu1 }
 0xd1b   :  { %v5195_v30 = vmul.f32 -1.442695, %v2509_v21  ;;  %v2510_v58 = vadd.f32 %v2463_v34, %v7060_v25  ;;  %v2512_v47 = vadd.f32 %v2504_v61, %v7062_v28 }
 0xd1c   :  { %v2465_v29 = vpop.f32.mrf.mxu0  ;;  %v2506_v23 = vpop.f32.mrf.mxu1 }
 0xd1d   :  { %5939 = vpow2.f32 %v5195_v30  ;;  %v5196_v52 = vmul.f32 -1.442695, %v2510_v58  ;;  %v5197_v55 = vmul.f32 -1.442695, %v2512_v47 }
 0xd1e   :  { %v2466_v32 = vpop.f32.mrf.mxu0  ;;  %v2507_v37 = vpop.f32.mrf.mxu1 }
 0xd1f   :  { %5941 = vpow2.f32 %v5196_v52 }
 0xd20   :  { %5943 = vpow2.f32 %v5197_v55 }
 0xd2a   :  { %v5940_v10 = vpop.eup %5939 }
 0xd2b   :  { %v2516_v31 = vadd.f32 1.0, %v5940_v10 }
 0xd2c   :  { %v5942_v35 = vpop.eup %5941 }
 0xd2d   :  { %5945 = vrcp.f32 %v2516_v31  ;;  %v2522_v22 = vadd.f32 1.0, %v5942_v35  ;;  %v5944_v8 = vpop.eup %5943  ;;  %v6170_v31 = vld [vmem:[#allocation7 + $0xe8] ss:$16 sps:$4 sm:$0xff]   ;;  %v6171_v35 = vld [vmem:[#allocation7 + $0xc4] ss:$16 sps:$4 sm:$0xff]  }
 0xd2e   :  { %5947 = vtanh.f32 %v2511_v36  ;;  %v2529_v9 = vadd.f32 1.0, %v5944_v8  ;;  %v6169_v36 = vld [vmem:[#allocation7 + $0xe0] ss:$16 sps:$4 sm:$0xff]  }
 0xd2f   :  { %5949 = vrcp.f32 %v2522_v22  ;;  %v6172_v22 = vld [vmem:[#allocation7 + $0xcc] ss:$16 sps:$4 sm:$0xff]   ;;  %v6173_v8 = vld [vmem:[#allocation7 + $0xc0] ss:$16 sps:$4 sm:$0xff]  }
 0xd30   :  { %5951 = vrcp.f32 %v2529_v9  ;;  %v6178_v9 = vld [vmem:[#allocation7 + $0xa8] ss:$16 sps:$4 sm:$0xff]  }
 0xd3a   :  { %v5946_v27 = vpop.eup %5945 }
 0xd3b   :  { %v5948_v1 = vpop.eup %5947 }
 0xd3c   :  { %v5950_v4 = vpop.eup %5949  ;;  %v2536_v63 = vmul.f32 %v5948_v1, %v5946_v27  ;;  %v6174_v27 = vld [vmem:[#allocation7 + $0xc8] ss:$16 sps:$4 sm:$0xff]   ;;  %v6175_v1 = vld [vmem:[#allocation7 + $0xa4] ss:$16 sps:$4 sm:$0xff]  }
 0xd3d   :  { %v2535_v21 = vmul.f32 %v5950_v4, %v2533_v26  ;;  %v5952_v24 = vpop.eup %5951  ;;  %v6176_v26 = vld [vmem:[#allocation7 + $0xac] ss:$16 sps:$4 sm:$0xff]   ;;  %v6177_v4 = vld [vmem:[#allocation7 + $0xa0] ss:$16 sps:$4 sm:$0xff]  }
 0xd3f   :  { %v7244_v34 = vadd.f32 %v2536_v63, %v2535_v21  ;;  %v6179_v63 = vld [vmem:[#allocation7 + $0x84] ss:$16 sps:$4 sm:$0xff]   ;;  %v6180_v21 = vld [vmem:[#allocation7 + $0x8c] ss:$16 sps:$4 sm:$0xff]  }
 0xd41   :  { %5953 = vtanh.f32 %v7244_v34 }
 0xd4e   :  { %v5954_v61 = vpop.eup %5953 }
 0xd4f   :  { %v2539_v30 = vmul.f32 %v5954_v61, %v5952_v24  ;;  %v6182_v24 = vld [vmem:[#allocation7 + $0x88] ss:$16 sps:$4 sm:$0xff]   ;;  %v6183_v61 = vld [vmem:[#allocation7 + $0x64] ss:$16 sps:$4 sm:$0xff]  }
 0xd51   :  { %2540 = vst [vmem:[#allocation2 + $0x8] sm:$0x3] %v2539_v30  ;;  %v2541_v58 = vpack.c.bf16 %v2539_v30, %v2539_v30  ;;  %v6184_v30 = vld [vmem:[#allocation7 + $0x6c] ss:$16 sps:$4 sm:$0xff]  }
 0xd53   :  { %2575 = vmatmul.mubr.bf16.vlgmr.msra.gmra.mxu0 %v2541_v58  ;;  %2616 = vmatmul.mubr.bf16.vlgmr.msra.gmra.mxu1 %v2541_v58  ;;  %v6185_v58 = vld [vmem:[#allocation7 + $0x60] ss:$16 sps:$4 sm:$0xff]  }
 0xd54   :  { %2673 = vmatpush1.bf16.msra.mxu0 %v6919_v33  ;;  %2714 = vmatpush1.bf16.msra.mxu1 %v6921_v60  ;;  %v6167_v33 = vld [vmem:[#allocation7 + $0xe4] ss:$16 sps:$4 sm:$0xff]   ;;  %v6168_v60 = vld [vmem:[#allocation7 + $0xec] ss:$16 sps:$4 sm:$0xff]  }
 0xd55   :  { %2674 = vmatprep.subr.bf16.mxu0 %v6923_v51  ;;  %2715 = vmatprep.subr.bf16.mxu1 %v6925_v39 }
 0xd56   :  { %2704 = vmatprep.mubr.bf16.mxu0 %v8069_v45  ;;  %2745 = vmatprep.mubr.bf16.mxu1 %v8069_v45 }
 0xd58   :  { %2675 = vmatpush1.bf16.msra.mxu0 %v6929_v62  ;;  %2716 = vmatpush1.bf16.msra.mxu1 %v6931_v53 }
 0xd59   :  { %2676 = vmatprep.subr.bf16.mxu0 %v6935_v46  ;;  %2717 = vmatprep.subr.bf16.mxu1 %v6937_v3 }
 0xd5c   :  { %2677 = vmatpush1.bf16.msra.mxu0 %v6943_v5  ;;  %2718 = vmatpush1.bf16.msra.mxu1 %v6945_v38 }
 0xd5d   :  { %2678 = vmatprep.subr.bf16.mxu0 %v6949_v49  ;;  %2719 = vmatprep.subr.bf16.mxu1 %v6951_v42 }
 0xd60   :  { %2679 = vmatpush1.bf16.msra.mxu0 %v6955_v2  ;;  %2720 = vmatpush1.bf16.msra.mxu1 %v6957_v43 }
 0xd61   :  { %2680 = vmatprep.subr.bf16.mxu0 %v6961_v54  ;;  %2721 = vmatprep.subr.bf16.mxu1 %v6963_v50 }
 0xd64   :  { %2681 = vmatpush1.bf16.msra.mxu0 %v6967_v59  ;;  %2722 = vmatpush1.bf16.msra.mxu1 %v6969_v0 }
 0xd65   :  { %2682 = vmatprep.subr.bf16.mxu0 %v6973_v6  ;;  %2723 = vmatprep.subr.bf16.mxu1 %v6975_v7 }
 0xd68   :  { %2683 = vmatpush1.bf16.msra.mxu0 %v6979_v11  ;;  %2724 = vmatpush1.bf16.msra.mxu1 %v6981_v12 }
 0xd69   :  { %2684 = vmatprep.subr.bf16.mxu0 %v6985_v13  ;;  %2725 = vmatprep.subr.bf16.mxu1 %v6987_v14 }
 0xd6c   :  { %2685 = vmatpush1.bf16.msra.mxu0 %v6991_v15  ;;  %2726 = vmatpush1.bf16.msra.mxu1 %v6993_v16 }
 0xd6d   :  { %2686 = vmatprep.subr.bf16.mxu0 %v6997_v17  ;;  %2727 = vmatprep.subr.bf16.mxu1 %v6999_v18 }
 0xd70   :  { %2687 = vmatpush1.bf16.msra.mxu0 %v7003_v19  ;;  %2728 = vmatpush1.bf16.msra.mxu1 %v7005_v20  ;;  %v2660_v19 = vrot.slane %v7244_v34, 6  ;;  %v6181_v34 = vld [vmem:[#allocation7 + $0x80] ss:$16 sps:$4 sm:$0xff]  }
 0xd71   :  { %2802 = vmatprep.subr.bf16.mxu0 %v6167_v33  ;;  %2843 = vmatprep.subr.bf16.mxu1 %v6168_v60  ;;  %v6186_v33 = vld [vmem:[#allocation7 + $0x68] ss:$16 sps:$4 sm:$0xff]   ;;  %v6187_v60 = vld [vmem:[#allocation7 + $0x44] ss:$16 sps:$4 sm:$0xff]  }
 0xe13   :  { %v2576_v51 = vpop.f32.mrf.mxu0  ;;  %v2617_v39 = vpop.f32.mrf.mxu1 }
 0xe14   :  { %v2628_v62 = vrot.slane %v2576_v51, 6  ;;  %v2630_v6 = vrot.slane %v2617_v39, 6  ;;  %v6188_v51 = vld [vmem:[#allocation7 + $0x4c] ss:$16 sps:$4 sm:$0xff]   ;;  %v6189_v39 = vld [vmem:[#allocation7 + $0x40] ss:$16 sps:$4 sm:$0xff]  }
 0xe15   :  { %v2578_v53 = vpop.f32.mrf.mxu0  ;;  %v2619_v46 = vpop.f32.mrf.mxu1 }
 0xe16   :  { %v2636_v3 = vadd.f32 %v2628_v62, %v7056_v48  ;;  %v2629_v5 = vrot.slane %v2578_v53, 6  ;;  %v2631_v59 = vrot.slane %v2619_v46, 6  ;;  %v2638_v12 = vadd.f32 %v2630_v6, %v7058_v56  ;;  %v6190_v62 = vld [vmem:[#allocation7 + $0x48] ss:$16 sps:$4 sm:$0xff]   ;;  %v6191_v53 = vld [vmem:[#allocation7 + $0x24] ss:$16 sps:$4 sm:$0xff]  }
 0xe17   :  { %v2580_v38 = vpop.f32.mrf.mxu0  ;;  %v2621_v49 = vpop.f32.mrf.mxu1  ;;  %v6192_v46 = vld [vmem:[#allocation7 + $0x2c] ss:$16 sps:$4 sm:$0xff]  }
 0xe18   :  { %v5198_v42 = vmul.f32 -1.442695, %v2636_v3  ;;  %v2637_v2 = vadd.f32 %v2629_v5, %v7060_v25  ;;  %v2639_v0 = vadd.f32 %v2631_v59, %v7062_v28  ;;  %v6193_v3 = vld [vmem:[#allocation7 + $0x20] ss:$16 sps:$4 sm:$0xff]   ;;  %v6194_v5 = vld [vmem:[#allocation7 + $0x28] ss:$16 sps:$4 sm:$0xff]  }
 0xe19   :  { %v2581_v43 = vpop.f32.mrf.mxu0  ;;  %v2622_v54 = vpop.f32.mrf.mxu1  ;;  %v6195_v38 = vld [vmem:[#allocation7 + $0x4] ss:$16 sps:$4 sm:$0xff]   ;;  %v6196_v49 = vld [vmem:[#allocation7 + $0xc] ss:$16 sps:$4 sm:$0xff]  }
 0xe1a   :  { %5955 = vpow2.f32 %v5198_v42  ;;  %v5199_v50 = vmul.f32 -1.442695, %v2637_v2  ;;  %v5200_v7 = vmul.f32 -1.442695, %v2639_v0  ;;  %v6197_v42 = vld [vmem:[#allocation7] ss:$16 sps:$4 sm:$0xff]  }
 0xe1b   :  { %v6198_v2 = vld [vmem:[#allocation7 + $0x8] ss:$16 sps:$4 sm:$0xff]  }
 0xe1c   :  { %5957 = vpow2.f32 %v5199_v50 }
 0xe1d   :  { %5959 = vpow2.f32 %v5200_v7 }
 0xe27   :  { %v5956_v11 = vpop.eup %5955 }
 0xe28   :  { %v2643_v13 = vadd.f32 1.0, %v5956_v11 }
 0xe29   :  { %v5958_v14 = vpop.eup %5957 }
 0xe2a   :  { %5961 = vrcp.f32 %v2643_v13  ;;  %v2649_v15 = vadd.f32 1.0, %v5958_v14  ;;  %v5960_v16 = vpop.eup %5959 }
 0xe2b   :  { %5963 = vtanh.f32 %v2638_v12  ;;  %v2656_v57 = vadd.f32 1.0, %v5960_v16 }
 0xe2c   :  { %5965 = vrcp.f32 %v2649_v15 }
 0xe2d   :  { %5967 = vrcp.f32 %v2656_v57 }
 0xe37   :  { %v5962_v17 = vpop.eup %5961 }
 0xe38   :  { %v5964_v18 = vpop.eup %5963 }
 0xe39   :  { %v5966_v20 = vpop.eup %5965  ;;  %v2663_v29 = vmul.f32 %v5964_v18, %v5962_v17 }
 0xe3a   :  { %v2662_v23 = vmul.f32 %v5966_v20, %v2660_v19  ;;  %v5968_v32 = vpop.eup %5967 }
 0xe3c   :  { %v7284_v52 = vadd.f32 %v2663_v29, %v2662_v23 }
 0xe3e   :  { %5969 = vtanh.f32 %v7284_v52 }
 0xe4b   :  { %v5970_v37 = vpop.eup %5969 }
 0xe4c   :  { %v2666_v47 = vmul.f32 %v5970_v37, %v5968_v32 }
 0xe4e   :  { %2667 = vst [vmem:[#allocation2 + $0x8] sm:$0xc] %v2666_v47  ;;  %v2668_v55 = vpack.c.bf16 %v2666_v47, %v2666_v47 }
 0xe50   :  { %v2670_v10 = vrot.slane %v2668_v55, 1 }
 0xe52   :  { %2705 = vmatmul.mubr.bf16.vlgmr.msra.gmra.mxu0 %v2670_v10  ;;  %2746 = vmatmul.mubr.bf16.vlgmr.msra.gmra.mxu1 %v2670_v10 }
 0xe53   :  { %2803 = vmatpush1.bf16.msra.mxu0 %v6169_v36  ;;  %2844 = vmatpush1.bf16.msra.mxu1 %v6170_v31  ;;  %v2790_v31 = vrot.slane %v7284_v52, 6  ;;  %v5653_v52 = vld [vmem:[#allocation5 + $0x1e4] ss:$16 sps:$4 sm:$0xff]  }
 0xe54   :  { %2804 = vmatprep.subr.bf16.mxu0 %v6171_v35  ;;  %2845 = vmatprep.subr.bf16.mxu1 %v6172_v22 }
 0xe55   :  { %2834 = vmatprep.mubr.bf16.mxu0 %v8069_v45  ;;  %2875 = vmatprep.mubr.bf16.mxu1 %v8069_v45 }
 0xe57   :  { %2805 = vmatpush1.bf16.msra.mxu0 %v6173_v8  ;;  %2846 = vmatpush1.bf16.msra.mxu1 %v6174_v27 }
 0xe58   :  { %2806 = vmatprep.subr.bf16.mxu0 %v6175_v1  ;;  %2847 = vmatprep.subr.bf16.mxu1 %v6176_v26 }
 0xe5b   :  { %2807 = vmatpush1.bf16.msra.mxu0 %v6177_v4  ;;  %2848 = vmatpush1.bf16.msra.mxu1 %v6178_v9 }
 0xe5c   :  { %2808 = vmatprep.subr.bf16.mxu0 %v6179_v63  ;;  %2849 = vmatprep.subr.bf16.mxu1 %v6180_v21 }
 0xe5f   :  { %2809 = vmatpush1.bf16.msra.mxu0 %v6181_v34  ;;  %2850 = vmatpush1.bf16.msra.mxu1 %v6182_v24  ;;  %v5656_v34 = vld [vmem:[#allocation5 + $0x1ec] ss:$16 sps:$4 sm:$0xff]   ;;  %v5651_v24 = vld [vmem:[#allocation5 + $0x1e0] ss:$16 sps:$4 sm:$0xff]  }
 0xe60   :  { %2810 = vmatprep.subr.bf16.mxu0 %v6183_v61  ;;  %2851 = vmatprep.subr.bf16.mxu1 %v6184_v30  ;;  %v5654_v61 = vld [vmem:[#allocation5 + $0x1e8] ss:$16 sps:$4 sm:$0xff]   ;;  %v5659_v30 = vld [vmem:[#allocation5 + $0x1c4] ss:$16 sps:$4 sm:$0xff]  }
 0xe63   :  { %2811 = vmatpush1.bf16.msra.mxu0 %v6185_v58  ;;  %2852 = vmatpush1.bf16.msra.mxu1 %v6186_v33  ;;  %v5662_v58 = vld [vmem:[#allocation5 + $0x1cc] ss:$16 sps:$4 sm:$0xff]   ;;  %v5657_v33 = vld [vmem:[#allocation5 + $0x1c0] ss:$16 sps:$4 sm:$0xff]  }
 0xe64   :  { %2812 = vmatprep.subr.bf16.mxu0 %v6187_v60  ;;  %2853 = vmatprep.subr.bf16.mxu1 %v6188_v51  ;;  %v5660_v60 = vld [vmem:[#allocation5 + $0x1c8] ss:$16 sps:$4 sm:$0xff]   ;;  %v5665_v51 = vld [vmem:[#allocation5 + $0x1a4] ss:$16 sps:$4 sm:$0xff]  }
 0xe67   :  { %2813 = vmatpush1.bf16.msra.mxu0 %v6189_v39  ;;  %2854 = vmatpush1.bf16.msra.mxu1 %v6190_v62  ;;  %v5668_v39 = vld [vmem:[#allocation5 + $0x1ac] ss:$16 sps:$4 sm:$0xff]   ;;  %v5663_v62 = vld [vmem:[#allocation5 + $0x1a0] ss:$16 sps:$4 sm:$0xff]  }
 0xe68   :  { %2814 = vmatprep.subr.bf16.mxu0 %v6191_v53  ;;  %2855 = vmatprep.subr.bf16.mxu1 %v6192_v46  ;;  %v5666_v53 = vld [vmem:[#allocation5 + $0x1a8] ss:$16 sps:$4 sm:$0xff]   ;;  %v5671_v46 = vld [vmem:[#allocation5 + $0x184] ss:$16 sps:$4 sm:$0xff]  }
 0xe6b   :  { %2815 = vmatpush1.bf16.msra.mxu0 %v6193_v3  ;;  %2856 = vmatpush1.bf16.msra.mxu1 %v6194_v5  ;;  %v5674_v3 = vld [vmem:[#allocation5 + $0x18c] ss:$16 sps:$4 sm:$0xff]   ;;  %v5669_v5 = vld [vmem:[#allocation5 + $0x180] ss:$16 sps:$4 sm:$0xff]  }
 0xe6c   :  { %2816 = vmatprep.subr.bf16.mxu0 %v6195_v38  ;;  %2857 = vmatprep.subr.bf16.mxu1 %v6196_v49  ;;  %v5672_v38 = vld [vmem:[#allocation5 + $0x188] ss:$16 sps:$4 sm:$0xff]   ;;  %v5677_v49 = vld [vmem:[#allocation5 + $0x164] ss:$16 sps:$4 sm:$0xff]  }
 0xe6f   :  { %2817 = vmatpush1.bf16.msra.mxu0 %v6197_v42  ;;  %2858 = vmatpush1.bf16.msra.mxu1 %v6198_v2  ;;  %v5680_v42 = vld [vmem:[#allocation5 + $0x16c] ss:$16 sps:$4 sm:$0xff]   ;;  %v5675_v2 = vld [vmem:[#allocation5 + $0x160] ss:$16 sps:$4 sm:$0xff]  }
 0xe70   :  { %3147 = vmatprep.subr.bf16.mxu0 %v5653_v52  ;;  %3190 = vmatprep.subr.bf16.mxu1 %v5656_v34 }
 0xf12   :  { %v2706_v43 = vpop.f32.mrf.mxu0  ;;  %v2747_v54 = vpop.f32.mrf.mxu1 }
 0xf13   :  { %v2758_v50 = vrot.slane %v2706_v43, 4  ;;  %v2760_v20 = vrot.slane %v2747_v54, 4  ;;  %v5678_v43 = vld [vmem:[#allocation5 + $0x168] ss:$16 sps:$4 sm:$0xff]   ;;  %v5683_v54 = vld [vmem:[#allocation5 + $0x144] ss:$16 sps:$4 sm:$0xff]  }
 0xf14   :  { %v2708_v59 = vpop.f32.mrf.mxu0  ;;  %v2749_v0 = vpop.f32.mrf.mxu1 }
 0xf15   :  { %v2766_v6 = vadd.f32 %v2758_v50, %v7056_v48  ;;  %v2759_v7 = vrot.slane %v2708_v59, 4  ;;  %v2761_v18 = vrot.slane %v2749_v0, 4  ;;  %v2768_v23 = vadd.f32 %v2760_v20, %v7058_v56  ;;  %v5686_v50 = vld [vmem:[#allocation5 + $0x14c] ss:$16 sps:$4 sm:$0xff]   ;;  %v5681_v59 = vld [vmem:[#allocation5 + $0x140] ss:$16 sps:$4 sm:$0xff]  }
 0xf16   :  { %v2710_v11 = vpop.f32.mrf.mxu0  ;;  %v2751_v12 = vpop.f32.mrf.mxu1  ;;  %v5684_v0 = vld [vmem:[#allocation5 + $0x148] ss:$16 sps:$4 sm:$0xff]  }
 0xf17   :  { %v5201_v13 = vmul.f32 -1.442695, %v2766_v6  ;;  %v2767_v14 = vadd.f32 %v2759_v7, %v7060_v25  ;;  %v2769_v19 = vadd.f32 %v2761_v18, %v7062_v28  ;;  %v5687_v6 = vld [vmem:[#allocation5 + $0x120] ss:$16 sps:$4 sm:$0xff]   ;;  %v5689_v7 = vld [vmem:[#allocation5 + $0x124] ss:$16 sps:$4 sm:$0xff]  }
 0xf18   :  { %v2711_v15 = vpop.f32.mrf.mxu0  ;;  %v2752_v16 = vpop.f32.mrf.mxu1  ;;  %v5690_v11 = vld [vmem:[#allocation5 + $0x128] ss:$16 sps:$4 sm:$0xff]   ;;  %v5692_v12 = vld [vmem:[#allocation5 + $0x12c] ss:$16 sps:$4 sm:$0xff]  }
 0xf19   :  { %5971 = vpow2.f32 %v5201_v13  ;;  %v5202_v17 = vmul.f32 -1.442695, %v2767_v14  ;;  %v5203_v57 = vmul.f32 -1.442695, %v2769_v19  ;;  %v5695_v13 = vld [vmem:[#allocation5 + $0x104] ss:$16 sps:$4 sm:$0xff]  }
 0xf1a   :  { %v5698_v14 = vld [vmem:[#allocation5 + $0x10c] ss:$16 sps:$4 sm:$0xff]   ;;  %v5693_v15 = vld [vmem:[#allocation5 + $0x100] ss:$16 sps:$4 sm:$0xff]   ;;  %v5696_v16 = vld [vmem:[#allocation5 + $0x108] ss:$16 sps:$4 sm:$0xff]  }
 0xf1b   :  { %5973 = vpow2.f32 %v5202_v17  ;;  %v7299_v17 = vld [vmem:[#allocation7 + $0x1e4] ss:$16 sps:$4 sm:$0xff]   ;;  %v7301_v18 = vld [vmem:[#allocation7 + $0x1ec] ss:$16 sps:$4 sm:$0xff]  }
 0xf1c   :  { %5975 = vpow2.f32 %v5203_v57 }
 0xf26   :  { %v5972_v29 = vpop.eup %5971 }
 0xf27   :  { %v2773_v32 = vadd.f32 1.0, %v5972_v29 }
 0xf28   :  { %v5974_v37 = vpop.eup %5973 }
 0xf29   :  { %5977 = vrcp.f32 %v2773_v32  ;;  %v2779_v47 = vadd.f32 1.0, %v5974_v37  ;;  %v5976_v55 = vpop.eup %5975 }
 0xf2a   :  { %5979 = vtanh.f32 %v2768_v23  ;;  %v2786_v22 = vadd.f32 1.0, %v5976_v55 }
 0xf2b   :  { %5981 = vrcp.f32 %v2779_v47 }
 0xf2c   :  { %5983 = vrcp.f32 %v2786_v22 }
 0xf36   :  { %v5978_v10 = vpop.eup %5977 }
 0xf37   :  { %v5980_v36 = vpop.eup %5979 }
 0xf38   :  { %v5982_v35 = vpop.eup %5981  ;;  %v2793_v8 = vmul.f32 %v5980_v36, %v5978_v10 }
 0xf39   :  { %v2792_v27 = vmul.f32 %v5982_v35, %v2790_v31  ;;  %v5984_v26 = vpop.eup %5983 }
 0xf3b   :  { %v7294_v1 = vadd.f32 %v2793_v8, %v2792_v27 }
 0xf3d   :  { %5985 = vtanh.f32 %v7294_v1 }
 0xf4a   :  { %v5986_v4 = vpop.eup %5985 }
 0xf4b   :  { %v2796_v9 = vmul.f32 %v5986_v4, %v5984_v26 }
 0xf4d   :  { %2797 = vst [vmem:[#allocation2 + $0x8] sm:$0x30] %v2796_v9  ;;  %v2798_v63 = vpack.c.bf16 %v2796_v9, %v2796_v9 }
 0xf4f   :  { %v2800_v21 = vrot.slane %v2798_v63, 2 }
 0xf51   :  { %2835 = vmatmul.mubr.bf16.vlgmr.msra.gmra.mxu0 %v2800_v21  ;;  %2876 = vmatmul.mubr.bf16.vlgmr.msra.gmra.mxu1 %v2800_v21 }
 0xf52   :  { %3179 = vmatprep.mubr.bf16.mxu0 %v8069_v45  ;;  %3222 = vmatprep.mubr.bf16.mxu1 %v8069_v45 }
 0xf53   :  { %3148 = vmatpush1.bf16.msra.mxu0 %v5651_v24  ;;  %3191 = vmatpush1.bf16.msra.mxu1 %v5654_v61  ;;  %v2920_v61 = vrot.slane %v7294_v1, 6  ;;  %v7316_v1 = vld [vmem:[#allocation7 + $0x1cc] ss:$16 sps:$4 sm:$0xff]  }
 0xf54   :  { %3149 = vmatprep.subr.bf16.mxu0 %v5659_v30  ;;  %3192 = vmatprep.subr.bf16.mxu1 %v5662_v58 }
 0xf57   :  { %3150 = vmatpush1.bf16.msra.mxu0 %v5657_v33  ;;  %3193 = vmatpush1.bf16.msra.mxu1 %v5660_v60 }
 0xf58   :  { %3151 = vmatprep.subr.bf16.mxu0 %v5665_v51  ;;  %3194 = vmatprep.subr.bf16.mxu1 %v5668_v39 }
 0xf5b   :  { %3152 = vmatpush1.bf16.msra.mxu0 %v5663_v62  ;;  %3195 = vmatpush1.bf16.msra.mxu1 %v5666_v53  ;;  %v2928_v62 = vld [vmem:[#allocation2] sm:$0xff] }
 0xf5c   :  { %3153 = vmatprep.subr.bf16.mxu0 %v5671_v46  ;;  %3196 = vmatprep.subr.bf16.mxu1 %v5674_v3  ;;  %v7310_v46 = vld [vmem:[#allocation7 + $0x1e0] ss:$16 sps:$4 sm:$0xff]   ;;  %v7312_v3 = vld [vmem:[#allocation7 + $0x1e8] ss:$16 sps:$4 sm:$0xff]  }
 0xf5f   :  { %3154 = vmatpush1.bf16.msra.mxu0 %v5669_v5  ;;  %3197 = vmatpush1.bf16.msra.mxu1 %v5672_v38  ;;  %v7314_v38 = vld [vmem:[#allocation7 + $0x1c4] ss:$16 sps:$4 sm:$0xff]  }
 0xf60   :  { %3155 = vmatprep.subr.bf16.mxu0 %v5677_v49  ;;  %3198 = vmatprep.subr.bf16.mxu1 %v5680_v42  ;;  %v7320_v49 = vld [vmem:[#allocation7 + $0x1c0] ss:$16 sps:$4 sm:$0xff]   ;;  %v7322_v42 = vld [vmem:[#allocation7 + $0x1c8] ss:$16 sps:$4 sm:$0xff]  }
 0xf63   :  { %3156 = vmatpush1.bf16.msra.mxu0 %v5675_v2  ;;  %3199 = vmatpush1.bf16.msra.mxu1 %v5678_v43  ;;  %v7326_v2 = vld [vmem:[#allocation7 + $0x1a4] ss:$16 sps:$4 sm:$0xff]   ;;  %v7328_v43 = vld [vmem:[#allocation7 + $0x1ac] ss:$16 sps:$4 sm:$0xff]  }
 0xf64   :  { %3157 = vmatprep.subr.bf16.mxu0 %v5683_v54  ;;  %3200 = vmatprep.subr.bf16.mxu1 %v5686_v50  ;;  %v7334_v54 = vld [vmem:[#allocation7 + $0x1a0] ss:$16 sps:$4 sm:$0xff]   ;;  %v7336_v50 = vld [vmem:[#allocation7 + $0x1a8] ss:$16 sps:$4 sm:$0xff]  }
 0xf67   :  { %3158 = vmatpush1.bf16.msra.mxu0 %v5681_v59  ;;  %3201 = vmatpush1.bf16.msra.mxu1 %v5684_v0  ;;  %v7340_v59 = vld [vmem:[#allocation7 + $0x184] ss:$16 sps:$4 sm:$0xff]   ;;  %v7342_v0 = vld [vmem:[#allocation7 + $0x18c] ss:$16 sps:$4 sm:$0xff]  }
 0xf68   :  { %3159 = vmatprep.subr.bf16.mxu0 %v5689_v7  ;;  %3202 = vmatprep.subr.bf16.mxu1 %v5692_v12  ;;  %v7348_v7 = vld [vmem:[#allocation7 + $0x188] ss:$16 sps:$4 sm:$0xff]   ;;  %v7354_v12 = vld [vmem:[#allocation7 + $0x16c] ss:$16 sps:$4 sm:$0xff]  }
 0xf6b   :  { %3160 = vmatpush1.bf16.msra.mxu0 %v5687_v6  ;;  %3203 = vmatpush1.bf16.msra.mxu1 %v5690_v11  ;;  %v7346_v6 = vld [vmem:[#allocation7 + $0x180] ss:$16 sps:$4 sm:$0xff]   ;;  %v7352_v11 = vld [vmem:[#allocation7 + $0x164] ss:$16 sps:$4 sm:$0xff]  }
 0xf6c   :  { %3161 = vmatprep.subr.bf16.mxu0 %v5695_v13  ;;  %3204 = vmatprep.subr.bf16.mxu1 %v5698_v14  ;;  %v7358_v13 = vld [vmem:[#allocation7 + $0x160] ss:$16 sps:$4 sm:$0xff]   ;;  %v7360_v14 = vld [vmem:[#allocation7 + $0x168] ss:$16 sps:$4 sm:$0xff]  }
 0xf6f   :  { %3162 = vmatpush1.bf16.msra.mxu0 %v5693_v15  ;;  %3205 = vmatpush1.bf16.msra.mxu1 %v5696_v16  ;;  %v7364_v15 = vld [vmem:[#allocation7 + $0x144] ss:$16 sps:$4 sm:$0xff]   ;;  %v7366_v16 = vld [vmem:[#allocation7 + $0x14c] ss:$16 sps:$4 sm:$0xff]  }
 0xf70   :  { %3426 = vmatprep.subr.bf16.mxu0 %v7299_v17  ;;  %3467 = vmatprep.subr.bf16.mxu1 %v7301_v18 }
0x1011   :  { %v2836_v19 = vpop.f32.mrf.mxu0  ;;  %v2877_v20 = vpop.f32.mrf.mxu1 }
0x1012   :  { %v2888_v57 = vrot.slane %v2836_v19, 2  ;;  %v2890_v26 = vrot.slane %v2877_v20, 2  ;;  %v7370_v19 = vld [vmem:[#allocation7 + $0x140] ss:$16 sps:$4 sm:$0xff]   ;;  %v7372_v20 = vld [vmem:[#allocation7 + $0x148] ss:$16 sps:$4 sm:$0xff]  }
0x1013   :  { %v2838_v29 = vpop.f32.mrf.mxu0  ;;  %v2879_v23 = vpop.f32.mrf.mxu1 }
0x1014   :  { %v2896_v32 = vadd.f32 %v2888_v57, %v7056_v48  ;;  %v2889_v37 = vrot.slane %v2838_v29, 2  ;;  %v2891_v8 = vrot.slane %v2879_v23, 2  ;;  %v2898_v63 = vadd.f32 %v2890_v26, %v7058_v56  ;;  %v7376_v57 = vld [vmem:[#allocation7 + $0x124] ss:$16 sps:$4 sm:$0xff]   ;;  %v7378_v29 = vld [vmem:[#allocation7 + $0x12c] ss:$16 sps:$4 sm:$0xff]  }
0x1015   :  { %v2840_v47 = vpop.f32.mrf.mxu0  ;;  %v2881_v55 = vpop.f32.mrf.mxu1  ;;  %v7382_v23 = vld [vmem:[#allocation7 + $0x120] ss:$16 sps:$4 sm:$0xff]  }
0x1016   :  { %v5204_v10 = vmul.f32 -1.442695, %v2896_v32  ;;  %v2897_v36 = vadd.f32 %v2889_v37, %v7060_v25  ;;  %v2899_v27 = vadd.f32 %v2891_v8, %v7062_v28  ;;  %v7384_v32 = vld [vmem:[#allocation7 + $0x128] ss:$16 sps:$4 sm:$0xff]   ;;  %v7388_v37 = vld [vmem:[#allocation7 + $0x104] ss:$16 sps:$4 sm:$0xff]  }
0x1017   :  { %v2841_v31 = vpop.f32.mrf.mxu0  ;;  %v2882_v35 = vpop.f32.mrf.mxu1  ;;  %v7390_v47 = vld [vmem:[#allocation7 + $0x10c] ss:$16 sps:$4 sm:$0xff]   ;;  %v7394_v55 = vld [vmem:[#allocation7 + $0x100] ss:$16 sps:$4 sm:$0xff]  }
0x1018   :  { %5987 = vpow2.f32 %v5204_v10  ;;  %v5205_v22 = vmul.f32 -1.442695, %v2897_v36  ;;  %v5206_v4 = vmul.f32 -1.442695, %v2899_v27  ;;  %v7396_v10 = vld [vmem:[#allocation7 + $0x108] ss:$16 sps:$4 sm:$0xff]  }
0x1019   :  { %v5207_v36 = vld [vmem:[%s8054_s6 + $0x4] sm:$0xf] }
0x101a   :  { %5989 = vpow2.f32 %v5205_v22  ;;  %v2970_v27 = vrot.slane %v5207_v36, %v6549_v41  ;;  %v2978_v26 = vrot.slane %v5207_v36, %v6547_v40 }
0x101b   :  { %5991 = vpow2.f32 %v5206_v4 }
0x1025   :  { %v5988_v9 = vpop.eup %5987 }
0x1026   :  { %v2903_v48 = vadd.f32 1.0, %v5988_v9 }
0x1027   :  { %v5990_v21 = vpop.eup %5989 }
0x1028   :  { %5993 = vrcp.f32 %v2903_v48  ;;  %v2909_v52 = vadd.f32 1.0, %v5990_v21  ;;  %v5992_v25 = vpop.eup %5991  ;;  %v8071_v48 = vld [vmem:[#allocation10_spill] sm:$0xff] }
0x1029   :  { %5995 = vtanh.f32 %v2898_v63  ;;  %v2916_v58 = vadd.f32 1.0, %v5992_v25  ;;  %v2974_v63 = vrot.slane %v5207_v36, %v6554_v44  ;;  %v2982_v21 = vrot.slane %v5207_v36, %v8071_v48 }
0x102a   :  { %5997 = vrcp.f32 %v2909_v52 }
0x102b   :  { %5999 = vrcp.f32 %v2916_v58 }
0x1035   :  { %v5994_v34 = vpop.eup %5993 }
0x1036   :  { %v5996_v24 = vpop.eup %5995 }
0x1037   :  { %v5998_v30 = vpop.eup %5997  ;;  %v2923_v28 = vmul.f32 %v5996_v24, %v5994_v34 }
0x1038   :  { %v2922_v33 = vmul.f32 %v5998_v30, %v2920_v61  ;;  %v6000_v56 = vpop.eup %5999 }
0x103a   :  { %v2924_v60 = vadd.f32 %v2923_v28, %v2922_v33 }
0x103c   :  { %6001 = vtanh.f32 %v2924_v60 }
0x1049   :  { %v6002_v51 = vpop.eup %6001 }
0x104a   :  { %v2926_v39 = vmul.f32 %v6002_v51, %v6000_v56 }
0x104c   :  { %2927 = vst [vmem:[#allocation2 + $0x8] sm:$0xc0] %v2926_v39 }
0x1053   :  { %v2929_v53 = vld [vmem:[#allocation2 + $0x8] sm:$0xff] }
0x1054   :  { %v2930_v5 = vpack.c.bf16 %v2929_v53, %v2928_v62 }
0x1056   :  { %3180 = vmatmul.mubr.bf16.vlgmr.msra.gmra.mxu0 %v2930_v5  ;;  %3223 = vmatmul.mubr.bf16.vlgmr.msra.gmra.mxu1 %v2930_v5 }
0x1057   :  { %3427 = vmatpush1.bf16.msra.mxu0 %v7310_v46  ;;  %3468 = vmatpush1.bf16.msra.mxu1 %v7312_v3 }
0x1058   :  { %3428 = vmatprep.subr.bf16.mxu0 %v7314_v38  ;;  %3469 = vmatprep.subr.bf16.mxu1 %v7316_v1 }
0x1059   :  { %3458 = vmatprep.mubr.bf16.mxu0 %v8069_v45  ;;  %3499 = vmatprep.mubr.bf16.mxu1 %v8069_v45 }
0x105b   :  { %3429 = vmatpush1.bf16.msra.mxu0 %v7320_v49  ;;  %3470 = vmatpush1.bf16.msra.mxu1 %v7322_v42 }
0x105c   :  { %3430 = vmatprep.subr.bf16.mxu0 %v7326_v2  ;;  %3471 = vmatprep.subr.bf16.mxu1 %v7328_v43 }
0x105f   :  { %3431 = vmatpush1.bf16.msra.mxu0 %v7334_v54  ;;  %3472 = vmatpush1.bf16.msra.mxu1 %v7336_v50 }
0x1060   :  { %3432 = vmatprep.subr.bf16.mxu0 %v7340_v59  ;;  %3473 = vmatprep.subr.bf16.mxu1 %v7342_v0 }
0x1063   :  { %3433 = vmatpush1.bf16.msra.mxu0 %v7346_v6  ;;  %3474 = vmatpush1.bf16.msra.mxu1 %v7348_v7 }
0x1064   :  { %3434 = vmatprep.subr.bf16.mxu0 %v7352_v11  ;;  %3475 = vmatprep.subr.bf16.mxu1 %v7354_v12 }
0x1067   :  { %3435 = vmatpush1.bf16.msra.mxu0 %v7358_v13  ;;  %3476 = vmatpush1.bf16.msra.mxu1 %v7360_v14 }
0x1068   :  { %3436 = vmatprep.subr.bf16.mxu0 %v7364_v15  ;;  %3477 = vmatprep.subr.bf16.mxu1 %v7366_v16 }
0x106b   :  { %3437 = vmatpush1.bf16.msra.mxu0 %v7370_v19  ;;  %3478 = vmatpush1.bf16.msra.mxu1 %v7372_v20 }
0x106c   :  { %3438 = vmatprep.subr.bf16.mxu0 %v7376_v57  ;;  %3479 = vmatprep.subr.bf16.mxu1 %v7378_v29 }
0x106f   :  { %3439 = vmatpush1.bf16.msra.mxu0 %v7382_v23  ;;  %3480 = vmatpush1.bf16.msra.mxu1 %v7384_v32 }
0x1070   :  { %3440 = vmatprep.subr.bf16.mxu0 %v7388_v37  ;;  %3481 = vmatprep.subr.bf16.mxu1 %v7390_v47 }
0x1073   :  { %3441 = vmatpush1.bf16.msra.mxu0 %v7394_v55  ;;  %3482 = vmatpush1.bf16.msra.mxu1 %v7396_v10 }
0x1074   :  { %3537 = vmatprep.subr.bf16.mxu0 %v7299_v17  ;;  %3578 = vmatprep.subr.bf16.mxu1 %v7301_v18 }
0x1076   :  { %3459 = vmatmul.mubr.bf16.vlgmr.msra.gmra.mxu0 %v8069_v45  ;;  %3500 = vmatmul.mubr.bf16.vlgmr.msra.gmra.mxu1 %v8069_v45 }
0x1077   :  { %3538 = vmatpush1.bf16.msra.mxu0 %v7310_v46  ;;  %3579 = vmatpush1.bf16.msra.mxu1 %v7312_v3 }
0x1078   :  { %3539 = vmatprep.subr.bf16.mxu0 %v7314_v38  ;;  %3580 = vmatprep.subr.bf16.mxu1 %v7316_v1 }
0x1079   :  { %3569 = vmatprep.mubr.bf16.mxu0 %v8069_v45  ;;  %3610 = vmatprep.mubr.bf16.mxu1 %v8069_v45 }
0x107b   :  { %3540 = vmatpush1.bf16.msra.mxu0 %v7320_v49  ;;  %3581 = vmatpush1.bf16.msra.mxu1 %v7322_v42 }
0x107c   :  { %3541 = vmatprep.subr.bf16.mxu0 %v7326_v2  ;;  %3582 = vmatprep.subr.bf16.mxu1 %v7328_v43 }
0x107f   :  { %3542 = vmatpush1.bf16.msra.mxu0 %v7334_v54  ;;  %3583 = vmatpush1.bf16.msra.mxu1 %v7336_v50 }
0x1080   :  { %3543 = vmatprep.subr.bf16.mxu0 %v7340_v59  ;;  %3584 = vmatprep.subr.bf16.mxu1 %v7342_v0 }
0x1083   :  { %3544 = vmatpush1.bf16.msra.mxu0 %v7346_v6  ;;  %3585 = vmatpush1.bf16.msra.mxu1 %v7348_v7 }
0x1084   :  { %3545 = vmatprep.subr.bf16.mxu0 %v7352_v11  ;;  %3586 = vmatprep.subr.bf16.mxu1 %v7354_v12 }
0x1087   :  { %3546 = vmatpush1.bf16.msra.mxu0 %v7358_v13  ;;  %3587 = vmatpush1.bf16.msra.mxu1 %v7360_v14 }
0x1088   :  { %3547 = vmatprep.subr.bf16.mxu0 %v7364_v15  ;;  %3588 = vmatprep.subr.bf16.mxu1 %v7366_v16 }
0x108b   :  { %3548 = vmatpush1.bf16.msra.mxu0 %v7370_v19  ;;  %3589 = vmatpush1.bf16.msra.mxu1 %v7372_v20 }
0x108c   :  { %3549 = vmatprep.subr.bf16.mxu0 %v7376_v57  ;;  %3590 = vmatprep.subr.bf16.mxu1 %v7378_v29 }
0x108f   :  { %3550 = vmatpush1.bf16.msra.mxu0 %v7382_v23  ;;  %3591 = vmatpush1.bf16.msra.mxu1 %v7384_v32 }
0x1090   :  { %3551 = vmatprep.subr.bf16.mxu0 %v7388_v37  ;;  %3592 = vmatprep.subr.bf16.mxu1 %v7390_v47 }
0x1093   :  { %3552 = vmatpush1.bf16.msra.mxu0 %v7394_v55  ;;  %3593 = vmatpush1.bf16.msra.mxu1 %v7396_v10 }
0x1094   :  { %3666 = vmatprep.subr.bf16.mxu0 %v7299_v17  ;;  %3707 = vmatprep.subr.bf16.mxu1 %v7301_v18 }
0x1116   :  { %v3181_v31 = vpop.f32.mrf.mxu0  ;;  %v3224_v35 = vpop.f32.mrf.mxu1 }
0x1117   :  { %v7455_v58 = vadd.f32 %v3181_v31, %v2970_v27 }
0x1118   :  { %v3183_v22 = vpop.f32.mrf.mxu0  ;;  %v3226_v8 = vpop.f32.mrf.mxu1 }
0x1119   :  { %v7457_v60 = vadd.f32 %v3183_v22, %v2974_v63  ;;  %v7461_v31 = vadd.f32 %v3226_v8, %v2982_v21  ;;  %v7464_v22 = vadd.f32 %v3224_v35, %v2978_v26 }
0x111a   :  { %v3185_v4 = vpop.f32.mrf.mxu0  ;;  %v3228_v9 = vpop.f32.mrf.mxu1 }
0x111b   :  { %v7447_v52 = vadd.f32 %v3185_v4, %v2970_v27  ;;  %v7449_v25 = vadd.f32 %v3228_v9, %v2978_v26 }
0x111c   :  { %v3187_v34 = vpop.f32.mrf.mxu0  ;;  %v3230_v24 = vpop.f32.mrf.mxu1 }
0x111d   :  { %v7451_v61 = vadd.f32 %v3187_v34, %v2974_v63  ;;  %v7453_v30 = vadd.f32 %v3230_v24, %v2982_v21 }
0x1136   :  { %v3460_v28 = vpop.f32.mrf.mxu0  ;;  %v3501_v33 = vpop.f32.mrf.mxu1 }
0x1137   :  { %v3508_v56 = vadd.f32 %v3460_v28, %v7455_v58  ;;  %v3510_v24 = vadd.f32 %v3501_v33, %v7464_v22 }
0x1138   :  { %v3462_v51 = vpop.f32.mrf.mxu0  ;;  %v3503_v39 = vpop.f32.mrf.mxu1 }
0x1139   :  { %v5272_v62 = vmul.f32 -1.442695, %v3508_v56  ;;  %v3509_v53 = vadd.f32 %v3462_v51, %v7457_v60  ;;  %v3511_v27 = vadd.f32 %v3503_v39, %v7461_v31 }
0x113a   :  { %v3464_v5 = vpop.f32.mrf.mxu0  ;;  %v3505_v36 = vpop.f32.mrf.mxu1 }
0x113b   :  { %6003 = vpow2.f32 %v5272_v62  ;;  %v5273_v4 = vmul.f32 -1.442695, %v3509_v53  ;;  %v5274_v63 = vmul.f32 -1.442695, %v3511_v27 }
0x113c   :  { %v3465_v9 = vpop.f32.mrf.mxu0  ;;  %v3506_v48 = vpop.f32.mrf.mxu1 }
0x113d   :  { %6005 = vpow2.f32 %v5273_v4 }
0x113e   :  { %6007 = vpow2.f32 %v5274_v63 }
0x1148   :  { %v6004_v34 = vpop.eup %6003 }
0x1149   :  { %v3515_v28 = vadd.f32 1.0, %v6004_v34 }
0x114a   :  { %v6006_v56 = vpop.eup %6005 }
0x114b   :  { %6009 = vrcp.f32 %v3515_v28  ;;  %v3521_v51 = vadd.f32 1.0, %v6006_v56  ;;  %v6008_v62 = vpop.eup %6007 }
0x114c   :  { %6011 = vtanh.f32 %v3510_v24  ;;  %v3528_v21 = vadd.f32 1.0, %v6008_v62 }
0x114d   :  { %6013 = vrcp.f32 %v3521_v51 }
0x114e   :  { %6015 = vrcp.f32 %v3528_v21 }
0x1158   :  { %v6010_v53 = vpop.eup %6009 }
0x1159   :  { %v6012_v5 = vpop.eup %6011 }
0x115a   :  { %v6014_v8 = vpop.eup %6013  ;;  %v3532_v39 = vmul.f32 %v6012_v5, %v6010_v53 }
0x115b   :  { %v3531_v36 = vmul.f32 0.0, %v6014_v8  ;;  %v6016_v26 = vpop.eup %6015 }
0x115d   :  { %v7467_v35 = vadd.f32 %v3532_v39, %v3531_v36 }
0x115f   :  { %6017 = vtanh.f32 %v7467_v35 }
0x116c   :  { %v6018_v33 = vpop.eup %6017 }
0x116d   :  { %v3535_v4 = vmul.f32 %v6018_v33, %v6016_v26 }
0x116f   :  { %v3536_v9 = vpack.c.bf16 %v3535_v4, %v3535_v4 }
0x1171   :  { %3570 = vmatmul.mubr.bf16.vlgmr.msra.gmra.mxu0 %v3536_v9  ;;  %3611 = vmatmul.mubr.bf16.vlgmr.msra.gmra.mxu1 %v3536_v9 }
0x1172   :  { %3667 = vmatpush1.bf16.msra.mxu0 %v7310_v46  ;;  %3708 = vmatpush1.bf16.msra.mxu1 %v7312_v3 }
0x1173   :  { %3668 = vmatprep.subr.bf16.mxu0 %v7314_v38  ;;  %3709 = vmatprep.subr.bf16.mxu1 %v7316_v1 }
0x1174   :  { %3698 = vmatprep.mubr.bf16.mxu0 %v8069_v45  ;;  %3739 = vmatprep.mubr.bf16.mxu1 %v8069_v45 }
0x1176   :  { %3669 = vmatpush1.bf16.msra.mxu0 %v7320_v49  ;;  %3710 = vmatpush1.bf16.msra.mxu1 %v7322_v42 }
0x1177   :  { %3670 = vmatprep.subr.bf16.mxu0 %v7326_v2  ;;  %3711 = vmatprep.subr.bf16.mxu1 %v7328_v43 }
0x117a   :  { %3671 = vmatpush1.bf16.msra.mxu0 %v7334_v54  ;;  %3712 = vmatpush1.bf16.msra.mxu1 %v7336_v50 }
0x117b   :  { %3672 = vmatprep.subr.bf16.mxu0 %v7340_v59  ;;  %3713 = vmatprep.subr.bf16.mxu1 %v7342_v0 }
0x117e   :  { %3673 = vmatpush1.bf16.msra.mxu0 %v7346_v6  ;;  %3714 = vmatpush1.bf16.msra.mxu1 %v7348_v7 }
0x117f   :  { %3674 = vmatprep.subr.bf16.mxu0 %v7352_v11  ;;  %3715 = vmatprep.subr.bf16.mxu1 %v7354_v12 }
0x1182   :  { %3675 = vmatpush1.bf16.msra.mxu0 %v7358_v13  ;;  %3716 = vmatpush1.bf16.msra.mxu1 %v7360_v14 }
0x1183   :  { %3676 = vmatprep.subr.bf16.mxu0 %v7364_v15  ;;  %3717 = vmatprep.subr.bf16.mxu1 %v7366_v16 }
0x1186   :  { %3677 = vmatpush1.bf16.msra.mxu0 %v7370_v19  ;;  %3718 = vmatpush1.bf16.msra.mxu1 %v7372_v20 }
0x1187   :  { %3678 = vmatprep.subr.bf16.mxu0 %v7376_v57  ;;  %3719 = vmatprep.subr.bf16.mxu1 %v7378_v29 }
0x118a   :  { %3679 = vmatpush1.bf16.msra.mxu0 %v7382_v23  ;;  %3720 = vmatpush1.bf16.msra.mxu1 %v7384_v32 }
0x118b   :  { %3680 = vmatprep.subr.bf16.mxu0 %v7388_v37  ;;  %3721 = vmatprep.subr.bf16.mxu1 %v7390_v47 }
0x118e   :  { %3681 = vmatpush1.bf16.msra.mxu0 %v7394_v55  ;;  %3722 = vmatpush1.bf16.msra.mxu1 %v7396_v10 }
0x118f   :  { %3795 = vmatprep.subr.bf16.mxu0 %v7299_v17  ;;  %3836 = vmatprep.subr.bf16.mxu1 %v7301_v18 }
0x1231   :  { %v3571_v48 = vpop.f32.mrf.mxu0  ;;  %v3612_v27 = vpop.f32.mrf.mxu1 }
0x1232   :  { %v3623_v63 = vrot.slane %v3571_v48, 6  ;;  %v3625_v33 = vrot.slane %v3612_v27, 6 }
0x1233   :  { %v3573_v34 = vpop.f32.mrf.mxu0  ;;  %v3614_v24 = vpop.f32.mrf.mxu1 }
0x1234   :  { %v3631_v28 = vadd.f32 %v3623_v63, %v7455_v58  ;;  %v3624_v56 = vrot.slane %v3573_v34, 6  ;;  %v3626_v39 = vrot.slane %v3614_v24, 6  ;;  %v3633_v48 = vadd.f32 %v3625_v33, %v7464_v22 }
0x1235   :  { %v3575_v51 = vpop.f32.mrf.mxu0  ;;  %v3616_v62 = vpop.f32.mrf.mxu1 }
0x1236   :  { %v5275_v53 = vmul.f32 -1.442695, %v3631_v28  ;;  %v3632_v5 = vadd.f32 %v3624_v56, %v7457_v60  ;;  %v3634_v26 = vadd.f32 %v3626_v39, %v7461_v31 }
0x1237   :  { %v3576_v8 = vpop.f32.mrf.mxu0  ;;  %v3617_v21 = vpop.f32.mrf.mxu1 }
0x1238   :  { %6019 = vpow2.f32 %v5275_v53  ;;  %v5276_v36 = vmul.f32 -1.442695, %v3632_v5  ;;  %v5277_v4 = vmul.f32 -1.442695, %v3634_v26  ;;  %v3655_v53 = vrot.slane %v7467_v35, 6 }
0x123a   :  { %6021 = vpow2.f32 %v5276_v36 }
0x123b   :  { %6023 = vpow2.f32 %v5277_v4 }
0x1245   :  { %v6020_v9 = vpop.eup %6019 }
0x1246   :  { %v3638_v63 = vadd.f32 1.0, %v6020_v9 }
0x1247   :  { %v6022_v34 = vpop.eup %6021 }
0x1248   :  { %6025 = vrcp.f32 %v3638_v63  ;;  %v3644_v28 = vadd.f32 1.0, %v6022_v34  ;;  %v6024_v56 = vpop.eup %6023 }
0x1249   :  { %6027 = vtanh.f32 %v3633_v48  ;;  %v3651_v5 = vadd.f32 1.0, %v6024_v56 }
0x124a   :  { %6029 = vrcp.f32 %v3644_v28 }
0x124b   :  { %6031 = vrcp.f32 %v3651_v5 }
0x1255   :  { %v6026_v51 = vpop.eup %6025 }
0x1256   :  { %v6028_v62 = vpop.eup %6027 }
0x1257   :  { %v6030_v24 = vpop.eup %6029  ;;  %v3658_v8 = vmul.f32 %v6028_v62, %v6026_v51 }
0x1258   :  { %v3657_v27 = vmul.f32 %v6030_v24, %v3655_v53  ;;  %v6032_v36 = vpop.eup %6031 }
0x125a   :  { %v7509_v21 = vadd.f32 %v3658_v8, %v3657_v27 }
0x125c   :  { %6033 = vtanh.f32 %v7509_v21 }
0x1269   :  { %v6034_v39 = vpop.eup %6033 }
0x126a   :  { %v3661_v26 = vmul.f32 %v6034_v39, %v6032_v36 }
0x126c   :  { %v3662_v33 = vpack.c.bf16 %v3661_v26, %v3661_v26 }
0x126e   :  { %v3664_v4 = vrot.slane %v3662_v33, 1 }
0x1270   :  { %3699 = vmatmul.mubr.bf16.vlgmr.msra.gmra.mxu0 %v3664_v4  ;;  %3740 = vmatmul.mubr.bf16.vlgmr.msra.gmra.mxu1 %v3664_v4 }
0x1271   :  { %3796 = vmatpush1.bf16.msra.mxu0 %v7310_v46  ;;  %3837 = vmatpush1.bf16.msra.mxu1 %v7312_v3 }
0x1272   :  { %3797 = vmatprep.subr.bf16.mxu0 %v7314_v38  ;;  %3838 = vmatprep.subr.bf16.mxu1 %v7316_v1 }
0x1273   :  { %3827 = vmatprep.mubr.bf16.mxu0 %v8069_v45  ;;  %3868 = vmatprep.mubr.bf16.mxu1 %v8069_v45 }
0x1275   :  { %3798 = vmatpush1.bf16.msra.mxu0 %v7320_v49  ;;  %3839 = vmatpush1.bf16.msra.mxu1 %v7322_v42 }
0x1276   :  { %3799 = vmatprep.subr.bf16.mxu0 %v7326_v2  ;;  %3840 = vmatprep.subr.bf16.mxu1 %v7328_v43 }
0x1279   :  { %3800 = vmatpush1.bf16.msra.mxu0 %v7334_v54  ;;  %3841 = vmatpush1.bf16.msra.mxu1 %v7336_v50 }
0x127a   :  { %3801 = vmatprep.subr.bf16.mxu0 %v7340_v59  ;;  %3842 = vmatprep.subr.bf16.mxu1 %v7342_v0 }
0x127d   :  { %3802 = vmatpush1.bf16.msra.mxu0 %v7346_v6  ;;  %3843 = vmatpush1.bf16.msra.mxu1 %v7348_v7 }
0x127e   :  { %3803 = vmatprep.subr.bf16.mxu0 %v7352_v11  ;;  %3844 = vmatprep.subr.bf16.mxu1 %v7354_v12 }
0x1281   :  { %3804 = vmatpush1.bf16.msra.mxu0 %v7358_v13  ;;  %3845 = vmatpush1.bf16.msra.mxu1 %v7360_v14 }
0x1282   :  { %3805 = vmatprep.subr.bf16.mxu0 %v7364_v15  ;;  %3846 = vmatprep.subr.bf16.mxu1 %v7366_v16 }
0x1285   :  { %3806 = vmatpush1.bf16.msra.mxu0 %v7370_v19  ;;  %3847 = vmatpush1.bf16.msra.mxu1 %v7372_v20 }
0x1286   :  { %3807 = vmatprep.subr.bf16.mxu0 %v7376_v57  ;;  %3848 = vmatprep.subr.bf16.mxu1 %v7378_v29 }
0x1289   :  { %3808 = vmatpush1.bf16.msra.mxu0 %v7382_v23  ;;  %3849 = vmatpush1.bf16.msra.mxu1 %v7384_v32 }
0x128a   :  { %3809 = vmatprep.subr.bf16.mxu0 %v7388_v37  ;;  %3850 = vmatprep.subr.bf16.mxu1 %v7390_v47 }
0x128d   :  { %3810 = vmatpush1.bf16.msra.mxu0 %v7394_v55  ;;  %3851 = vmatpush1.bf16.msra.mxu1 %v7396_v10 }
0x128e   :  { %3924 = vmatprep.subr.bf16.mxu0 %v7299_v17  ;;  %3965 = vmatprep.subr.bf16.mxu1 %v7301_v18 }
0x1330   :  { %v3700_v35 = vpop.f32.mrf.mxu0  ;;  %v3741_v9 = vpop.f32.mrf.mxu1 }
0x1331   :  { %v3752_v48 = vrot.slane %v3700_v35, 4  ;;  %v3754_v26 = vrot.slane %v3741_v9, 4 }
0x1332   :  { %v3702_v63 = vpop.f32.mrf.mxu0  ;;  %v3743_v34 = vpop.f32.mrf.mxu1 }
0x1333   :  { %v3760_v28 = vadd.f32 %v3752_v48, %v7455_v58  ;;  %v3753_v56 = vrot.slane %v3702_v63, 4  ;;  %v3755_v36 = vrot.slane %v3743_v34, 4  ;;  %v3762_v35 = vadd.f32 %v3754_v26, %v7464_v22 }
0x1334   :  { %v3704_v51 = vpop.f32.mrf.mxu0  ;;  %v3745_v62 = vpop.f32.mrf.mxu1 }
0x1335   :  { %v5278_v53 = vmul.f32 -1.442695, %v3760_v28  ;;  %v3761_v24 = vadd.f32 %v3753_v56, %v7457_v60  ;;  %v3763_v39 = vadd.f32 %v3755_v36, %v7461_v31 }
0x1336   :  { %v3705_v5 = vpop.f32.mrf.mxu0  ;;  %v3746_v8 = vpop.f32.mrf.mxu1 }
0x1337   :  { %6035 = vpow2.f32 %v5278_v53  ;;  %v5279_v27 = vmul.f32 -1.442695, %v3761_v24  ;;  %v5280_v33 = vmul.f32 -1.442695, %v3763_v39  ;;  %v3784_v53 = vrot.slane %v7509_v21, 6 }
0x1339   :  { %6037 = vpow2.f32 %v5279_v27 }
0x133a   :  { %6039 = vpow2.f32 %v5280_v33 }
0x1344   :  { %v6036_v4 = vpop.eup %6035 }
0x1345   :  { %v3767_v48 = vadd.f32 1.0, %v6036_v4 }
0x1346   :  { %v6038_v63 = vpop.eup %6037 }
0x1347   :  { %6041 = vrcp.f32 %v3767_v48  ;;  %v3773_v28 = vadd.f32 1.0, %v6038_v63  ;;  %v6040_v56 = vpop.eup %6039 }
0x1348   :  { %6043 = vtanh.f32 %v3762_v35  ;;  %v3780_v24 = vadd.f32 1.0, %v6040_v56 }
0x1349   :  { %6045 = vrcp.f32 %v3773_v28 }
0x134a   :  { %6047 = vrcp.f32 %v3780_v24 }
0x1354   :  { %v6042_v51 = vpop.eup %6041 }
0x1355   :  { %v6044_v62 = vpop.eup %6043 }
0x1356   :  { %v6046_v34 = vpop.eup %6045  ;;  %v3787_v5 = vmul.f32 %v6044_v62, %v6042_v51 }
0x1357   :  { %v3786_v9 = vmul.f32 %v6046_v34, %v3784_v53  ;;  %v6048_v27 = vpop.eup %6047 }
0x1359   :  { %v7551_v8 = vadd.f32 %v3787_v5, %v3786_v9 }
0x135b   :  { %6049 = vtanh.f32 %v7551_v8 }
0x1368   :  { %v6050_v36 = vpop.eup %6049 }
0x1369   :  { %v3790_v39 = vmul.f32 %v6050_v36, %v6048_v27 }
0x136b   :  { %v3791_v26 = vpack.c.bf16 %v3790_v39, %v3790_v39 }
0x136d   :  { %v3793_v33 = vrot.slane %v3791_v26, 2 }
0x136f   :  { %3828 = vmatmul.mubr.bf16.vlgmr.msra.gmra.mxu0 %v3793_v33  ;;  %3869 = vmatmul.mubr.bf16.vlgmr.msra.gmra.mxu1 %v3793_v33 }
0x1370   :  { %3925 = vmatpush1.bf16.msra.mxu0 %v7310_v46  ;;  %3966 = vmatpush1.bf16.msra.mxu1 %v7312_v3 }
0x1371   :  { %3926 = vmatprep.subr.bf16.mxu0 %v7314_v38  ;;  %3967 = vmatprep.subr.bf16.mxu1 %v7316_v1 }
0x1372   :  { %3956 = vmatprep.mubr.bf16.mxu0 %v8069_v45  ;;  %3997 = vmatprep.mubr.bf16.mxu1 %v8069_v45 }
0x1374   :  { %3927 = vmatpush1.bf16.msra.mxu0 %v7320_v49  ;;  %3968 = vmatpush1.bf16.msra.mxu1 %v7322_v42 }
0x1375   :  { %3928 = vmatprep.subr.bf16.mxu0 %v7326_v2  ;;  %3969 = vmatprep.subr.bf16.mxu1 %v7328_v43 }
0x1378   :  { %3929 = vmatpush1.bf16.msra.mxu0 %v7334_v54  ;;  %3970 = vmatpush1.bf16.msra.mxu1 %v7336_v50 }
0x1379   :  { %3930 = vmatprep.subr.bf16.mxu0 %v7340_v59  ;;  %3971 = vmatprep.subr.bf16.mxu1 %v7342_v0 }
0x137c   :  { %3931 = vmatpush1.bf16.msra.mxu0 %v7346_v6  ;;  %3972 = vmatpush1.bf16.msra.mxu1 %v7348_v7 }
0x137d   :  { %3932 = vmatprep.subr.bf16.mxu0 %v7352_v11  ;;  %3973 = vmatprep.subr.bf16.mxu1 %v7354_v12 }
0x1380   :  { %3933 = vmatpush1.bf16.msra.mxu0 %v7358_v13  ;;  %3974 = vmatpush1.bf16.msra.mxu1 %v7360_v14 }
0x1381   :  { %3934 = vmatprep.subr.bf16.mxu0 %v7364_v15  ;;  %3975 = vmatprep.subr.bf16.mxu1 %v7366_v16 }
0x1384   :  { %3935 = vmatpush1.bf16.msra.mxu0 %v7370_v19  ;;  %3976 = vmatpush1.bf16.msra.mxu1 %v7372_v20 }
0x1385   :  { %3936 = vmatprep.subr.bf16.mxu0 %v7376_v57  ;;  %3977 = vmatprep.subr.bf16.mxu1 %v7378_v29 }
0x1388   :  { %3937 = vmatpush1.bf16.msra.mxu0 %v7382_v23  ;;  %3978 = vmatpush1.bf16.msra.mxu1 %v7384_v32 }
0x1389   :  { %3938 = vmatprep.subr.bf16.mxu0 %v7388_v37  ;;  %3979 = vmatprep.subr.bf16.mxu1 %v7390_v47 }
0x138c   :  { %3939 = vmatpush1.bf16.msra.mxu0 %v7394_v55  ;;  %3980 = vmatpush1.bf16.msra.mxu1 %v7396_v10 }
0x138d   :  { %4038 = vmatprep.subr.bf16.mxu0 %v7299_v17  ;;  %4079 = vmatprep.subr.bf16.mxu1 %v7301_v18 }
0x142f   :  { %v3829_v21 = vpop.f32.mrf.mxu0  ;;  %v3870_v4 = vpop.f32.mrf.mxu1 }
0x1430   :  { %v3881_v35 = vrot.slane %v3829_v21, 2  ;;  %v3883_v39 = vrot.slane %v3870_v4, 2 }
0x1431   :  { %v3831_v48 = vpop.f32.mrf.mxu0  ;;  %v3872_v63 = vpop.f32.mrf.mxu1 }
0x1432   :  { %v3889_v28 = vadd.f32 %v3881_v35, %v7455_v58  ;;  %v3882_v56 = vrot.slane %v3831_v48, 2  ;;  %v3884_v27 = vrot.slane %v3872_v63, 2  ;;  %v3891_v21 = vadd.f32 %v3883_v39, %v7464_v22 }
0x1433   :  { %v3833_v51 = vpop.f32.mrf.mxu0  ;;  %v3874_v62 = vpop.f32.mrf.mxu1 }
0x1434   :  { %v5281_v53 = vmul.f32 -1.442695, %v3889_v28  ;;  %v3890_v34 = vadd.f32 %v3882_v56, %v7457_v60  ;;  %v3892_v36 = vadd.f32 %v3884_v27, %v7461_v31  ;;  %v3913_v51 = vrot.slane %v7551_v8, 6 }
0x1435   :  { %v3834_v24 = vpop.f32.mrf.mxu0  ;;  %v3875_v5 = vpop.f32.mrf.mxu1 }
0x1436   :  { %6051 = vpow2.f32 %v5281_v53  ;;  %v5282_v9 = vmul.f32 -1.442695, %v3890_v34  ;;  %v5283_v26 = vmul.f32 -1.442695, %v3892_v36 }
0x1438   :  { %6053 = vpow2.f32 %v5282_v9 }
0x1439   :  { %6055 = vpow2.f32 %v5283_v26 }
0x1443   :  { %v6052_v33 = vpop.eup %6051 }
0x1444   :  { %v3896_v58 = vadd.f32 1.0, %v6052_v33 }
0x1445   :  { %v6054_v35 = vpop.eup %6053 }
0x1446   :  { %6057 = vrcp.f32 %v3896_v58  ;;  %v3902_v48 = vadd.f32 1.0, %v6054_v35  ;;  %v6056_v60 = vpop.eup %6055 }
0x1447   :  { %6059 = vtanh.f32 %v3891_v21  ;;  %v3909_v62 = vadd.f32 1.0, %v6056_v60 }
0x1448   :  { %6061 = vrcp.f32 %v3902_v48 }
0x1449   :  { %6063 = vrcp.f32 %v3909_v62 }
0x1453   :  { %v6058_v28 = vpop.eup %6057 }
0x1454   :  { %v6060_v56 = vpop.eup %6059 }
0x1455   :  { %v6062_v63 = vpop.eup %6061  ;;  %v3916_v31 = vmul.f32 %v6060_v56, %v6058_v28 }
0x1456   :  { %v3915_v4 = vmul.f32 %v6062_v63, %v3913_v51  ;;  %v6064_v22 = vpop.eup %6063 }
0x1458   :  { %v7593_v53 = vadd.f32 %v3916_v31, %v3915_v4 }
0x145a   :  { %6065 = vtanh.f32 %v7593_v53 }
0x1467   :  { %v6066_v34 = vpop.eup %6065 }
0x1468   :  { %v3919_v24 = vmul.f32 %v6066_v34, %v6064_v22 }
0x146a   :  { %v3920_v5 = vpack.c.bf16 %v3919_v24, %v3919_v24  ;;  %v4030_v24 = vrot.slane %v7593_v53, 6 }
0x146c   :  { %v3922_v9 = vrot.slane %v3920_v5, 3 }
0x146e   :  { %3957 = vmatmul.mubr.bf16.vlgmr.msra.gmra.mxu0 %v3922_v9  ;;  %3998 = vmatmul.mubr.bf16.vlgmr.msra.gmra.mxu1 %v3922_v9 }
0x146f   :  { %4039 = vmatpush1.bf16.msra.mxu0 %v7310_v46  ;;  %4080 = vmatpush1.bf16.msra.mxu1 %v7312_v3 }
0x1470   :  { %4040 = vmatprep.subr.bf16.mxu0 %v7314_v38  ;;  %4081 = vmatprep.subr.bf16.mxu1 %v7316_v1 }
0x1471   :  { %4070 = vmatprep.mubr.bf16.mxu0 %v8069_v45  ;;  %4111 = vmatprep.mubr.bf16.mxu1 %v8069_v45 }
0x1473   :  { %4041 = vmatpush1.bf16.msra.mxu0 %v7320_v49  ;;  %4082 = vmatpush1.bf16.msra.mxu1 %v7322_v42 }
0x1474   :  { %4042 = vmatprep.subr.bf16.mxu0 %v7326_v2  ;;  %4083 = vmatprep.subr.bf16.mxu1 %v7328_v43 }
0x1477   :  { %4043 = vmatpush1.bf16.msra.mxu0 %v7334_v54  ;;  %4084 = vmatpush1.bf16.msra.mxu1 %v7336_v50 }
0x1478   :  { %4044 = vmatprep.subr.bf16.mxu0 %v7340_v59  ;;  %4085 = vmatprep.subr.bf16.mxu1 %v7342_v0 }
0x147b   :  { %4045 = vmatpush1.bf16.msra.mxu0 %v7346_v6  ;;  %4086 = vmatpush1.bf16.msra.mxu1 %v7348_v7 }
0x147c   :  { %4046 = vmatprep.subr.bf16.mxu0 %v7352_v11  ;;  %4087 = vmatprep.subr.bf16.mxu1 %v7354_v12 }
0x147f   :  { %4047 = vmatpush1.bf16.msra.mxu0 %v7358_v13  ;;  %4088 = vmatpush1.bf16.msra.mxu1 %v7360_v14 }
0x1480   :  { %4048 = vmatprep.subr.bf16.mxu0 %v7364_v15  ;;  %4089 = vmatprep.subr.bf16.mxu1 %v7366_v16 }
0x1483   :  { %4049 = vmatpush1.bf16.msra.mxu0 %v7370_v19  ;;  %4090 = vmatpush1.bf16.msra.mxu1 %v7372_v20 }
0x1484   :  { %4050 = vmatprep.subr.bf16.mxu0 %v7376_v57  ;;  %4091 = vmatprep.subr.bf16.mxu1 %v7378_v29 }
0x1487   :  { %4051 = vmatpush1.bf16.msra.mxu0 %v7382_v23  ;;  %4092 = vmatpush1.bf16.msra.mxu1 %v7384_v32 }
0x1488   :  { %4052 = vmatprep.subr.bf16.mxu0 %v7388_v37  ;;  %4093 = vmatprep.subr.bf16.mxu1 %v7390_v47 }
0x148b   :  { %4053 = vmatpush1.bf16.msra.mxu0 %v7394_v55  ;;  %4094 = vmatpush1.bf16.msra.mxu1 %v7396_v10 }
0x148c   :  { %4167 = vmatprep.subr.bf16.mxu0 %v7299_v17  ;;  %4208 = vmatprep.subr.bf16.mxu1 %v7301_v18 }
0x152e   :  { %v3958_v8 = vpop.f32.mrf.mxu0  ;;  %v3999_v27 = vpop.f32.mrf.mxu1 }
0x152f   :  { %v4006_v36 = vadd.f32 %v3958_v8, %v7447_v52  ;;  %v4008_v51 = vadd.f32 %v3999_v27, %v7449_v25 }
0x1530   :  { %v3960_v39 = vpop.f32.mrf.mxu0  ;;  %v4001_v26 = vpop.f32.mrf.mxu1 }
0x1531   :  { %v5284_v33 = vmul.f32 -1.442695, %v4006_v36  ;;  %v4007_v21 = vadd.f32 %v3960_v39, %v7451_v61  ;;  %v4009_v17 = vadd.f32 %v4001_v26, %v7453_v30 }
0x1532   :  { %v3962_v58 = vpop.f32.mrf.mxu0  ;;  %v4003_v35 = vpop.f32.mrf.mxu1 }
0x1533   :  { %6067 = vpow2.f32 %v5284_v33  ;;  %v5285_v48 = vmul.f32 -1.442695, %v4007_v21  ;;  %v5286_v56 = vmul.f32 -1.442695, %v4009_v17 }
0x1534   :  { %v3963_v60 = vpop.f32.mrf.mxu0  ;;  %v4004_v28 = vpop.f32.mrf.mxu1 }
0x1535   :  { %6069 = vpow2.f32 %v5285_v48 }
0x1536   :  { %6071 = vpow2.f32 %v5286_v56 }
0x1540   :  { %v6068_v18 = vpop.eup %6067 }
0x1541   :  { %v4013_v63 = vadd.f32 1.0, %v6068_v18 }
0x1542   :  { %v6070_v62 = vpop.eup %6069 }
0x1543   :  { %6073 = vrcp.f32 %v4013_v63  ;;  %v4019_v31 = vadd.f32 1.0, %v6070_v62  ;;  %v6072_v4 = vpop.eup %6071  ;;  %v6202_v63 = vld [vmem:[#allocation7 + $0x1e8] ss:$16 sps:$4 sm:$0xff]   ;;  %v6203_v62 = vld [vmem:[#allocation7 + $0x1c4] ss:$16 sps:$4 sm:$0xff]  }
0x1544   :  { %6075 = vtanh.f32 %v4008_v51  ;;  %v4026_v9 = vadd.f32 1.0, %v6072_v4  ;;  %v6201_v51 = vld [vmem:[#allocation7 + $0x1e0] ss:$16 sps:$4 sm:$0xff]  }
0x1545   :  { %6077 = vrcp.f32 %v4019_v31  ;;  %v6204_v31 = vld [vmem:[#allocation7 + $0x1cc] ss:$16 sps:$4 sm:$0xff]   ;;  %v6205_v4 = vld [vmem:[#allocation7 + $0x1c0] ss:$16 sps:$4 sm:$0xff]  }
0x1546   :  { %6079 = vrcp.f32 %v4026_v9  ;;  %v6210_v9 = vld [vmem:[#allocation7 + $0x1a8] ss:$16 sps:$4 sm:$0xff]  }
0x1550   :  { %v6074_v22 = vpop.eup %6073 }
0x1551   :  { %v6076_v34 = vpop.eup %6075 }
0x1552   :  { %v6078_v5 = vpop.eup %6077  ;;  %v4033_v8 = vmul.f32 %v6076_v34, %v6074_v22  ;;  %v6206_v22 = vld [vmem:[#allocation7 + $0x1c8] ss:$16 sps:$4 sm:$0xff]   ;;  %v6207_v34 = vld [vmem:[#allocation7 + $0x1a4] ss:$16 sps:$4 sm:$0xff]  }
0x1553   :  { %v4032_v36 = vmul.f32 %v6078_v5, %v4030_v24  ;;  %v6080_v27 = vpop.eup %6079  ;;  %v6208_v24 = vld [vmem:[#allocation7 + $0x1ac] ss:$16 sps:$4 sm:$0xff]   ;;  %v6209_v5 = vld [vmem:[#allocation7 + $0x1a0] ss:$16 sps:$4 sm:$0xff]  }
0x1555   :  { %v7635_v39 = vadd.f32 %v4033_v8, %v4032_v36  ;;  %v6211_v8 = vld [vmem:[#allocation7 + $0x184] ss:$16 sps:$4 sm:$0xff]   ;;  %v6212_v36 = vld [vmem:[#allocation7 + $0x18c] ss:$16 sps:$4 sm:$0xff]  }
0x1557   :  { %6081 = vtanh.f32 %v7635_v39 }
0x1564   :  { %v6082_v26 = vpop.eup %6081 }
0x1565   :  { %v4036_v33 = vmul.f32 %v6082_v26, %v6080_v27  ;;  %v6214_v27 = vld [vmem:[#allocation7 + $0x188] ss:$16 sps:$4 sm:$0xff]   ;;  %v6216_v26 = vld [vmem:[#allocation7 + $0x16c] ss:$16 sps:$4 sm:$0xff]  }
0x1567   :  { %v4037_v21 = vpack.c.bf16 %v4036_v33, %v4036_v33  ;;  %v6217_v33 = vld [vmem:[#allocation7 + $0x160] ss:$16 sps:$4 sm:$0xff]  }
0x1569   :  { %4071 = vmatmul.mubr.bf16.vlgmr.msra.gmra.mxu0 %v4037_v21  ;;  %4112 = vmatmul.mubr.bf16.vlgmr.msra.gmra.mxu1 %v4037_v21  ;;  %v6218_v21 = vld [vmem:[#allocation7 + $0x168] ss:$16 sps:$4 sm:$0xff]  }
0x156a   :  { %4168 = vmatpush1.bf16.msra.mxu0 %v7310_v46  ;;  %4209 = vmatpush1.bf16.msra.mxu1 %v7312_v3  ;;  %v6199_v46 = vld [vmem:[#allocation7 + $0x1e4] ss:$16 sps:$4 sm:$0xff]   ;;  %v6200_v3 = vld [vmem:[#allocation7 + $0x1ec] ss:$16 sps:$4 sm:$0xff]  }
0x156b   :  { %4169 = vmatprep.subr.bf16.mxu0 %v7314_v38  ;;  %4210 = vmatprep.subr.bf16.mxu1 %v7316_v1 }
0x156c   :  { %4199 = vmatprep.mubr.bf16.mxu0 %v8069_v45  ;;  %4240 = vmatprep.mubr.bf16.mxu1 %v8069_v45 }
0x156e   :  { %4170 = vmatpush1.bf16.msra.mxu0 %v7320_v49  ;;  %4211 = vmatpush1.bf16.msra.mxu1 %v7322_v42 }
0x156f   :  { %4171 = vmatprep.subr.bf16.mxu0 %v7326_v2  ;;  %4212 = vmatprep.subr.bf16.mxu1 %v7328_v43 }
0x1572   :  { %4172 = vmatpush1.bf16.msra.mxu0 %v7334_v54  ;;  %4213 = vmatpush1.bf16.msra.mxu1 %v7336_v50 }
0x1573   :  { %4173 = vmatprep.subr.bf16.mxu0 %v7340_v59  ;;  %4214 = vmatprep.subr.bf16.mxu1 %v7342_v0 }
0x1576   :  { %4174 = vmatpush1.bf16.msra.mxu0 %v7346_v6  ;;  %4215 = vmatpush1.bf16.msra.mxu1 %v7348_v7 }
0x1577   :  { %4175 = vmatprep.subr.bf16.mxu0 %v7352_v11  ;;  %4216 = vmatprep.subr.bf16.mxu1 %v7354_v12 }
0x157a   :  { %4176 = vmatpush1.bf16.msra.mxu0 %v7358_v13  ;;  %4217 = vmatpush1.bf16.msra.mxu1 %v7360_v14 }
0x157b   :  { %4177 = vmatprep.subr.bf16.mxu0 %v7364_v15  ;;  %4218 = vmatprep.subr.bf16.mxu1 %v7366_v16 }
0x157e   :  { %4178 = vmatpush1.bf16.msra.mxu0 %v7370_v19  ;;  %4219 = vmatpush1.bf16.msra.mxu1 %v7372_v20 }
0x157f   :  { %4179 = vmatprep.subr.bf16.mxu0 %v7376_v57  ;;  %4220 = vmatprep.subr.bf16.mxu1 %v7378_v29 }
0x1582   :  { %4180 = vmatpush1.bf16.msra.mxu0 %v7382_v23  ;;  %4221 = vmatpush1.bf16.msra.mxu1 %v7384_v32 }
0x1583   :  { %4181 = vmatprep.subr.bf16.mxu0 %v7388_v37  ;;  %4222 = vmatprep.subr.bf16.mxu1 %v7390_v47 }
0x1586   :  { %4182 = vmatpush1.bf16.msra.mxu0 %v7394_v55  ;;  %4223 = vmatpush1.bf16.msra.mxu1 %v7396_v10  ;;  %v4156_v55 = vrot.slane %v7635_v39, 6  ;;  %v6213_v39 = vld [vmem:[#allocation7 + $0x180] ss:$16 sps:$4 sm:$0xff]  }
0x1587   :  { %4296 = vmatprep.subr.bf16.mxu0 %v6199_v46  ;;  %4337 = vmatprep.subr.bf16.mxu1 %v6200_v3  ;;  %v6219_v46 = vld [vmem:[#allocation7 + $0x144] ss:$16 sps:$4 sm:$0xff]   ;;  %v6220_v3 = vld [vmem:[#allocation7 + $0x14c] ss:$16 sps:$4 sm:$0xff]  }
0x1629   :  { %v4072_v38 = vpop.f32.mrf.mxu0  ;;  %v4113_v1 = vpop.f32.mrf.mxu1 }
0x162a   :  { %v4124_v49 = vrot.slane %v4072_v38, 6  ;;  %v4126_v15 = vrot.slane %v4113_v1, 6  ;;  %v6221_v38 = vld [vmem:[#allocation7 + $0x140] ss:$16 sps:$4 sm:$0xff]   ;;  %v6222_v1 = vld [vmem:[#allocation7 + $0x148] ss:$16 sps:$4 sm:$0xff]  }
0x162b   :  { %v4074_v42 = vpop.f32.mrf.mxu0  ;;  %v4115_v2 = vpop.f32.mrf.mxu1 }
0x162c   :  { %v4132_v43 = vadd.f32 %v4124_v49, %v7447_v52  ;;  %v4125_v54 = vrot.slane %v4074_v42, 6  ;;  %v4127_v13 = vrot.slane %v4115_v2, 6  ;;  %v4134_v20 = vadd.f32 %v4126_v15, %v7449_v25  ;;  %v6223_v49 = vld [vmem:[#allocation7 + $0x124] ss:$16 sps:$4 sm:$0xff]   ;;  %v6224_v42 = vld [vmem:[#allocation7 + $0x12c] ss:$16 sps:$4 sm:$0xff]  }
0x162d   :  { %v4076_v50 = vpop.f32.mrf.mxu0  ;;  %v4117_v59 = vpop.f32.mrf.mxu1  ;;  %v6225_v2 = vld [vmem:[#allocation7 + $0x120] ss:$16 sps:$4 sm:$0xff]  }
0x162e   :  { %v5287_v0 = vmul.f32 -1.442695, %v4132_v43  ;;  %v4133_v6 = vadd.f32 %v4125_v54, %v7451_v61  ;;  %v4135_v14 = vadd.f32 %v4127_v13, %v7453_v30  ;;  %v6226_v43 = vld [vmem:[#allocation7 + $0x128] ss:$16 sps:$4 sm:$0xff]   ;;  %v6227_v54 = vld [vmem:[#allocation7 + $0x104] ss:$16 sps:$4 sm:$0xff]  }
0x162f   :  { %v4077_v7 = vpop.f32.mrf.mxu0  ;;  %v4118_v11 = vpop.f32.mrf.mxu1  ;;  %v6228_v50 = vld [vmem:[#allocation7 + $0x10c] ss:$16 sps:$4 sm:$0xff]   ;;  %v6229_v59 = vld [vmem:[#allocation7 + $0x100] ss:$16 sps:$4 sm:$0xff]  }
0x1630   :  { %6083 = vpow2.f32 %v5287_v0  ;;  %v5288_v12 = vmul.f32 -1.442695, %v4133_v6  ;;  %v5289_v16 = vmul.f32 -1.442695, %v4135_v14  ;;  %v6230_v0 = vld [vmem:[#allocation7 + $0x108] ss:$16 sps:$4 sm:$0xff]  }
0x1632   :  { %6085 = vpow2.f32 %v5288_v12 }
0x1633   :  { %6087 = vpow2.f32 %v5289_v16 }
0x163d   :  { %v6084_v19 = vpop.eup %6083 }
0x163e   :  { %v4139_v57 = vadd.f32 1.0, %v6084_v19 }
0x163f   :  { %v6086_v29 = vpop.eup %6085 }
0x1640   :  { %6089 = vrcp.f32 %v4139_v57  ;;  %v4145_v23 = vadd.f32 1.0, %v6086_v29  ;;  %v6088_v32 = vpop.eup %6087 }
0x1641   :  { %6091 = vtanh.f32 %v4134_v20  ;;  %v4152_v53 = vadd.f32 1.0, %v6088_v32 }
0x1642   :  { %6093 = vrcp.f32 %v4145_v23 }
0x1643   :  { %6095 = vrcp.f32 %v4152_v53 }
0x164d   :  { %v6090_v37 = vpop.eup %6089 }
0x164e   :  { %v6092_v47 = vpop.eup %6091 }
0x164f   :  { %v6094_v10 = vpop.eup %6093  ;;  %v4159_v58 = vmul.f32 %v6092_v47, %v6090_v37 }
0x1650   :  { %v4158_v35 = vmul.f32 %v6094_v10, %v4156_v55  ;;  %v6096_v60 = vpop.eup %6095 }
0x1652   :  { %v7675_v48 = vadd.f32 %v4159_v58, %v4158_v35 }
0x1654   :  { %6097 = vtanh.f32 %v7675_v48 }
0x1661   :  { %v6098_v28 = vpop.eup %6097 }
0x1662   :  { %v4162_v17 = vmul.f32 %v6098_v28, %v6096_v60 }
0x1664   :  { %v4163_v56 = vpack.c.bf16 %v4162_v17, %v4162_v17 }
0x1666   :  { %v4165_v18 = vrot.slane %v4163_v56, 1 }
0x1668   :  { %4200 = vmatmul.mubr.bf16.vlgmr.msra.gmra.mxu0 %v4165_v18  ;;  %4241 = vmatmul.mubr.bf16.vlgmr.msra.gmra.mxu1 %v4165_v18 }
0x1669   :  { %4297 = vmatpush1.bf16.msra.mxu0 %v6201_v51  ;;  %4338 = vmatpush1.bf16.msra.mxu1 %v6202_v63  ;;  %v4285_v51 = vrot.slane %v7675_v48, 6  ;;  %v4467_v48 = vld [vmem:[%s8055_s7 + $0x170] sm:$0xff] }
0x166a   :  { %4298 = vmatprep.subr.bf16.mxu0 %v6203_v62  ;;  %4339 = vmatprep.subr.bf16.mxu1 %v6204_v31 }
0x166b   :  { %4328 = vmatprep.mubr.bf16.mxu0 %v8069_v45  ;;  %4369 = vmatprep.mubr.bf16.mxu1 %v8069_v45  ;;  %v6215_v45 = vld [vmem:[#allocation7 + $0x164] ss:$16 sps:$4 sm:$0xff]  }
0x166d   :  { %4299 = vmatpush1.bf16.msra.mxu0 %v6205_v4  ;;  %4340 = vmatpush1.bf16.msra.mxu1 %v6206_v22 }
0x166e   :  { %4300 = vmatprep.subr.bf16.mxu0 %v6207_v34  ;;  %4341 = vmatprep.subr.bf16.mxu1 %v6208_v24 }
0x1671   :  { %4301 = vmatpush1.bf16.msra.mxu0 %v6209_v5  ;;  %4342 = vmatpush1.bf16.msra.mxu1 %v6210_v9 }
0x1672   :  { %4302 = vmatprep.subr.bf16.mxu0 %v6211_v8  ;;  %4343 = vmatprep.subr.bf16.mxu1 %v6212_v36  ;;  %v6301_v36 = vmov 0.0  }
0x1675   :  { %4303 = vmatpush1.bf16.msra.mxu0 %v6213_v39  ;;  %4344 = vmatpush1.bf16.msra.mxu1 %v6214_v27  ;;  %v4466_v39 = vld [vmem:[%s8055_s7 + $0x168] sm:$0xff]  ;;  %v4468_v27 = vld [vmem:[%s8055_s7 + $0x178] sm:$0xff] }
0x1676   :  { %4304 = vmatprep.subr.bf16.mxu0 %v6215_v45  ;;  %4345 = vmatprep.subr.bf16.mxu1 %v6216_v26  ;;  %v4464_v45 = vld [vmem:[%s8055_s7 + $0x158] sm:$0xff]  ;;  %v4463_v26 = vld [vmem:[%s8055_s7 + $0x150] sm:$0xff] }
0x1679   :  { %4305 = vmatpush1.bf16.msra.mxu0 %v6217_v33  ;;  %4346 = vmatpush1.bf16.msra.mxu1 %v6218_v21  ;;  %v4465_v33 = vld [vmem:[%s8055_s7 + $0x160] sm:$0xff] }
0x167a   :  { %4306 = vmatprep.subr.bf16.mxu0 %v6219_v46  ;;  %4347 = vmatprep.subr.bf16.mxu1 %v6220_v3  ;;  %v4461_v21 = vld [vmem:[%s8055_s7 + $0x140] sm:$0xff]  ;;  %v4460_v46 = vld [vmem:[%s8055_s7 + $0x138] sm:$0xff]  ;;  %v4462_v3 = vld [vmem:[%s8055_s7 + $0x148] sm:$0xff] }
0x167d   :  { %4307 = vmatpush1.bf16.msra.mxu0 %v6221_v38  ;;  %4348 = vmatpush1.bf16.msra.mxu1 %v6222_v1  ;;  %v4458_v38 = vld [vmem:[%s8055_s7 + $0x128] sm:$0xff]  ;;  %v4457_v1 = vld [vmem:[%s8055_s7 + $0x120] sm:$0xff] }
0x167e   :  { %4308 = vmatprep.subr.bf16.mxu0 %v6223_v49  ;;  %4349 = vmatprep.subr.bf16.mxu1 %v6224_v42  ;;  %v4459_v49 = vld [vmem:[%s8055_s7 + $0x130] sm:$0xff] }
0x167f   :  { %v4455_v42 = vld [vmem:[%s8055_s7 + $0x110] sm:$0xff] }
0x1681   :  { %4309 = vmatpush1.bf16.msra.mxu0 %v6225_v2  ;;  %4350 = vmatpush1.bf16.msra.mxu1 %v6226_v43  ;;  %v4454_v2 = vld [vmem:[%s8055_s7 + $0x108] sm:$0xff]  ;;  %v4456_v43 = vld [vmem:[%s8055_s7 + $0x118] sm:$0xff] }
0x1682   :  { %4310 = vmatprep.subr.bf16.mxu0 %v6227_v54  ;;  %4351 = vmatprep.subr.bf16.mxu1 %v6228_v50  ;;  %v4452_v54 = vld [vmem:[%s8055_s7 + $0xf8] sm:$0xff]  ;;  %v4451_v50 = vld [vmem:[%s8055_s7 + $0xf0] sm:$0xff] }
0x1685   :  { %4311 = vmatpush1.bf16.msra.mxu0 %v6229_v59  ;;  %4352 = vmatpush1.bf16.msra.mxu1 %v6230_v0  ;;  %v4453_v59 = vld [vmem:[%s8055_s7 + $0x100] sm:$0xff] }
0x1686   :  { %4489 = vmatprep.subr.mxu0 %v4467_v48  ;;  %5362 = vmatprep.subr.mxu1 %v6301_v36  ;;  %v4449_v0 = vld [vmem:[%s8055_s7 + $0xe0] sm:$0xff] }
0x1728   :  { %v4201_v6 = vpop.f32.mrf.mxu0  ;;  %v4242_v7 = vpop.f32.mrf.mxu1 }
0x1729   :  { %v4253_v11 = vrot.slane %v4201_v6, 4  ;;  %v4255_v55 = vrot.slane %v4242_v7, 4  ;;  %v4448_v6 = vld [vmem:[%s8055_s7 + $0xd8] sm:$0xff]  ;;  %v4450_v7 = vld [vmem:[%s8055_s7 + $0xe8] sm:$0xff] }
0x172a   :  { %v4203_v12 = vpop.f32.mrf.mxu0  ;;  %v4244_v13 = vpop.f32.mrf.mxu1 }
0x172b   :  { %v4261_v14 = vadd.f32 %v4253_v11, %v7447_v52  ;;  %v4254_v15 = vrot.slane %v4203_v12, 4  ;;  %v4256_v37 = vrot.slane %v4244_v13, 4  ;;  %v4263_v58 = vadd.f32 %v4255_v55, %v7449_v25  ;;  %v4446_v11 = vld [vmem:[%s8055_s7 + $0xc8] sm:$0xff]  ;;  %v4445_v12 = vld [vmem:[%s8055_s7 + $0xc0] sm:$0xff]  ;;  %v4447_v13 = vld [vmem:[%s8055_s7 + $0xd0] sm:$0xff] }
0x172c   :  { %v4205_v16 = vpop.f32.mrf.mxu0  ;;  %v4246_v19 = vpop.f32.mrf.mxu1  ;;  %v4435_v55 = vld [vmem:[%s8055_s7 + $0x70] sm:$0xff] }
0x172d   :  { %v5290_v20 = vmul.f32 -1.442695, %v4261_v14  ;;  %v4262_v57 = vadd.f32 %v4254_v15, %v7451_v61  ;;  %v4264_v47 = vadd.f32 %v4256_v37, %v7453_v30  ;;  %v4443_v14 = vld [vmem:[%s8055_s7 + $0xb0] sm:$0xff]  ;;  %v4442_v15 = vld [vmem:[%s8055_s7 + $0xa8] sm:$0xff]  ;;  %v4444_v16 = vld [vmem:[%s8055_s7 + $0xb8] sm:$0xff] }
0x172e   :  { %v4206_v29 = vpop.f32.mrf.mxu0  ;;  %v4247_v23 = vpop.f32.mrf.mxu1  ;;  %v4440_v19 = vld [vmem:[%s8055_s7 + $0x98] sm:$0xff]  ;;  %v4434_v37 = vld [vmem:[%s8055_s7 + $0x68] sm:$0xff] }
0x172f   :  { %6099 = vpow2.f32 %v5290_v20  ;;  %v5291_v32 = vmul.f32 -1.442695, %v4262_v57  ;;  %v5292_v10 = vmul.f32 -1.442695, %v4264_v47  ;;  %v4439_v20 = vld [vmem:[%s8055_s7 + $0x90] sm:$0xff]  ;;  %v4441_v57 = vld [vmem:[%s8055_s7 + $0xa0] sm:$0xff] }
0x1730   :  { %v4437_v29 = vld [vmem:[%s8055_s7 + $0x80] sm:$0xff]  ;;  %v4436_v23 = vld [vmem:[%s8055_s7 + $0x78] sm:$0xff] }
0x1731   :  { %6101 = vpow2.f32 %v5291_v32  ;;  %v4438_v32 = vld [vmem:[%s8055_s7 + $0x88] sm:$0xff]  ;;  %v4433_v47 = vld [vmem:[%s8055_s7 + $0x60] sm:$0xff] }
0x1732   :  { %6103 = vpow2.f32 %v5292_v10  ;;  %v4431_v10 = vld [vmem:[%s8055_s7 + $0x50] sm:$0xff] }
0x173c   :  { %v6100_v53 = vpop.eup %6099 }
0x173d   :  { %v4268_v35 = vadd.f32 1.0, %v6100_v53  ;;  %v4430_v53 = vld [vmem:[%s8055_s7 + $0x48] sm:$0xff] }
0x173e   :  { %v6102_v60 = vpop.eup %6101 }
0x173f   :  { %6105 = vrcp.f32 %v4268_v35  ;;  %v4274_v28 = vadd.f32 1.0, %v6102_v60  ;;  %v6104_v17 = vpop.eup %6103  ;;  %v4428_v35 = vld [vmem:[%s8055_s7 + $0x38] sm:$0xff]  ;;  %v4427_v60 = vld [vmem:[%s8055_s7 + $0x30] sm:$0xff] }
0x1740   :  { %6107 = vtanh.f32 %v4263_v58  ;;  %v4281_v62 = vadd.f32 1.0, %v6104_v17  ;;  %v4432_v58 = vld [vmem:[%s8055_s7 + $0x58] sm:$0xff]  ;;  %v4425_v17 = vld [vmem:[%s8055_s7 + $0x20] sm:$0xff] }
0x1741   :  { %6109 = vrcp.f32 %v4274_v28  ;;  %v4429_v28 = vld [vmem:[%s8055_s7 + $0x40] sm:$0xff] }
0x1742   :  { %6111 = vrcp.f32 %v4281_v62  ;;  %v4423_v62 = vld [vmem:[%s8055_s7 + $0x10] sm:$0xff] }
0x174c   :  { %v6106_v56 = vpop.eup %6105 }
0x174d   :  { %v6108_v18 = vpop.eup %6107 }
0x174e   :  { %v6110_v63 = vpop.eup %6109  ;;  %v4288_v31 = vmul.f32 %v6108_v18, %v6106_v56  ;;  %v4424_v56 = vld [vmem:[%s8055_s7 + $0x18] sm:$0xff]  ;;  %v4426_v18 = vld [vmem:[%s8055_s7 + $0x28] sm:$0xff] }
0x174f   :  { %v4287_v4 = vmul.f32 %v6110_v63, %v4285_v51  ;;  %v6112_v34 = vpop.eup %6111  ;;  %v4422_v51 = vld [vmem:[%s8055_s7 + $0x8] sm:$0xff]  ;;  %v4421_v63 = vld [vmem:[%s8055_s7] sm:$0xff] }
0x1751   :  { %v7685_v22 = vadd.f32 %v4288_v31, %v4287_v4 }
0x1753   :  { %6113 = vtanh.f32 %v7685_v22 }
0x1760   :  { %v6114_v24 = vpop.eup %6113 }
0x1761   :  { %v4291_v5 = vmul.f32 %v6114_v24, %v6112_v34 }
0x1763   :  { %v4292_v9 = vpack.c.bf16 %v4291_v5, %v4291_v5 }
0x1765   :  { %v4294_v8 = vrot.slane %v4292_v9, 2 }
0x1767   :  { %4329 = vmatmul.mubr.bf16.vlgmr.msra.gmra.mxu0 %v4294_v8  ;;  %4370 = vmatmul.mubr.bf16.vlgmr.msra.gmra.mxu1 %v4294_v8 }
0x1768   :  { %4490 = vmatpush1.msra.mxu0 %v4466_v39  ;;  %5363 = vmatpush3.msra.mxu1 %v4468_v27 }
0x1769   :  { %4491 = vmatprep.subr.mxu0 %v4464_v45  ;;  %5364 = vmatprep.subr.mxu1 %v6301_v36 }
0x176a   :  { %4492 = vmatpush1.msra.mxu0 %v4463_v26  ;;  %5365 = vmatpush3.msra.mxu1 %v4465_v33 }
0x176b   :  { %4493 = vmatprep.subr.mxu0 %v4461_v21  ;;  %5366 = vmatprep.subr.mxu1 %v6301_v36 }
0x176c   :  { %4494 = vmatpush1.msra.mxu0 %v4460_v46  ;;  %5367 = vmatpush3.msra.mxu1 %v4462_v3 }
0x176d   :  { %4495 = vmatprep.subr.mxu0 %v4458_v38  ;;  %5368 = vmatprep.subr.mxu1 %v6301_v36 }
0x176e   :  { %4496 = vmatpush1.msra.mxu0 %v4457_v1  ;;  %5369 = vmatpush3.msra.mxu1 %v4459_v49 }
0x176f   :  { %4497 = vmatprep.subr.mxu0 %v4455_v42  ;;  %5370 = vmatprep.subr.mxu1 %v6301_v36 }
0x1770   :  { %4498 = vmatpush1.msra.mxu0 %v4454_v2  ;;  %5371 = vmatpush3.msra.mxu1 %v4456_v43 }
0x1771   :  { %4499 = vmatprep.subr.mxu0 %v4452_v54  ;;  %5372 = vmatprep.subr.mxu1 %v6301_v36 }
0x1772   :  { %4500 = vmatpush1.msra.mxu0 %v4451_v50  ;;  %5373 = vmatpush3.msra.mxu1 %v4453_v59  ;;  %v4414_v59 = vrot.slane %v7685_v22, 6  ;;  %v4645_v22 = vld [vmem:[%s8057_s9 + $0x70] sm:$0xff] }
0x1773   :  { %4501 = vmatprep.subr.mxu0 %v4449_v0  ;;  %5374 = vmatprep.subr.mxu1 %v6301_v36 }
0x1774   :  { %4502 = vmatpush1.msra.mxu0 %v4448_v6  ;;  %5375 = vmatpush3.msra.mxu1 %v4450_v7 }
0x1775   :  { %4503 = vmatprep.subr.mxu0 %v4446_v11  ;;  %5376 = vmatprep.subr.mxu1 %v6301_v36 }
0x1776   :  { %4504 = vmatpush1.msra.mxu0 %v4445_v12  ;;  %5377 = vmatpush3.msra.mxu1 %v4447_v13 }
0x1777   :  { %4505 = vmatprep.subr.mxu0 %v4443_v14  ;;  %5378 = vmatprep.subr.mxu1 %v6301_v36 }
0x1778   :  { %4506 = vmatpush1.msra.mxu0 %v4442_v15  ;;  %5379 = vmatpush3.msra.mxu1 %v4444_v16  ;;  %v4646_v15 = vld [vmem:[%s8057_s9 + $0x78] sm:$0xff]  ;;  %v4644_v16 = vld [vmem:[%s8057_s9 + $0x68] sm:$0xff] }
0x1779   :  { %4507 = vmatprep.subr.mxu0 %v4440_v19  ;;  %5380 = vmatprep.subr.mxu1 %v6301_v36  ;;  %v4643_v19 = vld [vmem:[%s8057_s9 + $0x60] sm:$0xff] }
0x177a   :  { %4508 = vmatpush1.msra.mxu0 %v4439_v20  ;;  %5381 = vmatpush3.msra.mxu1 %v4441_v57  ;;  %v4642_v20 = vld [vmem:[%s8057_s9 + $0x58] sm:$0xff]  ;;  %v4641_v57 = vld [vmem:[%s8057_s9 + $0x50] sm:$0xff] }
0x177b   :  { %4509 = vmatprep.subr.mxu0 %v4437_v29  ;;  %5382 = vmatprep.subr.mxu1 %v6301_v36  ;;  %v4640_v29 = vld [vmem:[%s8057_s9 + $0x48] sm:$0xff] }
0x177c   :  { %4510 = vmatpush1.msra.mxu0 %v4436_v23  ;;  %5383 = vmatpush3.msra.mxu1 %v4438_v32  ;;  %v4639_v23 = vld [vmem:[%s8057_s9 + $0x40] sm:$0xff]  ;;  %v4638_v32 = vld [vmem:[%s8057_s9 + $0x38] sm:$0xff] }
0x177d   :  { %4511 = vmatprep.subr.mxu0 %v4434_v37  ;;  %5384 = vmatprep.subr.mxu1 %v6301_v36  ;;  %v4637_v37 = vld [vmem:[%s8057_s9 + $0x30] sm:$0xff] }
0x177e   :  { %4512 = vmatpush1.msra.mxu0 %v4433_v47  ;;  %5385 = vmatpush3.msra.mxu1 %v4435_v55  ;;  %v4636_v47 = vld [vmem:[%s8057_s9 + $0x28] sm:$0xff]  ;;  %v4635_v55 = vld [vmem:[%s8057_s9 + $0x20] sm:$0xff] }
0x177f   :  { %4513 = vmatprep.subr.mxu0 %v4431_v10  ;;  %5386 = vmatprep.subr.mxu1 %v6301_v36  ;;  %v4634_v10 = vld [vmem:[%s8057_s9 + $0x18] sm:$0xff] }
0x1780   :  { %4514 = vmatpush1.msra.mxu0 %v4430_v53  ;;  %5387 = vmatpush3.msra.mxu1 %v4432_v58  ;;  %v4633_v53 = vld [vmem:[%s8057_s9 + $0x10] sm:$0xff]  ;;  %v4632_v58 = vld [vmem:[%s8057_s9 + $0x8] sm:$0xff] }
0x1781   :  { %4515 = vmatprep.subr.mxu0 %v4428_v35  ;;  %5388 = vmatprep.subr.mxu1 %v6301_v36  ;;  %v4631_v35 = vld [vmem:[%s8057_s9] sm:$0xff] }
0x1782   :  { %4516 = vmatpush1.msra.mxu0 %v4427_v60  ;;  %5389 = vmatpush3.msra.mxu1 %v4429_v28  ;;  %v7929_v60 = vld [vmem:[%s8056_s8] sm:$0x7] }
0x1783   :  { %4517 = vmatprep.subr.mxu0 %v4425_v17  ;;  %5390 = vmatprep.subr.mxu1 %v6301_v36  ;;  %v4474_v28 = vrot.slane %v7929_v60, %v6549_v41  ;;  %v4478_v17 = vrot.slane %v7929_v60, %v6554_v44  ;;  %v4725_v41 = vld [vmem:[%s8058_s10 + $0x8] sm:$0xff]  ;;  %v4724_v44 = vld [vmem:[%s8058_s10] sm:$0xff] }
0x1784   :  { %4518 = vmatpush1.msra.mxu0 %v4424_v56  ;;  %5391 = vmatpush3.msra.mxu1 %v4426_v18 }
0x1785   :  { %4519 = vmatprep.subr.mxu0 %v4422_v51  ;;  %5392 = vmatprep.subr.mxu1 %v6301_v36 }
0x1786   :  { %4520 = vmatpush1.msra.mxu0 %v4421_v63  ;;  %4553 = vmatprep.mubr.f32.mxu0 %v6301_v36 }
0x1787   :  { %5393 = vmatpush3.msra.mxu1 %v4423_v62  ;;  %5394 = vmatprep.mubr.msk.f32.mxu1 %vm6302_vm1, %v6301_v36 }
0x1788   :  { %5397 = vmatprep.subr.mxu0 %v6301_v36  ;;  %5432 = vmatprep.subr.mxu1 %v6301_v36 }
0x1827   :  { %v4330_v31 = vpop.f32.mrf.mxu0  ;;  %v4371_v4 = vpop.f32.mrf.mxu1 }
0x1828   :  { %v4382_v34 = vrot.slane %v4330_v31, 2  ;;  %v4384_v38 = vrot.slane %v4371_v4, 2 }
0x1829   :  { %v4332_v24 = vpop.f32.mrf.mxu0  ;;  %v4373_v5 = vpop.f32.mrf.mxu1 }
0x182a   :  { %v4390_v9 = vadd.f32 %v4382_v34, %v7447_v52  ;;  %v4383_v8 = vrot.slane %v4332_v24, 2  ;;  %v4385_v46 = vrot.slane %v4373_v5, 2  ;;  %v4392_v42 = vadd.f32 %v4384_v38, %v7449_v25  ;;  %v4891_v38 = vld [vmem:[%s8060_s12 + $0x70] sm:$0xff] }
0x182b   :  { %v4334_v48 = vpop.f32.mrf.mxu0  ;;  %v4375_v39 = vpop.f32.mrf.mxu1 }
0x182c   :  { %v5293_v27 = vmul.f32 -1.442695, %v4390_v9  ;;  %v4391_v45 = vadd.f32 %v4383_v8, %v7451_v61  ;;  %v4393_v3 = vadd.f32 %v4385_v46, %v7453_v30 }
0x182d   :  { %v4335_v26 = vpop.f32.mrf.mxu0  ;;  %v4376_v33 = vpop.f32.mrf.mxu1 }
0x182e   :  { %6115 = vpow2.f32 %v5293_v27  ;;  %v5294_v21 = vmul.f32 -1.442695, %v4391_v45  ;;  %v5295_v1 = vmul.f32 -1.442695, %v4393_v3  ;;  %v4802_v27 = vld [vmem:[%s8059_s11 + $0x8] sm:$0xff]  ;;  %v4801_v45 = vld [vmem:[%s8059_s11] sm:$0xff] }
0x182f   :  { %v4892_v3 = vld [vmem:[%s8060_s12 + $0x78] sm:$0xff] }
0x1830   :  { %6117 = vpow2.f32 %v5294_v21 }
0x1831   :  { %6119 = vpow2.f32 %v5295_v1  ;;  %v4890_v1 = vld [vmem:[%s8060_s12 + $0x68] sm:$0xff] }
0x183b   :  { %v6116_v49 = vpop.eup %6115 }
0x183c   :  { %v4397_v52 = vadd.f32 1.0, %v6116_v49  ;;  %v4889_v49 = vld [vmem:[%s8060_s12 + $0x60] sm:$0xff] }
0x183d   :  { %v6118_v2 = vpop.eup %6117 }
0x183e   :  { %6121 = vrcp.f32 %v4397_v52  ;;  %v4403_v43 = vadd.f32 1.0, %v6118_v2  ;;  %v6120_v61 = vpop.eup %6119  ;;  %v4887_v52 = vld [vmem:[%s8060_s12 + $0x50] sm:$0xff]  ;;  %v4886_v2 = vld [vmem:[%s8060_s12 + $0x48] sm:$0xff] }
0x183f   :  { %6123 = vtanh.f32 %v4392_v42  ;;  %v4410_v6 = vadd.f32 1.0, %v6120_v61  ;;  %v4888_v42 = vld [vmem:[%s8060_s12 + $0x58] sm:$0xff] }
0x1840   :  { %6125 = vrcp.f32 %v4403_v43  ;;  %v4885_v43 = vld [vmem:[%s8060_s12 + $0x40] sm:$0xff]  ;;  %v4884_v61 = vld [vmem:[%s8060_s12 + $0x38] sm:$0xff] }
0x1841   :  { %6127 = vrcp.f32 %v4410_v6  ;;  %v4879_v6 = vld [vmem:[%s8060_s12 + $0x10] sm:$0xff] }
0x184b   :  { %v6122_v54 = vpop.eup %6121 }
0x184c   :  { %v6124_v50 = vpop.eup %6123 }
0x184d   :  { %v6126_v0 = vpop.eup %6125  ;;  %v4417_v30 = vmul.f32 %v6124_v50, %v6122_v54  ;;  %v4883_v54 = vld [vmem:[%s8060_s12 + $0x30] sm:$0xff]  ;;  %v4882_v50 = vld [vmem:[%s8060_s12 + $0x28] sm:$0xff] }
0x184e   :  { %v4416_v7 = vmul.f32 %v6126_v0, %v4414_v59  ;;  %v6128_v25 = vpop.eup %6127  ;;  %v4881_v59 = vld [vmem:[%s8060_s12 + $0x20] sm:$0xff]  ;;  %v4880_v0 = vld [vmem:[%s8060_s12 + $0x18] sm:$0xff] }
0x1850   :  { %v4418_v11 = vadd.f32 %v4417_v30, %v4416_v7  ;;  %v4878_v30 = vld [vmem:[%s8060_s12 + $0x8] sm:$0xff]  ;;  %v4877_v7 = vld [vmem:[%s8060_s12] sm:$0xff] }
0x1852   :  { %6129 = vtanh.f32 %v4418_v11  ;;  %v4966_v11 = vld [vmem:[%s8061_s13 + $0x18] sm:$0xff] }
0x185f   :  { %v6130_v12 = vpop.eup %6129 }
0x1860   :  { %v4420_v13 = vmul.f32 %v6130_v12, %v6128_v25  ;;  %v4965_v25 = vld [vmem:[%s8061_s13 + $0x10] sm:$0xff]  ;;  %v4964_v12 = vld [vmem:[%s8061_s13 + $0x8] sm:$0xff] }
0x1862   :  { %v4487_v14 = vrot.slane %v4420_v13, 6  ;;  %v4482_v13 = vrot.slane %v7929_v60, %v6547_v40 }
0x1864   :  { %4554 = vmatmul.mubr.f32.vlgmr.msra.gmra.mxu0 %v4487_v14  ;;  %5395 = vmatmul.mubr.f32.vlgmr.msra.gmra.mxu1 %v4487_v14 }
0x1865   :  { %5398 = vmatpush3.msra.mxu0 %v4646_v15  ;;  %5429 = vmatprep.mubr.msk.f32.mxu0 %vm6302_vm1, %v6301_v36 }
0x1866   :  { %5399 = vmatprep.subr.mxu0 %v6301_v36  ;;  %5436 = vmatprep.mubr.msk.f32.mxu1 %vm6302_vm1, %v6301_v36 }
0x1867   :  { %5400 = vmatpush3.msra.mxu0 %v4645_v22  ;;  %5433 = vmatpush3.msra.mxu1 %v4725_v41 }
0x1868   :  { %5401 = vmatprep.subr.mxu0 %v6301_v36  ;;  %5434 = vmatprep.subr.mxu1 %v6301_v36 }
0x1869   :  { %5402 = vmatpush3.msra.mxu0 %v4644_v16  ;;  %5435 = vmatpush3.msra.mxu1 %v4724_v44 }
0x186a   :  { %5403 = vmatprep.subr.mxu0 %v6301_v36  ;;  %5439 = vmatprep.subr.mxu1 %v6301_v36 }
0x186b   :  { %5404 = vmatpush3.msra.mxu0 %v4643_v19  ;;  %v4963_v19 = vld [vmem:[%s8061_s13] sm:$0xff] }
0x186c   :  { %5405 = vmatprep.subr.mxu0 %v6301_v36 }
0x186d   :  { %5406 = vmatpush3.msra.mxu0 %v4642_v20 }
0x186e   :  { %5407 = vmatprep.subr.mxu0 %v6301_v36 }
0x186f   :  { %5408 = vmatpush3.msra.mxu0 %v4641_v57 }
0x1870   :  { %5409 = vmatprep.subr.mxu0 %v6301_v36 }
0x1871   :  { %5410 = vmatpush3.msra.mxu0 %v4640_v29 }
0x1872   :  { %5411 = vmatprep.subr.mxu0 %v6301_v36 }
0x1873   :  { %5412 = vmatpush3.msra.mxu0 %v4639_v23 }
0x1874   :  { %5413 = vmatprep.subr.mxu0 %v6301_v36 }
0x1875   :  { %5414 = vmatpush3.msra.mxu0 %v4638_v32 }
0x1876   :  { %5415 = vmatprep.subr.mxu0 %v6301_v36 }
0x1877   :  { %5416 = vmatpush3.msra.mxu0 %v4637_v37 }
0x1878   :  { %5417 = vmatprep.subr.mxu0 %v6301_v36 }
0x1879   :  { %5418 = vmatpush3.msra.mxu0 %v4636_v47 }
0x187a   :  { %5419 = vmatprep.subr.mxu0 %v6301_v36 }
0x187b   :  { %5420 = vmatpush3.msra.mxu0 %v4635_v55 }
0x187c   :  { %5421 = vmatprep.subr.mxu0 %v6301_v36 }
0x187d   :  { %5422 = vmatpush3.msra.mxu0 %v4634_v10 }
0x187e   :  { %5423 = vmatprep.subr.mxu0 %v6301_v36 }
0x187f   :  { %5424 = vmatpush3.msra.mxu0 %v4633_v53 }
0x1880   :  { %5425 = vmatprep.subr.mxu0 %v6301_v36 }
0x1881   :  { %5426 = vmatpush3.msra.mxu0 %v4632_v58 }
0x1882   :  { %5427 = vmatprep.subr.mxu0 %v6301_v36 }
0x1883   :  { %5428 = vmatpush3.msra.mxu0 %v4631_v35 }
0x1884   :  { %5481 = vmatprep.subr.mxu0 %v6301_v36 }
0x1924   :  { %v4555_v56 = vpop.f32.mrf.mxu0  ;;  %v7935_v18 = vpop.f32.mrf.mxu1 }
0x1925   :  { %v4556_v62 = vadd.f32 %v4555_v56, %v4474_v28  ;;  %v4627_v14 = vadd.f32 %v7935_v18, %v4482_v13 }
0x1926   :  { %v4557_v51 = vpop.f32.mrf.mxu0  ;;  %v5396_v63 = vpop.f32.mrf.mxu1 }
0x1927   :  { %v4558_v31 = vadd.f32 %v4557_v51, %v4478_v17 }
0x1929   :  { %v4630_v4 = vmul.f32 %v4558_v31, %v4556_v62 }
0x192b   :  { %5430 = vmatmul.mubr.f32.vlgmr.msra.gmra.mxu0 %v4630_v4 }
0x192c   :  { %5489 = vmatprep.mubr.msk.f32.mxu0 %vm6302_vm1, %v6301_v36  ;;  %5482 = vmatpush3.msra.mxu0 %v4966_v11 }
0x192d   :  { %5483 = vmatprep.subr.mxu0 %v6301_v36 }
0x192e   :  { %5484 = vmatpush3.msra.mxu0 %v4965_v25 }
0x192f   :  { %5485 = vmatprep.subr.mxu0 %v6301_v36 }
0x1930   :  { %5486 = vmatpush3.msra.mxu0 %v4964_v12 }
0x1931   :  { %5487 = vmatprep.subr.mxu0 %v6301_v36 }
0x1932   :  { %5488 = vmatpush3.msra.mxu0 %v4963_v19 }
0x19eb   :  { %v4713_v34 = vpop.f32.mrf.mxu0 }
0x19ec   :  { %v4718_v24 = vsel %vm4717_vm2, %v4713_v34, -inf }
0x19ed   :  { %v5431_v5 = vpop.f32.mrf.mxu0  ;;  %4719 = vmax.xlane.f32.xlu0 %v4718_v24 }
0x1a76   :  { %v4720_v9 = vpop.xlane.xlu0 %4719 }
0x1a77   :  { %v4721_v8 = vsub.f32 %v4713_v34, %v4720_v9 }
0x1a79   :  { %v4722_v48 = vmul.f32 1.442695, %v4721_v8 }
0x1a7b   :  { %6131 = vpow2.f32 %v4722_v48 }
0x1a88   :  { %v6132_v39 = vpop.eup %6131 }
0x1a89   :  { %5437 = vmatmul.mubr.msk.f32.vlgmr.msra.gmra.mxu1 %vm145_vm0, %v6132_v39 }
0x1a8a   :  { %5443 = vmatprep.mubr.msk.f32.mxu1 %vm6302_vm1, %v6301_v36  ;;  %5440 = vmatpush3.msra.mxu1 %v4802_v27 }
0x1a8b   :  { %5441 = vmatprep.subr.mxu1 %v6301_v36 }
0x1a8c   :  { %5442 = vmatpush3.msra.mxu1 %v4801_v45 }
0x1a8d   :  { %5446 = vmatprep.subr.mxu1 %v6301_v36 }
0x1b49   :  { %v4795_v26 = vpop.f32.mrf.mxu1 }
0x1b4a   :  { %6133 = vrcp.f32 %v4795_v26 }
0x1b4b   :  { %v5438_v33 = vpop.f32.mrf.mxu1 }
0x1b57   :  { %v6134_v21 = vpop.eup %6133 }
0x1b58   :  { %v4800_v46 = vmul.f32 %v6134_v21, %v6132_v39 }
0x1b5a   :  { %5444 = vmatmul.mubr.msk.f32.vlgmr.msra.gmra.mxu1 %vm145_vm0, %v4800_v46 }
0x1b5b   :  { %5447 = vmatpush3.msra.mxu1 %v4892_v3  ;;  %5478 = vmatprep.mubr.msk.f32.mxu1 %vm6302_vm1, %v6301_v36 }
0x1b5c   :  { %5448 = vmatprep.subr.mxu1 %v6301_v36 }
0x1b5d   :  { %5449 = vmatpush3.msra.mxu1 %v4891_v38 }
0x1b5e   :  { %5450 = vmatprep.subr.mxu1 %v6301_v36 }
0x1b5f   :  { %5451 = vmatpush3.msra.mxu1 %v4890_v1 }
0x1b60   :  { %5452 = vmatprep.subr.mxu1 %v6301_v36 }
0x1b61   :  { %5453 = vmatpush3.msra.mxu1 %v4889_v49 }
0x1b62   :  { %5454 = vmatprep.subr.mxu1 %v6301_v36 }
0x1b63   :  { %5455 = vmatpush3.msra.mxu1 %v4888_v42 }
0x1b64   :  { %5456 = vmatprep.subr.mxu1 %v6301_v36 }
0x1b65   :  { %5457 = vmatpush3.msra.mxu1 %v4887_v52 }
0x1b66   :  { %5458 = vmatprep.subr.mxu1 %v6301_v36 }
0x1b67   :  { %5459 = vmatpush3.msra.mxu1 %v4886_v2 }
0x1b68   :  { %5460 = vmatprep.subr.mxu1 %v6301_v36 }
0x1b69   :  { %5461 = vmatpush3.msra.mxu1 %v4885_v43 }
0x1b6a   :  { %5462 = vmatprep.subr.mxu1 %v6301_v36 }
0x1b6b   :  { %5463 = vmatpush3.msra.mxu1 %v4884_v61 }
0x1b6c   :  { %5464 = vmatprep.subr.mxu1 %v6301_v36 }
0x1b6d   :  { %5465 = vmatpush3.msra.mxu1 %v4883_v54 }
0x1b6e   :  { %5466 = vmatprep.subr.mxu1 %v6301_v36 }
0x1b6f   :  { %5467 = vmatpush3.msra.mxu1 %v4882_v50 }
0x1b70   :  { %5468 = vmatprep.subr.mxu1 %v6301_v36 }
0x1b71   :  { %5469 = vmatpush3.msra.mxu1 %v4881_v59 }
0x1b72   :  { %5470 = vmatprep.subr.mxu1 %v6301_v36 }
0x1b73   :  { %5471 = vmatpush3.msra.mxu1 %v4880_v0 }
0x1b74   :  { %5472 = vmatprep.subr.mxu1 %v6301_v36 }
0x1b75   :  { %5473 = vmatpush3.msra.mxu1 %v4879_v6 }
0x1b76   :  { %5474 = vmatprep.subr.mxu1 %v6301_v36 }
0x1b77   :  { %5475 = vmatpush3.msra.mxu1 %v4878_v30 }
0x1b78   :  { %5476 = vmatprep.subr.mxu1 %v6301_v36  ;;  %v5298_v36 = vld [vmem:[%s8062_s14] ss:$0 sm:$0xff] }
0x1b79   :  { %5477 = vmatpush3.msra.mxu1 %v4877_v7 }
0x1c1a   :  { %v4872_v15 = vpop.f32.mrf.mxu1 }
0x1c1b   :  { %v4876_v22 = vmul.f32 %v4872_v15, %v4627_v14 }
0x1c1c   :  { %v5445_v16 = vpop.f32.mrf.mxu1 }
0x1c1d   :  { %5479 = vmatmul.mubr.f32.vlgmr.msra.gmra.mxu1 %v4876_v22 }
0x1cdd   :  { %v4959_v20 = vpop.f32.mrf.mxu1 }
0x1cde   :  { %5490 = vmatmul.mubr.msk.f32.vlgmr.msra.gmra.mxu0 %vm4974_vm3, %v4959_v20 }
0x1cdf   :  { %v5480_v57 = vpop.f32.mrf.mxu1 }
0x1d9e   :  { %v5044_v40 = vpop.f32.mrf.mxu0 }
0x1d9f   :  { %v5045_v29 = vadd.f32 %v5298_v36, %v5044_v40 }
0x1da0   :  { %v5491_v23 = vpop.f32.mrf.mxu0 }
0x1da1   :  { %5049 = vst.msk [vmem:[%s8063_s15] sm:$0x3] %vm5048_vm4, %v5045_v29 }
0x1da2   :  { %5054 = vsyncpa [#allocation4], 1 }
0x1da3   :  { %5055 = vsyncpa [#allocation6], 1 }

</bundles_post_ra>
